<compile_context>
chip_gen: v7x
topology: tpu7x:2x2x1
jax: 0.10.0
libtpu: 0.0.40
codegen_flags: <defaults>
</compile_context>

<pallas_src>
import jax
import jax.numpy as jnp
from jax.experimental import pallas as pl
from jax.experimental.pallas import tpu as pltpu


def mlp_kernel(x_ref,
               w1_ref, b1_ref,
               w2_ref, b2_ref,
               w3_ref, b3_ref,
               w4_ref, b4_ref,
               w5_ref, b5_ref,
               o_ref):
    """Fused 5-layer MLP on one (batch_tile, ...) slab.

    Dots take bf16 operands (MXU bf16 path) and accumulate in f32; bias adds and
    ReLU run in f32 on the VPU; activations are cast back to bf16 only to feed
    the next matmul.
    """
    cdt = w1_ref.dtype  # compute (MXU-input) dtype, bf16

    def dense(h, w_ref, b_ref):
        return jnp.dot(h, w_ref[...], preferred_element_type=jnp.float32) + b_ref[...]

    h = x_ref[...]                                              # (tile, in_dim) bf16
    h = jnp.maximum(dense(h, w1_ref, b1_ref), 0.0).astype(cdt)  # -> 1024
    h = jnp.maximum(dense(h, w2_ref, b2_ref), 0.0).astype(cdt)  # -> 512
    h = jnp.maximum(dense(h, w3_ref, b3_ref), 0.0).astype(cdt)  # -> 256
    h = jnp.maximum(dense(h, w4_ref, b4_ref), 0.0).astype(cdt)  # -> 256
    o_ref[...] = dense(h, w5_ref, b5_ref).astype(o_ref.dtype)   # -> out (padded), f32


def net_forward(x, params, *, batch_tile=256, compute_dtype=jnp.bfloat16):
    """x: (B, in_dim) float32. params: list of (W, b) with W (in, out), b (1, out).

    Returns (B, out_dim) float32. Batch is zero-padded to a multiple of
    `batch_tile`; the last layer is padded to a 128-lane multiple; both paddings
    are sliced off before returning.
    """
    B, in_dim = x.shape
    out_dim = params[-1][0].shape[1]

    # ---- pad batch to a tile multiple and output features to 128 lanes -------
    b_pad = ((B + batch_tile - 1) // batch_tile) * batch_tile
    out_pad = ((out_dim + 127) // 128) * 128

    x_p = x if b_pad == B else jnp.pad(x, ((0, b_pad - B), (0, 0)))
    x_p = x_p.astype(compute_dtype)

    ws, bs = [], []
    n_layers = len(params)
    for li, (w, b) in enumerate(params):
        if li == n_layers - 1 and out_pad != out_dim:
            w = jnp.pad(w, ((0, 0), (0, out_pad - out_dim)))
            b = jnp.pad(b, ((0, 0), (0, out_pad - out_dim)))
        ws.append(w.astype(compute_dtype))   # bf16 -> MXU path, half the DMA bytes
        bs.append(b.astype(jnp.float32))     # biases stay f32

    flat_params = []
    for w, b in zip(ws, bs):
        flat_params += [w, b]

    # Weights / biases are resident: constant index map, full-array blocks.
    def resident(arr):
        return pl.BlockSpec(arr.shape, lambda i: (0, 0))

    in_specs = [pl.BlockSpec((batch_tile, in_dim), lambda i: (i, 0))]
    for w, b in zip(ws, bs):
        in_specs.append(resident(w))
        in_specs.append(resident(b))

    out_specs = pl.BlockSpec((batch_tile, out_pad), lambda i: (i, 0))

    # Cost estimate: 5 GEMMs over the padded batch.
    dims = [in_dim] + [w.shape[1] for w in ws]
    flops = 2 * b_pad * sum(k * n for k, n in zip(dims[:-1], dims[1:]))
    bytes_accessed = (
        x_p.size * x_p.dtype.itemsize
        + sum(a.size * a.dtype.itemsize for a in flat_params)
        + b_pad * out_pad * 4
    )

    out = pl.pallas_call(
        mlp_kernel,
        out_shape=jax.ShapeDtypeStruct((b_pad, out_pad), jnp.float32),
        grid_spec=pltpu.PrefetchScalarGridSpec(
            num_scalar_prefetch=0,
            grid=(b_pad // batch_tile,),
            in_specs=in_specs,
            out_specs=out_specs,
        ),
        compiler_params=pltpu.CompilerParams(
            dimension_semantics=("parallel",),
            vmem_limit_bytes=32 * 1024 * 1024,
        ),
        cost_estimate=pl.CostEstimate(
            flops=flops, transcendentals=0, bytes_accessed=bytes_accessed),
    )(x_p, *flat_params)

    return out[:B, :out_dim]


def init_params(key, in_dim, out_dim):
    """Deterministic init matching the layer sizes of the PyTorch Net."""
    n_filters = 1024
    dims = [in_dim, n_filters, n_filters // 2, n_filters // 4, n_filters // 4, out_dim]
    params = []
    for li in range(len(dims) - 1):
        key, kw, kb = jax.random.split(key, 3)
        fan_in = dims[li]
        bound = 1.0 / jnp.sqrt(fan_in)
        w = jax.random.uniform(kw, (dims[li], dims[li + 1]),
                               minval=-bound, maxval=bound, dtype=jnp.float32)
        b = jax.random.uniform(kb, (1, dims[li + 1]),
                               minval=-bound, maxval=bound, dtype=jnp.float32)
        params.append((w, b))
    return params


def reference_forward_mixed(x, params, compute_dtype=jnp.bfloat16):
    """Pure-JAX reference mirroring the kernel's precision (bf16 in, f32 acc)."""
    h = x.astype(compute_dtype)
    for i, (w, b) in enumerate(params):
        h = jnp.dot(h, w.astype(compute_dtype),
                    preferred_element_type=jnp.float32) + b
        if i < len(params) - 1:
            h = jnp.maximum(h, 0.0).astype(compute_dtype)
    return h


def reference_forward_f32(x, params):
    h = x
    for i, (w, b) in enumerate(params):
        h = h @ w + b
        if i < len(params) - 1:
            h = jnp.maximum(h, 0.0)
    return h


if __name__ == "__main__":
    in_dim, out_dim, batch = 32, 8, 16

    key = jax.random.PRNGKey(0)
    key, kx = jax.random.split(key)
    x = jax.random.normal(kx, (batch, in_dim), dtype=jnp.float32)
    params = init_params(key, in_dim, out_dim)

    out = net_forward(x, params)          # batch_tile=256 default; batch padded internally
    out = jax.block_until_ready(out)
    assert out.shape == (batch, out_dim)

    # Tight check vs. a precision-mirrored reference (bf16 inputs, f32 accumulation).
    ref_mixed = reference_forward_mixed(x, params)
    assert jnp.allclose(out, ref_mixed, atol=1e-2, rtol=1e-2), "mismatch vs mixed-precision reference"

    # Loose sanity check vs. the full-f32 reference (semantic match to the PyTorch Net).
    ref_f32 = reference_forward_f32(x, params)
    assert jnp.allclose(out, ref_f32, atol=1e-1, rtol=1e-1), "mismatch vs f32 reference"

    print("KERNEL_OK")
</pallas_src>

<mosaic_0001>
module attributes {stable_mosaic.version = 11 : i64} {
  func.func @mlp_kernel(%arg0: i32, %arg1: memref<256x32xbf16, #tpu.memory_space<vmem>>, %arg2: memref<32x1024xbf16, #tpu.memory_space<vmem>>, %arg3: memref<1x1024xf32, #tpu.memory_space<vmem>>, %arg4: memref<1024x512xbf16, #tpu.memory_space<vmem>>, %arg5: memref<1x512xf32, #tpu.memory_space<vmem>>, %arg6: memref<512x256xbf16, #tpu.memory_space<vmem>>, %arg7: memref<1x256xf32, #tpu.memory_space<vmem>>, %arg8: memref<256x256xbf16, #tpu.memory_space<vmem>>, %arg9: memref<1x256xf32, #tpu.memory_space<vmem>>, %arg10: memref<256x128xbf16, #tpu.memory_space<vmem>>, %arg11: memref<1x128xf32, #tpu.memory_space<vmem>>, %arg12: memref<256x128xf32, #tpu.memory_space<vmem>>) attributes {dimension_semantics = [#tpu.dimension_semantics<parallel>], iteration_bounds = array<i64: 1>, scalar_prefetch = 0 : i64, scratch_operands = 0 : i64, tpu.core_type = #tpu.core_type<tc>, window_params = [{transform_indices = @transform_0, window_bounds = array<i64: 256, 32>}, {pipeline_mode = #tpu.pipeline_mode<synchronous>, transform_indices = @transform_1, window_bounds = array<i64: 32, 1024>}, {pipeline_mode = #tpu.pipeline_mode<synchronous>, transform_indices = @transform_2, window_bounds = array<i64: 1, 1024>}, {pipeline_mode = #tpu.pipeline_mode<synchronous>, transform_indices = @transform_3, window_bounds = array<i64: 1024, 512>}, {pipeline_mode = #tpu.pipeline_mode<synchronous>, transform_indices = @transform_4, window_bounds = array<i64: 1, 512>}, {pipeline_mode = #tpu.pipeline_mode<synchronous>, transform_indices = @transform_5, window_bounds = array<i64: 512, 256>}, {pipeline_mode = #tpu.pipeline_mode<synchronous>, transform_indices = @transform_6, window_bounds = array<i64: 1, 256>}, {pipeline_mode = #tpu.pipeline_mode<synchronous>, transform_indices = @transform_7, window_bounds = array<i64: 256, 256>}, {pipeline_mode = #tpu.pipeline_mode<synchronous>, transform_indices = @transform_8, window_bounds = array<i64: 1, 256>}, {pipeline_mode = #tpu.pipeline_mode<synchronous>, transform_indices = @transform_9, window_bounds = array<i64: 256, 128>}, {pipeline_mode = #tpu.pipeline_mode<synchronous>, transform_indices = @transform_10, window_bounds = array<i64: 1, 128>}, {transform_indices = @transform_11, window_bounds = array<i64: 256, 128>}]} {
    %c0 = arith.constant 0 : index
    %c0_0 = arith.constant 0 : index
    %0 = vector.load %arg1[%c0, %c0_0] : memref<256x32xbf16, #tpu.memory_space<vmem>>, vector<256x32xbf16>
    %c0_1 = arith.constant 0 : index
    %c0_2 = arith.constant 0 : index
    %1 = vector.load %arg2[%c0_1, %c0_2] : memref<32x1024xbf16, #tpu.memory_space<vmem>>, vector<32x1024xbf16>
    %cst = arith.constant dense<0.000000e+00> : vector<256x1024xf32>
    %2 = tpu.matmul %0, %1, %cst {dimension_numbers = #tpu.dot_dimension_numbers<[1], [0], [0], [1], [0, 0, 1, 1], [], []>} : vector<256x32xbf16>, vector<32x1024xbf16>, vector<256x1024xf32> -> vector<256x1024xf32>
    %c0_3 = arith.constant 0 : index
    %c0_4 = arith.constant 0 : index
    %3 = vector.load %arg3[%c0_3, %c0_4] : memref<1x1024xf32, #tpu.memory_space<vmem>>, vector<1x1024xf32>
    %4 = vector.broadcast %3 : vector<1x1024xf32> to vector<256x1024xf32>
    %5 = arith.addf %2, %4 : vector<256x1024xf32>
    %cst_5 = arith.constant 0.000000e+00 : f32
    %6 = vector.broadcast %cst_5 : f32 to vector<256x1024xf32>
    %7 = arith.maximumf %5, %6 : vector<256x1024xf32>
    %8 = arith.truncf %7 : vector<256x1024xf32> to vector<256x1024xbf16>
    %c0_6 = arith.constant 0 : index
    %c0_7 = arith.constant 0 : index
    %9 = vector.load %arg4[%c0_6, %c0_7] : memref<1024x512xbf16, #tpu.memory_space<vmem>>, vector<1024x512xbf16>
    %cst_8 = arith.constant dense<0.000000e+00> : vector<256x512xf32>
    %10 = tpu.matmul %8, %9, %cst_8 {dimension_numbers = #tpu.dot_dimension_numbers<[1], [0], [0], [1], [0, 0, 1, 1], [], []>} : vector<256x1024xbf16>, vector<1024x512xbf16>, vector<256x512xf32> -> vector<256x512xf32>
    %c0_9 = arith.constant 0 : index
    %c0_10 = arith.constant 0 : index
    %11 = vector.load %arg5[%c0_9, %c0_10] : memref<1x512xf32, #tpu.memory_space<vmem>>, vector<1x512xf32>
    %12 = vector.broadcast %11 : vector<1x512xf32> to vector<256x512xf32>
    %13 = arith.addf %10, %12 : vector<256x512xf32>
    %cst_11 = arith.constant 0.000000e+00 : f32
    %14 = vector.broadcast %cst_11 : f32 to vector<256x512xf32>
    %15 = arith.maximumf %13, %14 : vector<256x512xf32>
    %16 = arith.truncf %15 : vector<256x512xf32> to vector<256x512xbf16>
    %c0_12 = arith.constant 0 : index
    %c0_13 = arith.constant 0 : index
    %17 = vector.load %arg6[%c0_12, %c0_13] : memref<512x256xbf16, #tpu.memory_space<vmem>>, vector<512x256xbf16>
    %cst_14 = arith.constant dense<0.000000e+00> : vector<256x256xf32>
    %18 = tpu.matmul %16, %17, %cst_14 {dimension_numbers = #tpu.dot_dimension_numbers<[1], [0], [0], [1], [0, 0, 1, 1], [], []>} : vector<256x512xbf16>, vector<512x256xbf16>, vector<256x256xf32> -> vector<256x256xf32>
    %c0_15 = arith.constant 0 : index
    %c0_16 = arith.constant 0 : index
    %19 = vector.load %arg7[%c0_15, %c0_16] : memref<1x256xf32, #tpu.memory_space<vmem>>, vector<1x256xf32>
    %20 = vector.broadcast %19 : vector<1x256xf32> to vector<256x256xf32>
    %21 = arith.addf %18, %20 : vector<256x256xf32>
    %cst_17 = arith.constant 0.000000e+00 : f32
    %22 = vector.broadcast %cst_17 : f32 to vector<256x256xf32>
    %23 = arith.maximumf %21, %22 : vector<256x256xf32>
    %24 = arith.truncf %23 : vector<256x256xf32> to vector<256x256xbf16>
    %c0_18 = arith.constant 0 : index
    %c0_19 = arith.constant 0 : index
    %25 = vector.load %arg8[%c0_18, %c0_19] : memref<256x256xbf16, #tpu.memory_space<vmem>>, vector<256x256xbf16>
    %cst_20 = arith.constant dense<0.000000e+00> : vector<256x256xf32>
    %26 = tpu.matmul %24, %25, %cst_20 {dimension_numbers = #tpu.dot_dimension_numbers<[1], [0], [0], [1], [0, 0, 1, 1], [], []>} : vector<256x256xbf16>, vector<256x256xbf16>, vector<256x256xf32> -> vector<256x256xf32>
    %c0_21 = arith.constant 0 : index
    %c0_22 = arith.constant 0 : index
    %27 = vector.load %arg9[%c0_21, %c0_22] : memref<1x256xf32, #tpu.memory_space<vmem>>, vector<1x256xf32>
    %28 = vector.broadcast %27 : vector<1x256xf32> to vector<256x256xf32>
    %29 = arith.addf %26, %28 : vector<256x256xf32>
    %cst_23 = arith.constant 0.000000e+00 : f32
    %30 = vector.broadcast %cst_23 : f32 to vector<256x256xf32>
    %31 = arith.maximumf %29, %30 : vector<256x256xf32>
    %32 = arith.truncf %31 : vector<256x256xf32> to vector<256x256xbf16>
    %c0_24 = arith.constant 0 : index
    %c0_25 = arith.constant 0 : index
    %33 = vector.load %arg10[%c0_24, %c0_25] : memref<256x128xbf16, #tpu.memory_space<vmem>>, vector<256x128xbf16>
    %cst_26 = arith.constant dense<0.000000e+00> : vector<256x128xf32>
    %34 = tpu.matmul %32, %33, %cst_26 {dimension_numbers = #tpu.dot_dimension_numbers<[1], [0], [0], [1], [0, 0, 1, 1], [], []>} : vector<256x256xbf16>, vector<256x128xbf16>, vector<256x128xf32> -> vector<256x128xf32>
    %c0_27 = arith.constant 0 : index
    %c0_28 = arith.constant 0 : index
    %35 = vector.load %arg11[%c0_27, %c0_28] : memref<1x128xf32, #tpu.memory_space<vmem>>, vector<1x128xf32>
    %36 = vector.broadcast %35 : vector<1x128xf32> to vector<256x128xf32>
    %37 = arith.addf %34, %36 : vector<256x128xf32>
    %c0_29 = arith.constant 0 : index
    %c0_30 = arith.constant 0 : index
    %38 = vector.load %arg12[%c0_29, %c0_30] : memref<256x128xf32, #tpu.memory_space<vmem>>, vector<256x128xf32>
    tpu.vector_store %arg12[%c0_29, %c0_30], %37 {strides = array<i32>} : memref<256x128xf32, #tpu.memory_space<vmem>>, vector<256x128xf32>,
    return
  }
  func.func @transform_0(%arg0: i32) -> (i32, i32) {
    %c0_i32 = arith.constant 0 : i32
    %c0_i32_0 = arith.constant 0 : i32
    return %arg0, %c0_i32 : i32, i32
  }
  func.func @transform_1(%arg0: i32) -> (i32, i32) {
    %c0_i32 = arith.constant 0 : i32
    %c0_i32_0 = arith.constant 0 : i32
    %c0_i32_1 = arith.constant 0 : i32
    return %c0_i32, %c0_i32_0 : i32, i32
  }
  func.func @transform_2(%arg0: i32) -> (i32, i32) {
    %c0_i32 = arith.constant 0 : i32
    %c0_i32_0 = arith.constant 0 : i32
    %c0_i32_1 = arith.constant 0 : i32
    return %c0_i32, %c0_i32_0 : i32, i32
  }
  func.func @transform_3(%arg0: i32) -> (i32, i32) {
    %c0_i32 = arith.constant 0 : i32
    %c0_i32_0 = arith.constant 0 : i32
    %c0_i32_1 = arith.constant 0 : i32
    return %c0_i32, %c0_i32_0 : i32, i32
  }
  func.func @transform_4(%arg0: i32) -> (i32, i32) {
    %c0_i32 = arith.constant 0 : i32
    %c0_i32_0 = arith.constant 0 : i32
    %c0_i32_1 = arith.constant 0 : i32
    return %c0_i32, %c0_i32_0 : i32, i32
  }
  func.func @transform_5(%arg0: i32) -> (i32, i32) {
    %c0_i32 = arith.constant 0 : i32
    %c0_i32_0 = arith.constant 0 : i32
    %c0_i32_1 = arith.constant 0 : i32
    return %c0_i32, %c0_i32_0 : i32, i32
  }
  func.func @transform_6(%arg0: i32) -> (i32, i32) {
    %c0_i32 = arith.constant 0 : i32
    %c0_i32_0 = arith.constant 0 : i32
    %c0_i32_1 = arith.constant 0 : i32
    return %c0_i32, %c0_i32_0 : i32, i32
  }
  func.func @transform_7(%arg0: i32) -> (i32, i32) {
    %c0_i32 = arith.constant 0 : i32
    %c0_i32_0 = arith.constant 0 : i32
    %c0_i32_1 = arith.constant 0 : i32
    return %c0_i32, %c0_i32_0 : i32, i32
  }
  func.func @transform_8(%arg0: i32) -> (i32, i32) {
    %c0_i32 = arith.constant 0 : i32
    %c0_i32_0 = arith.constant 0 : i32
    %c0_i32_1 = arith.constant 0 : i32
    return %c0_i32, %c0_i32_0 : i32, i32
  }
  func.func @transform_9(%arg0: i32) -> (i32, i32) {
    %c0_i32 = arith.constant 0 : i32
    %c0_i32_0 = arith.constant 0 : i32
    %c0_i32_1 = arith.constant 0 : i32
    return %c0_i32, %c0_i32_0 : i32, i32
  }
  func.func @transform_10(%arg0: i32) -> (i32, i32) {
    %c0_i32 = arith.constant 0 : i32
    %c0_i32_0 = arith.constant 0 : i32
    %c0_i32_1 = arith.constant 0 : i32
    return %c0_i32, %c0_i32_0 : i32, i32
  }
  func.func @transform_11(%arg0: i32) -> (i32, i32) {
    %c0_i32 = arith.constant 0 : i32
    %c0_i32_0 = arith.constant 0 : i32
    return %arg0, %c0_i32 : i32, i32
  }
}

</mosaic_0001>

<bundles_post_ra>
// kernel: tpu_custom_call.1
= control target key start
LH: loop header
LB: loop body
LE: loop exit
PB: predicated region body
PF: predicated region fallthrough
CT: control target
= control target key end

     0   :  { %16 = vsyncpa [#allocation3], 0  ;;  %s10172_s0 = inlined_call_operand.vmem [shape: bf16[256,32], index: 0, kind: input, shape index: {}]   ;;  %s10173_s1 = inlined_call_operand.vmem [shape: bf16[32,1024], index: 1, kind: input, shape index: {}]   ;;  %s10174_s2 = inlined_call_operand.vmem [shape: f32[1,1024], index: 2, kind: input, shape index: {}]   ;;  %s10175_s3 = inlined_call_operand.hbm [shape: bf16[1024,512], index: 3, kind: input, shape index: {}]   ;;  %s10176_s4 = inlined_call_operand.vmem [shape: f32[1,512], index: 4, kind: input, shape index: {}]   ;;  %s10177_s5 = inlined_call_operand.hbm [shape: bf16[512,256], index: 5, kind: input, shape index: {}]   ;;  %s10178_s6 = inlined_call_operand.vmem [shape: f32[1,256], index: 6, kind: input, shape index: {}]   ;;  %s10179_s7 = inlined_call_operand.hbm [shape: bf16[256,256], index: 7, kind: input, shape index: {}]   ;;  %s10180_s8 = inlined_call_operand.vmem [shape: f32[1,256], index: 8, kind: input, shape index: {}]   ;;  %s10181_s9 = inlined_call_operand.hbm [shape: bf16[256,128], index: 9, kind: input, shape index: {}]   ;;  %s10182_s10 = inlined_call_operand.vmem [shape: f32[1,128], index: 10, kind: input, shape index: {}]   ;;  %s10183_s11 = inlined_call_operand.hbm [shape: f32[256,128], index: 11, kind: output, shape index: {}]  }
   0x1   :  { %17 = vsyncpa [#allocation6], 0 }
   0x2   :  { %18 = vsyncpa [#allocation9], 0 }
   0x3   :  { %19 = vsyncpa [#allocation4], 0  ;;  %s8470_s17 = smov [#allocation5]   ;;  %s8352_s21 = scalar_lea.hbm %s10177_s5, 8192 }
   0x4   :  { %s45_s18 = sshll.u32 %s8470_s17, 4  ;;  %p8353_p0 = scmp.ne.s32.totalorder %s10177_s5, %s8352_s21  ;;  %s46_s18 = int_to_ptr.vmem [resolvable:$true] %s45_s18 }
   0x5   :  { %p8356_p1 = scmp.lt.u32.totalorder %s8352_s21, %s10177_s5 }
   0x7   :  { %p8358_p2 = pnand %p8356_p1, %p8353_p0 }
   0x9   :  { %8361 = shalt.err (!%p8358_p2)
}
   0xa   :  { %s8362_s26 = scalar_lea.vmem %s46_s18, 8192  ;;  %p8367_p4 = scmp.lt.s32.totalorder %s46_s18, %s46_s18 }
   0xb   :  { %p8363_p3 = scmp.ne.s32.totalorder %s46_s18, %s8362_s26  ;;  %p8368_p5 = scmp.lt.s32.totalorder %s8362_s26, %s8362_s26 }
   0xd   :  { %p8369_p6 = por %p8368_p5, %p8367_p4 }
   0xf   :  { %p8370_p7 = pnand %p8369_p6, %p8363_p3 }
  0x11   :  { %8373 = shalt.err (!%p8370_p7)
}
  0x12   :  { %s8471_s27 = smov 128   ;;  %s8472_s28 = smov 8  }
  0x13   :  { %51 = dma.hbm_to_vmem [thread:$0]  %s10177_s5, 8192, %s46_s18, [#allocation6], %s8471_s27, %s8471_s27, %s8472_s28  }
  0x14   :  { %s8473_s12 = smov [#allocation2]   ;;  %s8374_s16 = scalar_lea.hbm %s10175_s3, 32768 }
  0x15   :  { %s31_s13 = sshll.u32 %s8473_s12, 4  ;;  %p8375_p8 = scmp.ne.s32.totalorder %s10175_s3, %s8374_s16  ;;  %s32_s13 = int_to_ptr.vmem [resolvable:$true] %s31_s13 }
  0x16   :  { %p8378_p9 = scmp.lt.u32.totalorder %s8374_s16, %s10175_s3 }
  0x18   :  { %p8380_p10 = pnand %p8378_p9, %p8375_p8 }
  0x1a   :  { %8383 = shalt.err (!%p8380_p10)
}
  0x1b   :  { %s8384_s22 = scalar_lea.vmem %s32_s13, 32768  ;;  %p8389_p12 = scmp.lt.s32.totalorder %s32_s13, %s32_s13 }
  0x1c   :  { %p8385_p11 = scmp.ne.s32.totalorder %s32_s13, %s8384_s22  ;;  %p8390_p13 = scmp.lt.s32.totalorder %s8384_s22, %s8384_s22 }
  0x1e   :  { %p8391_p0 = por %p8390_p13, %p8389_p12 }
  0x20   :  { %p8392_p1 = pnand %p8391_p0, %p8385_p11 }
  0x22   :  { %8395 = shalt.err (!%p8392_p1)
}
  0x23   :  { %s8474_s5 = smov 256   ;;  %s8475_s18 = smov 16  }
  0x24   :  { %37 = dma.hbm_to_vmem [thread:$0]  %s10175_s3, 32768, %s32_s13, [#allocation3], %s8474_s5, %s8474_s5, %s8475_s18  }
  0x25   :  { %s8476_s25 = smov [#allocation7]   ;;  %s8477_s29 = smov [#allocation8]  }
  0x26   :  { %s59_s26 = sshll.u32 %s8476_s25, 4  ;;  %s73_s30 = sshll.u32 %s8477_s29, 4  ;;  %s60_s26 = int_to_ptr.vmem [resolvable:$true] %s59_s26  ;;  %s8569_s30 = int_to_ptr.vmem [resolvable:$true] %s73_s30 }
  0x27   :  { %s8396_s15 = scalar_lea.hbm %s10179_s7, 4096 }
  0x28   :  { %p8397_p2 = scmp.ne.s32.totalorder %s10179_s7, %s8396_s15  ;;  %p8400_p3 = scmp.lt.u32.totalorder %s8396_s15, %s10179_s7 }
  0x2a   :  { %p8402_p4 = pnand %p8400_p3, %p8397_p2 }
  0x2c   :  { %8405 = shalt.err (!%p8402_p4)
}
  0x2d   :  { %s8406_s3 = scalar_lea.vmem %s60_s26, 4096  ;;  %p8411_p6 = scmp.lt.s32.totalorder %s60_s26, %s60_s26 }
  0x2e   :  { %p8407_p5 = scmp.ne.s32.totalorder %s60_s26, %s8406_s3  ;;  %p8412_p7 = scmp.lt.s32.totalorder %s8406_s3, %s8406_s3 }
  0x30   :  { %p8413_p8 = por %p8412_p7, %p8411_p6 }
  0x32   :  { %p8414_p9 = pnand %p8413_p8, %p8407_p5 }
  0x34   :  { %8417 = shalt.err (!%p8414_p9)
}
  0x35   :  { %65 = dma.hbm_to_vmem [thread:$0]  %s10179_s7, 4096, %s60_s26, [#allocation6], %s8471_s27, %s8471_s27, %s8472_s28  }
  0x36   :  { %s8418_s18 = scalar_lea.hbm %s10181_s9, 2048 }
  0x37   :  { %p8419_p10 = scmp.ne.s32.totalorder %s10181_s9, %s8418_s18  ;;  %p8422_p11 = scmp.lt.u32.totalorder %s8418_s18, %s10181_s9 }
  0x39   :  { %p8424_p12 = pnand %p8422_p11, %p8419_p10 }
  0x3b   :  { %8427 = shalt.err (!%p8424_p12)
}
  0x3c   :  { %s8428_s12 = scalar_lea.vmem %s8569_s30, 2048  ;;  %p8433_p0 = scmp.lt.s32.totalorder %s8569_s30, %s8569_s30 }
  0x3d   :  { %p8429_p13 = scmp.ne.s32.totalorder %s8569_s30, %s8428_s12  ;;  %p8434_p1 = scmp.lt.s32.totalorder %s8428_s12, %s8428_s12 }
  0x3f   :  { %p8435_p2 = por %p8434_p1, %p8433_p0 }
  0x41   :  { %p8436_p3 = pnand %p8435_p2, %p8429_p13 }
  0x43   :  { %8439 = shalt.err (!%p8436_p3)
}
  0x44   :  { %s8478_s7 = smov 64   ;;  %s8479_s26 = smov 4  }
  0x45   :  { %79 = dma.hbm_to_vmem [thread:$0]  %s10181_s9, 2048, %s8569_s30, [#allocation9], %s8478_s7, %s8478_s7, %s8479_s26  }
  0x46   :  { %8462 = dma.done.wait [#allocation3], 32768  }
  0x47   :  { %8463 = vsyncadd [#allocation3], 4294934528 }
  0x48   :  { %8464 = dma.done.wait [#allocation6], 12288  }
  0x49   :  { %8465 = vsyncadd [#allocation6], 4294955008 }
  0x4a   :  { %8466 = dma.done.wait [#allocation9], 2048  }
  0x4b   :  { %8467 = vsyncadd [#allocation9], 4294965248  ;;  %v8480_v0 = vmov 0   ;;  %v127_v1 = vld [vmem:[%s10173_s1] sm:$0xff]  ;;  %v128_v3 = vld [vmem:[%s10173_s1 + $0x8] sm:$0xff]  ;;  %vm345_vm0 = vcmask 261120  }
  0x4c   :  { %426 = vmatprep.mubr.bf16.mxu0 %v8480_v0  ;;  %619 = vmatprep.mubr.bf16.mxu1 %v8480_v0  ;;  %v131_v2 = vld [vmem:[%s10173_s1 + $0x20] sm:$0xff]  ;;  %v132_v5 = vld [vmem:[%s10173_s1 + $0x28] sm:$0xff]  ;;  %v129_v15 = vld [vmem:[%s10173_s1 + $0x10] sm:$0xff] }
  0x4d   :  { %v6579_v4 = vcombine.high %v127_v1, %v131_v2  ;;  %v6578_v6 = vcombine.low %v127_v1, %v131_v2  ;;  %v135_v7 = vld [vmem:[%s10173_s1 + $0x40] sm:$0xff]  ;;  %v6581_v9 = vcombine.high %v128_v3, %v132_v5  ;;  %v6580_v10 = vcombine.low %v128_v3, %v132_v5  ;;  %v136_v12 = vld [vmem:[%s10173_s1 + $0x48] sm:$0xff]  ;;  %v133_v17 = vld [vmem:[%s10173_s1 + $0x30] sm:$0xff] }
  0x4e   :  { %v139_v8 = vld [vmem:[%s10173_s1 + $0x60] sm:$0xff]  ;;  %v140_v13 = vld [vmem:[%s10173_s1 + $0x68] sm:$0xff]  ;;  %v6583_v19 = vcombine.high %v129_v15, %v133_v17  ;;  %v6582_v21 = vcombine.low %v129_v15, %v133_v17  ;;  %v137_v22 = vld [vmem:[%s10173_s1 + $0x50] sm:$0xff] }
  0x4f   :  { %v6587_v11 = vcombine.high %v135_v7, %v139_v8  ;;  %394 = vmatprep.subr.bf16.mxu0 %v6579_v4  ;;  %v6589_v14 = vcombine.high %v136_v12, %v140_v13  ;;  %587 = vmatprep.subr.bf16.mxu1 %v6581_v9  ;;  %v6586_v16 = vcombine.low %v135_v7, %v139_v8  ;;  %v8638_v20 = vld [vmem:[%s10172_s0] sm:$0xff]   ;;  %v141_v23 = vld [vmem:[%s10173_s1 + $0x70] sm:$0xff]  ;;  %v8655_v26 = vld [vmem:[%s10172_s0 + $0x8] sm:$0xff]  }
  0x50   :  { %395 = vmatpush1.bf16.msra.mxu0 %v6578_v6  ;;  %588 = vmatpush1.bf16.msra.mxu1 %v6580_v10  ;;  %v6588_v18 = vcombine.low %v136_v12, %v140_v13  ;;  %v6590_v24 = vcombine.low %v137_v22, %v141_v23  ;;  %v6591_v25 = vcombine.high %v137_v22, %v141_v23  ;;  %v130_v27 = vld [vmem:[%s10173_s1 + $0x18] sm:$0xff]  ;;  %v7809_v34 = vld [vmem:[#allocation2 + $0x4] ss:$16 sps:$4 sm:$0xff]   ;;  %v8711_v39 = vld [vmem:[%s10172_s0 + $0x28] sm:$0xff]  }
  0x51   :  { %396 = vmatprep.subr.bf16.mxu0 %v6587_v11  ;;  %589 = vmatprep.subr.bf16.mxu1 %v6589_v14  ;;  %v134_v28 = vld [vmem:[%s10173_s1 + $0x38] sm:$0xff]  ;;  %v8678_v35 = vld [vmem:[%s10172_s0 + $0x10] sm:$0xff]   ;;  %v8700_v38 = vld [vmem:[%s10172_s0 + $0x20] sm:$0xff]  }
  0x52   :  { %v138_v29 = vld [vmem:[%s10173_s1 + $0x58] sm:$0xff]  ;;  %v6584_v30 = vcombine.low %v130_v27, %v134_v28  ;;  %v6585_v31 = vcombine.high %v130_v27, %v134_v28  ;;  %v8722_v40 = vld [vmem:[%s10172_s0 + $0x30] sm:$0xff]   ;;  %v8744_v42 = vld [vmem:[%s10172_s0 + $0x40] sm:$0xff]  }
  0x53   :  { %v142_v32 = vld [vmem:[%s10173_s1 + $0x78] sm:$0xff]  ;;  %v8755_v44 = vld [vmem:[%s10172_s0 + $0x48] sm:$0xff]   ;;  %v8766_v45 = vld [vmem:[%s10172_s0 + $0x50] sm:$0xff]  }
  0x54   :  { %397 = vmatpush1.bf16.msra.mxu0 %v6586_v16  ;;  %590 = vmatpush1.bf16.msra.mxu1 %v6588_v18  ;;  %v6593_v33 = vcombine.high %v138_v29, %v142_v32  ;;  %v6592_v36 = vcombine.low %v138_v29, %v142_v32  ;;  %v8689_v37 = vld [vmem:[%s10172_s0 + $0x18] sm:$0xff]   ;;  %v8788_v47 = vld [vmem:[%s10172_s0 + $0x60] sm:$0xff]   ;;  %v8799_v48 = vld [vmem:[%s10172_s0 + $0x68] sm:$0xff]  }
  0x55   :  { %780 = vmatprep.subr.bf16.mxu0 %v6583_v19  ;;  %973 = vmatprep.subr.bf16.mxu1 %v6585_v31  ;;  %v8733_v41 = vld [vmem:[%s10172_s0 + $0x38] sm:$0xff]   ;;  %v8810_v49 = vld [vmem:[%s10172_s0 + $0x70] sm:$0xff]  }
  0x56   :  { %v7836_v43 = vld [vmem:[#allocation2 + $0xc] ss:$16 sps:$4 sm:$0xff]   ;;  %v7807_v51 = vld [vmem:[#allocation2] ss:$16 sps:$4 sm:$0xff]   ;;  %v7812_v52 = vld [vmem:[#allocation2 + $0x24] ss:$16 sps:$4 sm:$0xff]  }
  0x57   :  { %6594 = vmatmul.mubr.msk.bf16.vlgmr.msra.gmra.mrb[0].mxu0 %vm345_vm0, %v8638_v20  ;;  %6610 = vmatmul.mubr.msk.bf16.vlgmr.msra.gmra.mrb[0].mxu1 %vm345_vm0, %v8638_v20  ;;  %v8777_v46 = vld [vmem:[%s10172_s0 + $0x58] sm:$0xff]   ;;  %v7810_v55 = vld [vmem:[#allocation2 + $0x20] ss:$16 sps:$4 sm:$0xff]   ;;  %v7815_v56 = vld [vmem:[#allocation2 + $0x44] ss:$16 sps:$4 sm:$0xff]  }
  0x58   :  { %781 = vmatpush1.bf16.msra.mxu0 %v6582_v21  ;;  %436 = vmatprep.mubr.bf16.mxu0 %v8480_v0  ;;  %v8821_v50 = vld [vmem:[%s10172_s0 + $0x78] sm:$0xff]   ;;  %v7813_v59 = vld [vmem:[#allocation2 + $0x40] ss:$16 sps:$4 sm:$0xff]   ;;  %v7818_v60 = vld [vmem:[#allocation2 + $0x64] ss:$16 sps:$4 sm:$0xff]  }
  0x59   :  { %629 = vmatprep.mubr.bf16.mxu1 %v8480_v0  ;;  %782 = vmatprep.subr.bf16.mxu0 %v6591_v25  ;;  %v7834_v53 = vld [vmem:[#allocation2 + $0x8] ss:$16 sps:$4 sm:$0xff]   ;;  %v7839_v54 = vld [vmem:[#allocation2 + $0x2c] ss:$16 sps:$4 sm:$0xff]   ;;  %v7816_v63 = vld [vmem:[#allocation2 + $0x60] ss:$16 sps:$4 sm:$0xff]  }
  0x5a   :  { %974 = vmatpush1.bf16.msra.mxu1 %v6584_v30  ;;  %v7837_v57 = vld [vmem:[#allocation2 + $0x28] ss:$16 sps:$4 sm:$0xff]   ;;  %v7845_v58 = vld [vmem:[#allocation2 + $0x4c] ss:$16 sps:$4 sm:$0xff]   ;;  %v7821_v1 = vld [vmem:[#allocation2 + $0x84] ss:$16 sps:$4 sm:$0xff]  }
  0x5b   :  { %975 = vmatprep.subr.bf16.mxu1 %v6593_v33  ;;  %v7843_v61 = vld [vmem:[#allocation2 + $0x48] ss:$16 sps:$4 sm:$0xff]   ;;  %v7848_v62 = vld [vmem:[#allocation2 + $0x6c] ss:$16 sps:$4 sm:$0xff]   ;;  %v7819_v4 = vld [vmem:[#allocation2 + $0x80] ss:$16 sps:$4 sm:$0xff]  }
  0x5c   :  { %783 = vmatpush1.bf16.msra.mxu0 %v6590_v24  ;;  %v7846_v2 = vld [vmem:[#allocation2 + $0x68] ss:$16 sps:$4 sm:$0xff]   ;;  %v7854_v3 = vld [vmem:[#allocation2 + $0x8c] ss:$16 sps:$4 sm:$0xff]   ;;  %v7824_v5 = vld [vmem:[#allocation2 + $0xa4] ss:$16 sps:$4 sm:$0xff]  }
  0x5d   :  { %3108 = vmatprep.subr.bf16.mxu0 %v7809_v34  ;;  %v7852_v6 = vld [vmem:[#allocation2 + $0x88] ss:$16 sps:$4 sm:$0xff]   ;;  %v7857_v7 = vld [vmem:[#allocation2 + $0xac] ss:$16 sps:$4 sm:$0xff]   ;;  %v7822_v8 = vld [vmem:[#allocation2 + $0xa0] ss:$16 sps:$4 sm:$0xff]  }
  0x5e   :  { %976 = vmatpush1.bf16.msra.mxu1 %v6592_v36  ;;  %v7827_v9 = vld [vmem:[#allocation2 + $0xc4] ss:$16 sps:$4 sm:$0xff]   ;;  %v7855_v10 = vld [vmem:[#allocation2 + $0xa8] ss:$16 sps:$4 sm:$0xff]   ;;  %v7863_v11 = vld [vmem:[#allocation2 + $0xcc] ss:$16 sps:$4 sm:$0xff]  }
  0x5f   :  { %6595 = vmatmul.mubr.msk.bf16.gmra.mrb[4].mxu0 %vm345_vm0, %v8655_v26  ;;  %6611 = vmatmul.mubr.msk.bf16.gmra.mrb[4].mxu1 %vm345_vm0, %v8655_v26  ;;  %v7825_v12 = vld [vmem:[#allocation2 + $0xc0] ss:$16 sps:$4 sm:$0xff]   ;;  %v7830_v13 = vld [vmem:[#allocation2 + $0xe4] ss:$16 sps:$4 sm:$0xff]   ;;  %v7861_v14 = vld [vmem:[#allocation2 + $0xc8] ss:$16 sps:$4 sm:$0xff]  }
  0x60   :  { %446 = vmatprep.mubr.bf16.mxu0 %v8480_v0  ;;  %639 = vmatprep.mubr.bf16.mxu1 %v8480_v0  ;;  %v7866_v15 = vld [vmem:[#allocation2 + $0xec] ss:$16 sps:$4 sm:$0xff]   ;;  %v7828_v16 = vld [vmem:[#allocation2 + $0xe0] ss:$16 sps:$4 sm:$0xff]   ;;  %v7833_v17 = vld [vmem:[#allocation2 + $0x104] ss:$16 sps:$4 sm:$0xff]  }
  0x61   :  { %3880 = vmatprep.subr.bf16.mxu1 %v7836_v43  ;;  %v7864_v18 = vld [vmem:[#allocation2 + $0xe8] ss:$16 sps:$4 sm:$0xff]   ;;  %v7872_v19 = vld [vmem:[#allocation2 + $0x10c] ss:$16 sps:$4 sm:$0xff]   ;;  %v7842_v21 = vld [vmem:[#allocation2 + $0x124] ss:$16 sps:$4 sm:$0xff]  }
  0x62   :  { %v7870_v22 = vld [vmem:[#allocation2 + $0x108] ss:$16 sps:$4 sm:$0xff]   ;;  %v7875_v23 = vld [vmem:[#allocation2 + $0x12c] ss:$16 sps:$4 sm:$0xff]   ;;  %v7840_v24 = vld [vmem:[#allocation2 + $0x120] ss:$16 sps:$4 sm:$0xff]  }
  0x63   :  { %v7851_v25 = vld [vmem:[#allocation2 + $0x144] ss:$16 sps:$4 sm:$0xff]   ;;  %v7881_v27 = vld [vmem:[#allocation2 + $0x14c] ss:$16 sps:$4 sm:$0xff]   ;;  %v7849_v28 = vld [vmem:[#allocation2 + $0x140] ss:$16 sps:$4 sm:$0xff]  }
  0x64   :  { %v7860_v29 = vld [vmem:[#allocation2 + $0x164] ss:$16 sps:$4 sm:$0xff]   ;;  %v7879_v30 = vld [vmem:[#allocation2 + $0x148] ss:$16 sps:$4 sm:$0xff]   ;;  %v7884_v31 = vld [vmem:[#allocation2 + $0x16c] ss:$16 sps:$4 sm:$0xff]  }
  0x65   :  { %v7858_v32 = vld [vmem:[#allocation2 + $0x160] ss:$16 sps:$4 sm:$0xff]   ;;  %v7869_v33 = vld [vmem:[#allocation2 + $0x184] ss:$16 sps:$4 sm:$0xff]   ;;  %v7882_v34 = vld [vmem:[#allocation2 + $0x168] ss:$16 sps:$4 sm:$0xff]  }
  0x66   :  { %v7867_v36 = vld [vmem:[#allocation2 + $0x180] ss:$16 sps:$4 sm:$0xff]  }
  0x67   :  { %6596 = vmatmul.mubr.msk.bf16.gmra.mrb[8].mxu0 %vm345_vm0, %v8678_v35  ;;  %6612 = vmatmul.mubr.msk.bf16.gmra.mrb[8].mxu1 %vm345_vm0, %v8678_v35  ;;  %v7876_v43 = vld [vmem:[#allocation2 + $0x1a0] ss:$16 sps:$4 sm:$0xff]  }
  0x68   :  { %456 = vmatprep.mubr.bf16.mxu0 %v8480_v0  ;;  %649 = vmatprep.mubr.bf16.mxu1 %v8480_v0 }
  0x6f   :  { %6597 = vmatmul.mubr.msk.bf16.gmra.mrb[12].mxu0 %vm345_vm0, %v8689_v37  ;;  %6613 = vmatmul.mubr.msk.bf16.gmra.mrb[12].mxu1 %vm345_vm0, %v8689_v37 }
  0x70   :  { %466 = vmatprep.mubr.bf16.mxu0 %v8480_v0  ;;  %659 = vmatprep.mubr.bf16.mxu1 %v8480_v0 }
  0x77   :  { %6598 = vmatmul.mubr.msk.bf16.gmra.mrb[16].mxu0 %vm345_vm0, %v8700_v38  ;;  %6614 = vmatmul.mubr.msk.bf16.gmra.mrb[16].mxu1 %vm345_vm0, %v8700_v38 }
  0x78   :  { %476 = vmatprep.mubr.bf16.mxu0 %v8480_v0  ;;  %669 = vmatprep.mubr.bf16.mxu1 %v8480_v0 }
  0x7f   :  { %6599 = vmatmul.mubr.msk.bf16.gmra.mrb[20].mxu0 %vm345_vm0, %v8711_v39  ;;  %6615 = vmatmul.mubr.msk.bf16.gmra.mrb[20].mxu1 %vm345_vm0, %v8711_v39 }
  0x80   :  { %486 = vmatprep.mubr.bf16.mxu0 %v8480_v0  ;;  %679 = vmatprep.mubr.bf16.mxu1 %v8480_v0 }
  0x87   :  { %6600 = vmatmul.mubr.msk.bf16.gmra.mrb[24].mxu0 %vm345_vm0, %v8722_v40  ;;  %6616 = vmatmul.mubr.msk.bf16.gmra.mrb[24].mxu1 %vm345_vm0, %v8722_v40 }
  0x88   :  { %496 = vmatprep.mubr.bf16.mxu0 %v8480_v0  ;;  %689 = vmatprep.mubr.bf16.mxu1 %v8480_v0 }
  0x8f   :  { %6601 = vmatmul.mubr.msk.bf16.gmra.mrb[28].mxu0 %vm345_vm0, %v8733_v41  ;;  %6617 = vmatmul.mubr.msk.bf16.gmra.mrb[28].mxu1 %vm345_vm0, %v8733_v41 }
  0x90   :  { %506 = vmatprep.mubr.bf16.mxu0 %v8480_v0  ;;  %699 = vmatprep.mubr.bf16.mxu1 %v8480_v0 }
  0x97   :  { %6602 = vmatmul.mubr.msk.bf16.gmra.mrb[32].mxu0 %vm345_vm0, %v8744_v42  ;;  %6618 = vmatmul.mubr.msk.bf16.gmra.mrb[32].mxu1 %vm345_vm0, %v8744_v42 }
  0x98   :  { %516 = vmatprep.mubr.bf16.mxu0 %v8480_v0  ;;  %709 = vmatprep.mubr.bf16.mxu1 %v8480_v0 }
  0x9f   :  { %6603 = vmatmul.mubr.msk.bf16.gmra.mrb[36].mxu0 %vm345_vm0, %v8755_v44  ;;  %6619 = vmatmul.mubr.msk.bf16.gmra.mrb[36].mxu1 %vm345_vm0, %v8755_v44 }
  0xa0   :  { %526 = vmatprep.mubr.bf16.mxu0 %v8480_v0  ;;  %719 = vmatprep.mubr.bf16.mxu1 %v8480_v0 }
  0xa7   :  { %6604 = vmatmul.mubr.msk.bf16.gmra.mrb[40].mxu0 %vm345_vm0, %v8766_v45  ;;  %6620 = vmatmul.mubr.msk.bf16.gmra.mrb[40].mxu1 %vm345_vm0, %v8766_v45 }
  0xa8   :  { %536 = vmatprep.mubr.bf16.mxu0 %v8480_v0  ;;  %729 = vmatprep.mubr.bf16.mxu1 %v8480_v0 }
  0xaf   :  { %6605 = vmatmul.mubr.msk.bf16.gmra.mrb[44].mxu0 %vm345_vm0, %v8777_v46  ;;  %6621 = vmatmul.mubr.msk.bf16.gmra.mrb[44].mxu1 %vm345_vm0, %v8777_v46 }
  0xb0   :  { %546 = vmatprep.mubr.bf16.mxu0 %v8480_v0  ;;  %739 = vmatprep.mubr.bf16.mxu1 %v8480_v0 }
  0xb7   :  { %6606 = vmatmul.mubr.msk.bf16.gmra.mrb[48].mxu0 %vm345_vm0, %v8788_v47  ;;  %6622 = vmatmul.mubr.msk.bf16.gmra.mrb[48].mxu1 %vm345_vm0, %v8788_v47 }
  0xb8   :  { %556 = vmatprep.mubr.bf16.mxu0 %v8480_v0  ;;  %749 = vmatprep.mubr.bf16.mxu1 %v8480_v0 }
  0xbf   :  { %6607 = vmatmul.mubr.msk.bf16.gmra.mrb[52].mxu0 %vm345_vm0, %v8799_v48  ;;  %6623 = vmatmul.mubr.msk.bf16.gmra.mrb[52].mxu1 %vm345_vm0, %v8799_v48 }
  0xc0   :  { %566 = vmatprep.mubr.bf16.mxu0 %v8480_v0  ;;  %759 = vmatprep.mubr.bf16.mxu1 %v8480_v0 }
  0xc7   :  { %6608 = vmatmul.mubr.msk.bf16.gmra.mrb[56].mxu0 %vm345_vm0, %v8810_v49  ;;  %6624 = vmatmul.mubr.msk.bf16.gmra.mrb[56].mxu1 %vm345_vm0, %v8810_v49 }
  0xc8   :  { %576 = vmatprep.mubr.bf16.mxu0 %v8480_v0  ;;  %769 = vmatprep.mubr.bf16.mxu1 %v8480_v0 }
  0xcf   :  { %6609 = vmatmul.mubr.msk.bf16.gmra.mrb[60].mxu0 %vm345_vm0, %v8821_v50  ;;  %6625 = vmatmul.mubr.msk.bf16.gmra.mrb[60].mxu1 %vm345_vm0, %v8821_v50 }
  0xd0   :  { %812 = vmatprep.mubr.bf16.mxu0 %v8480_v0  ;;  %1005 = vmatprep.mubr.bf16.mxu1 %v8480_v0 }
  0xd7   :  { %6626 = vmatmul.mubr.msk.bf16.vlgmr.msra.gmra.mrb[64].mxu0 %vm345_vm0, %v8638_v20  ;;  %6642 = vmatmul.mubr.msk.bf16.vlgmr.msra.gmra.mrb[64].mxu1 %vm345_vm0, %v8638_v20  ;;  %v7831_v20 = vld [vmem:[#allocation2 + $0x100] ss:$16 sps:$4 sm:$0xff]  }
  0xd8   :  { %3109 = vmatpush1.bf16.msra.mxu0 %v7807_v51  ;;  %822 = vmatprep.mubr.bf16.mxu0 %v8480_v0  ;;  %v7887_v51 = vld [vmem:[#allocation2 + $0x1c4] ss:$16 sps:$4 sm:$0xff]  }
  0xd9   :  { %1015 = vmatprep.mubr.bf16.mxu1 %v8480_v0  ;;  %3110 = vmatprep.subr.bf16.mxu0 %v7812_v52  ;;  %v7891_v52 = vld [vmem:[#allocation2 + $0x1a8] ss:$16 sps:$4 sm:$0xff]  }
  0xda   :  { %3881 = vmatpush1.bf16.msra.mxu1 %v7834_v53  ;;  %v7899_v53 = vld [vmem:[#allocation2 + $0x1cc] ss:$16 sps:$4 sm:$0xff]  }
  0xdb   :  { %3882 = vmatprep.subr.bf16.mxu1 %v7839_v54  ;;  %v7885_v54 = vld [vmem:[#allocation2 + $0x1c0] ss:$16 sps:$4 sm:$0xff]  }
  0xdc   :  { %3111 = vmatpush1.bf16.msra.mxu0 %v7810_v55  ;;  %v7896_v55 = vld [vmem:[#allocation2 + $0x1e4] ss:$16 sps:$4 sm:$0xff]  }
  0xdd   :  { %3112 = vmatprep.subr.bf16.mxu0 %v7815_v56  ;;  %v7897_v56 = vld [vmem:[#allocation2 + $0x1c8] ss:$16 sps:$4 sm:$0xff]  }
  0xde   :  { %3883 = vmatpush1.bf16.msra.mxu1 %v7837_v57  ;;  %v7894_v57 = vld [vmem:[#allocation2 + $0x1e0] ss:$16 sps:$4 sm:$0xff]  }
  0xdf   :  { %6627 = vmatmul.mubr.msk.bf16.gmra.mrb[68].mxu0 %vm345_vm0, %v8655_v26  ;;  %3884 = vmatprep.subr.bf16.mxu1 %v7845_v58  ;;  %v7900_v58 = vld [vmem:[#allocation2 + $0x1e8] ss:$16 sps:$4 sm:$0xff]  }
  0xe0   :  { %6643 = vmatmul.mubr.msk.bf16.gmra.mrb[68].mxu1 %vm345_vm0, %v8655_v26  ;;  %832 = vmatprep.mubr.bf16.mxu0 %v8480_v0  ;;  %v7873_v26 = vld [vmem:[#allocation2 + $0x128] ss:$16 sps:$4 sm:$0xff]  }
  0xe1   :  { %1025 = vmatprep.mubr.bf16.mxu1 %v8480_v0  ;;  %3113 = vmatpush1.bf16.msra.mxu0 %v7813_v59  ;;  %v7905_v59 = vld [vmem:[#allocation2 + $0x204] ss:$16 sps:$4 sm:$0xff]  }
  0xe2   :  { %3114 = vmatprep.subr.bf16.mxu0 %v7818_v60  ;;  %3885 = vmatpush1.bf16.msra.mxu1 %v7843_v61  ;;  %v7932_v60 = vld [vmem:[#allocation2 + $0x20c] ss:$16 sps:$4 sm:$0xff]  }
  0xe3   :  { %3886 = vmatprep.subr.bf16.mxu1 %v7848_v62  ;;  %v143_v62 = vld [vmem:[%s10174_s2] sm:$0xff] }
  0xe5   :  { %3115 = vmatpush1.bf16.msra.mxu0 %v7816_v63 }
  0xe6   :  { %3116 = vmatprep.subr.bf16.mxu0 %v7821_v1  ;;  %3887 = vmatpush1.bf16.msra.mxu1 %v7846_v2 }
  0xe7   :  { %6628 = vmatmul.mubr.msk.bf16.gmra.mrb[72].mxu0 %vm345_vm0, %v8678_v35  ;;  %3888 = vmatprep.subr.bf16.mxu1 %v7854_v3 }
  0xe8   :  { %6644 = vmatmul.mubr.msk.bf16.gmra.mrb[72].mxu1 %vm345_vm0, %v8678_v35  ;;  %842 = vmatprep.mubr.bf16.mxu0 %v8480_v0  ;;  %v7890_v35 = vld [vmem:[#allocation2 + $0x18c] ss:$16 sps:$4 sm:$0xff]  }
  0xe9   :  { %1035 = vmatprep.mubr.bf16.mxu1 %v8480_v0  ;;  %3117 = vmatpush1.bf16.msra.mxu0 %v7819_v4 }
  0xea   :  { %3118 = vmatprep.subr.bf16.mxu0 %v7824_v5  ;;  %3889 = vmatpush1.bf16.msra.mxu1 %v7852_v6 }
  0xeb   :  { %3890 = vmatprep.subr.bf16.mxu1 %v7857_v7 }
  0xed   :  { %3119 = vmatpush1.bf16.msra.mxu0 %v7822_v8 }
  0xee   :  { %3120 = vmatprep.subr.bf16.mxu0 %v7827_v9  ;;  %3891 = vmatpush1.bf16.msra.mxu1 %v7855_v10 }
  0xef   :  { %6629 = vmatmul.mubr.msk.bf16.gmra.mrb[76].mxu0 %vm345_vm0, %v8689_v37  ;;  %3892 = vmatprep.subr.bf16.mxu1 %v7863_v11 }
  0xf0   :  { %6645 = vmatmul.mubr.msk.bf16.gmra.mrb[76].mxu1 %vm345_vm0, %v8689_v37  ;;  %852 = vmatprep.mubr.bf16.mxu0 %v8480_v0  ;;  %v7878_v37 = vld [vmem:[#allocation2 + $0x1a4] ss:$16 sps:$4 sm:$0xff]  }
  0xf1   :  { %1045 = vmatprep.mubr.bf16.mxu1 %v8480_v0  ;;  %3121 = vmatpush1.bf16.msra.mxu0 %v7825_v12 }
  0xf2   :  { %3122 = vmatprep.subr.bf16.mxu0 %v7830_v13  ;;  %3893 = vmatpush1.bf16.msra.mxu1 %v7861_v14 }
  0xf3   :  { %3894 = vmatprep.subr.bf16.mxu1 %v7866_v15 }
  0xf5   :  { %3123 = vmatpush1.bf16.msra.mxu0 %v7828_v16 }
  0xf6   :  { %3124 = vmatprep.subr.bf16.mxu0 %v7833_v17  ;;  %3895 = vmatpush1.bf16.msra.mxu1 %v7864_v18 }
  0xf7   :  { %6630 = vmatmul.mubr.msk.bf16.gmra.mrb[80].mxu0 %vm345_vm0, %v8700_v38  ;;  %3896 = vmatprep.subr.bf16.mxu1 %v7872_v19 }
  0xf8   :  { %6646 = vmatmul.mubr.msk.bf16.gmra.mrb[80].mxu1 %vm345_vm0, %v8700_v38  ;;  %862 = vmatprep.mubr.bf16.mxu0 %v8480_v0  ;;  %v7888_v38 = vld [vmem:[#allocation2 + $0x188] ss:$16 sps:$4 sm:$0xff]  }
  0xf9   :  { %1055 = vmatprep.mubr.bf16.mxu1 %v8480_v0  ;;  %3125 = vmatpush1.bf16.msra.mxu0 %v7831_v20 }
  0xfa   :  { %3126 = vmatprep.subr.bf16.mxu0 %v7842_v21  ;;  %3897 = vmatpush1.bf16.msra.mxu1 %v7870_v22 }
  0xfb   :  { %3898 = vmatprep.subr.bf16.mxu1 %v7875_v23 }
  0xfd   :  { %3127 = vmatpush1.bf16.msra.mxu0 %v7840_v24 }
  0xfe   :  { %3128 = vmatprep.subr.bf16.mxu0 %v7851_v25  ;;  %3899 = vmatpush1.bf16.msra.mxu1 %v7873_v26 }
  0xff   :  { %6631 = vmatmul.mubr.msk.bf16.gmra.mrb[84].mxu0 %vm345_vm0, %v8711_v39  ;;  %3900 = vmatprep.subr.bf16.mxu1 %v7881_v27 }
 0x100   :  { %6647 = vmatmul.mubr.msk.bf16.gmra.mrb[84].mxu1 %vm345_vm0, %v8711_v39  ;;  %872 = vmatprep.mubr.bf16.mxu0 %v8480_v0  ;;  %v7893_v39 = vld [vmem:[#allocation2 + $0x1ac] ss:$16 sps:$4 sm:$0xff]  }
 0x101   :  { %1065 = vmatprep.mubr.bf16.mxu1 %v8480_v0  ;;  %3129 = vmatpush1.bf16.msra.mxu0 %v7849_v28 }
 0x102   :  { %3130 = vmatprep.subr.bf16.mxu0 %v7860_v29  ;;  %3901 = vmatpush1.bf16.msra.mxu1 %v7879_v30 }
 0x103   :  { %3902 = vmatprep.subr.bf16.mxu1 %v7884_v31 }
 0x105   :  { %3131 = vmatpush1.bf16.msra.mxu0 %v7858_v32 }
 0x106   :  { %3132 = vmatprep.subr.bf16.mxu0 %v7869_v33  ;;  %3903 = vmatpush1.bf16.msra.mxu1 %v7882_v34 }
 0x107   :  { %6632 = vmatmul.mubr.msk.bf16.gmra.mrb[88].mxu0 %vm345_vm0, %v8722_v40  ;;  %3904 = vmatprep.subr.bf16.mxu1 %v7890_v35 }
 0x108   :  { %6648 = vmatmul.mubr.msk.bf16.gmra.mrb[88].mxu1 %vm345_vm0, %v8722_v40  ;;  %882 = vmatprep.mubr.bf16.mxu0 %v8480_v0  ;;  %v7902_v40 = vld [vmem:[#allocation2 + $0x1ec] ss:$16 sps:$4 sm:$0xff]  }
 0x109   :  { %1075 = vmatprep.mubr.bf16.mxu1 %v8480_v0  ;;  %3133 = vmatpush1.bf16.msra.mxu0 %v7867_v36 }
 0x10a   :  { %3134 = vmatprep.subr.bf16.mxu0 %v7878_v37  ;;  %3905 = vmatpush1.bf16.msra.mxu1 %v7888_v38 }
 0x10b   :  { %3906 = vmatprep.subr.bf16.mxu1 %v7893_v39 }
 0x10d   :  { %3135 = vmatpush1.bf16.msra.mxu0 %v7876_v43 }
 0x10e   :  { %3136 = vmatprep.subr.bf16.mxu0 %v7887_v51  ;;  %3907 = vmatpush1.bf16.msra.mxu1 %v7891_v52 }
 0x10f   :  { %6633 = vmatmul.mubr.msk.bf16.gmra.mrb[92].mxu0 %vm345_vm0, %v8733_v41  ;;  %3908 = vmatprep.subr.bf16.mxu1 %v7899_v53 }
 0x110   :  { %6649 = vmatmul.mubr.msk.bf16.gmra.mrb[92].mxu1 %vm345_vm0, %v8733_v41  ;;  %892 = vmatprep.mubr.bf16.mxu0 %v8480_v0  ;;  %v145_v41 = vlaneseq }
 0x111   :  { %1085 = vmatprep.mubr.bf16.mxu1 %v8480_v0  ;;  %3137 = vmatpush1.bf16.msra.mxu0 %v7885_v54 }
 0x112   :  { %3138 = vmatprep.subr.bf16.mxu0 %v7896_v55  ;;  %3909 = vmatpush1.bf16.msra.mxu1 %v7897_v56  ;;  %v8885_v61 = vshrl.u32 %v145_v41, 7 }
 0x113   :  { %3910 = vmatprep.subr.bf16.mxu1 %v7902_v40 }
 0x114   :  { %10222 = vst [vmem:[#allocation15_spill] sm:$0xff] %v8885_v61  ;;  %v8898_v63 = vsub.s32 1, %v8885_v61  ;;  %v10185_v2 = vsub.s32 2, %v8885_v61  ;;  %v10184_v3 = vsub.s32 3, %v8885_v61 }
 0x115   :  { %3139 = vmatpush1.bf16.msra.mxu0 %v7894_v57 }
 0x116   :  { %3911 = vmatpush1.bf16.msra.mxu1 %v7900_v58  ;;  %3301 = vmatprep.subr.bf16.mxu0 %v7905_v59  ;;  %10224 = vst [vmem:[#allocation17_spill] sm:$0xff] %v8898_v63  ;;  %v8916_v5 = vrot.slane %v143_v62, %v10185_v2  ;;  %v8920_v6 = vrot.slane %v143_v62, %v10184_v3 }
 0x117   :  { %6634 = vmatmul.mubr.msk.bf16.gmra.mrb[96].mxu0 %vm345_vm0, %v8744_v42  ;;  %4073 = vmatprep.subr.bf16.mxu1 %v7932_v60 }
 0x118   :  { %6650 = vmatmul.mubr.msk.bf16.gmra.mrb[96].mxu1 %vm345_vm0, %v8744_v42  ;;  %902 = vmatprep.mubr.bf16.mxu0 %v8480_v0  ;;  %v8892_v42 = vsub.s32 0, %v8885_v61 }
 0x119   :  { %1095 = vmatprep.mubr.bf16.mxu1 %v8480_v0 }
 0x11a   :  { %10223 = vst [vmem:[#allocation16_spill] sm:$0xff] %v8892_v42  ;;  %v8903_v1 = vrot.slane %v143_v62, %v8892_v42 }
 0x11f   :  { %6635 = vmatmul.mubr.msk.bf16.gmra.mrb[100].mxu0 %vm345_vm0, %v8755_v44 }
 0x120   :  { %6651 = vmatmul.mubr.msk.bf16.gmra.mrb[100].mxu1 %vm345_vm0, %v8755_v44  ;;  %912 = vmatprep.mubr.bf16.mxu0 %v8480_v0  ;;  %v8908_v44 = vrot.slane %v143_v62, %v8898_v63 }
 0x121   :  { %1105 = vmatprep.mubr.bf16.mxu1 %v8480_v0 }
 0x127   :  { %6636 = vmatmul.mubr.msk.bf16.gmra.mrb[104].mxu0 %vm345_vm0, %v8766_v45 }
 0x128   :  { %6652 = vmatmul.mubr.msk.bf16.gmra.mrb[104].mxu1 %vm345_vm0, %v8766_v45  ;;  %922 = vmatprep.mubr.bf16.mxu0 %v8480_v0 }
 0x129   :  { %1115 = vmatprep.mubr.bf16.mxu1 %v8480_v0 }
 0x12a   :  { %v428_v4 = vpop.f32.mrb[0].mxu0  ;;  %v621_v8 = vpop.f32.mrb[0].mxu1 }
 0x12b   :  { %v429_v45 = vadd.f32 %v428_v4, %v8903_v1  ;;  %v430_v7 = vpop.f32.mrb[1].mxu0  ;;  %v622_v11 = vadd.f32 %v621_v8, %v8916_v5  ;;  %v623_v12 = vpop.f32.mrb[1].mxu1 }
 0x12c   :  { %v431_v9 = vadd.f32 %v430_v7, %v8908_v44  ;;  %v432_v10 = vpop.f32.mrb[2].mxu0  ;;  %v624_v15 = vadd.f32 %v623_v12, %v8920_v6  ;;  %v625_v16 = vpop.f32.mrb[2].mxu1 }
 0x12d   :  { %v433_v13 = vadd.f32 %v432_v10, %v8903_v1  ;;  %v434_v14 = vpop.f32.mrb[3].mxu0  ;;  %v1168_v18 = vmax.f32 %v622_v11, 0.0  ;;  %v626_v19 = vadd.f32 %v625_v16, %v8916_v5  ;;  %v627_v20 = vpop.f32.mrb[3].mxu1  ;;  %v1166_v21 = vmax.f32 %v429_v45, 0.0 }
 0x12e   :  { %v435_v17 = vadd.f32 %v434_v14, %v8908_v44  ;;  %v1169_v23 = vmax.f32 %v624_v15, 0.0  ;;  %v628_v24 = vadd.f32 %v627_v20, %v8920_v6  ;;  %v1167_v25 = vmax.f32 %v431_v9, 0.0 }
 0x12f   :  { %v1174_v22 = vmax.f32 %v433_v13, 0.0  ;;  %6637 = vmatmul.mubr.msk.bf16.gmra.mrb[108].mxu0 %vm345_vm0, %v8777_v46  ;;  %v1176_v27 = vmax.f32 %v626_v19, 0.0 }
 0x130   :  { %v1175_v26 = vmax.f32 %v435_v17, 0.0  ;;  %6653 = vmatmul.mubr.msk.bf16.gmra.mrb[108].mxu1 %vm345_vm0, %v8777_v46  ;;  %932 = vmatprep.mubr.bf16.mxu0 %v8480_v0  ;;  %v1177_v29 = vmax.f32 %v628_v24, 0.0 }
 0x131   :  { %v8935_v28 = vpack.c.bf16 %v1174_v22, %v1166_v21  ;;  %1125 = vmatprep.mubr.bf16.mxu1 %v8480_v0  ;;  %v8940_v32 = vpack.c.bf16 %v1176_v27, %v1168_v18 }
 0x132   :  { %v8938_v30 = vpack.c.bf16 %v1175_v26, %v1167_v25  ;;  %v438_v31 = vpop.f32.mrb[4].mxu0  ;;  %v631_v35 = vpop.f32.mrb[4].mxu1  ;;  %v8943_v36 = vpack.c.bf16 %v1177_v29, %v1169_v23 }
 0x133   :  { %v439_v33 = vadd.f32 %v438_v31, %v8903_v1  ;;  %v440_v34 = vpop.f32.mrb[5].mxu0  ;;  %v632_v38 = vadd.f32 %v631_v35, %v8916_v5  ;;  %v633_v39 = vpop.f32.mrb[5].mxu1 }
 0x134   :  { %v441_v46 = vadd.f32 %v440_v34, %v8908_v44  ;;  %v442_v37 = vpop.f32.mrb[6].mxu0  ;;  %v634_v52 = vadd.f32 %v633_v39, %v8920_v6  ;;  %v635_v53 = vpop.f32.mrb[6].mxu1 }
 0x135   :  { %v443_v43 = vadd.f32 %v442_v37, %v8903_v1  ;;  %v444_v51 = vpop.f32.mrb[7].mxu0  ;;  %v1184_v55 = vmax.f32 %v632_v38, 0.0  ;;  %v636_v56 = vadd.f32 %v635_v53, %v8916_v5  ;;  %v637_v40 = vpop.f32.mrb[7].mxu1  ;;  %v1182_v57 = vmax.f32 %v439_v33, 0.0 }
 0x136   :  { %v445_v54 = vadd.f32 %v444_v51, %v8908_v44  ;;  %v1185_v59 = vmax.f32 %v634_v52, 0.0  ;;  %v638_v60 = vadd.f32 %v637_v40, %v8920_v6  ;;  %v1183_v41 = vmax.f32 %v441_v46, 0.0 }
 0x137   :  { %v1190_v58 = vmax.f32 %v443_v43, 0.0  ;;  %6638 = vmatmul.mubr.msk.bf16.gmra.mrb[112].mxu0 %vm345_vm0, %v8788_v47  ;;  %v1192_v4 = vmax.f32 %v636_v56, 0.0 }
 0x138   :  { %v1191_v62 = vmax.f32 %v445_v54, 0.0  ;;  %6654 = vmatmul.mubr.msk.bf16.gmra.mrb[112].mxu1 %vm345_vm0, %v8788_v47  ;;  %942 = vmatprep.mubr.bf16.mxu0 %v8480_v0  ;;  %v1193_v7 = vmax.f32 %v638_v60, 0.0 }
 0x139   :  { %v8957_v45 = vpack.c.bf16 %v1190_v58, %v1182_v57  ;;  %1135 = vmatprep.mubr.bf16.mxu1 %v8480_v0  ;;  %v8962_v10 = vpack.c.bf16 %v1192_v4, %v1184_v55 }
 0x13a   :  { %v8960_v8 = vpack.c.bf16 %v1191_v62, %v1183_v41  ;;  %v448_v9 = vpop.f32.mrb[8].mxu0  ;;  %v641_v13 = vpop.f32.mrb[8].mxu1  ;;  %v8965_v14 = vpack.c.bf16 %v1193_v7, %v1185_v59 }
 0x13b   :  { %v449_v11 = vadd.f32 %v448_v9, %v8903_v1  ;;  %v450_v12 = vpop.f32.mrb[9].mxu0  ;;  %v642_v16 = vadd.f32 %v641_v13, %v8916_v5  ;;  %v643_v17 = vpop.f32.mrb[9].mxu1 }
 0x13c   :  { %v451_v47 = vadd.f32 %v450_v12, %v8908_v44  ;;  %v452_v15 = vpop.f32.mrb[10].mxu0  ;;  %v644_v20 = vadd.f32 %v643_v17, %v8920_v6  ;;  %v645_v21 = vpop.f32.mrb[10].mxu1 }
 0x13d   :  { %v453_v18 = vadd.f32 %v452_v15, %v8903_v1  ;;  %v454_v19 = vpop.f32.mrb[11].mxu0  ;;  %v1200_v23 = vmax.f32 %v642_v16, 0.0  ;;  %v646_v24 = vadd.f32 %v645_v21, %v8916_v5  ;;  %v647_v25 = vpop.f32.mrb[11].mxu1  ;;  %v1198_v26 = vmax.f32 %v449_v11, 0.0 }
 0x13e   :  { %v455_v22 = vadd.f32 %v454_v19, %v8908_v44  ;;  %v1201_v29 = vmax.f32 %v644_v20, 0.0  ;;  %v648_v31 = vadd.f32 %v647_v25, %v8920_v6  ;;  %v1199_v33 = vmax.f32 %v451_v47, 0.0 }
 0x13f   :  { %v1206_v27 = vmax.f32 %v453_v18, 0.0  ;;  %6639 = vmatmul.mubr.msk.bf16.gmra.mrb[116].mxu0 %vm345_vm0, %v8799_v48  ;;  %v1208_v35 = vmax.f32 %v646_v24, 0.0 }
 0x140   :  { %v1207_v34 = vmax.f32 %v455_v22, 0.0  ;;  %6655 = vmatmul.mubr.msk.bf16.gmra.mrb[116].mxu1 %vm345_vm0, %v8799_v48  ;;  %952 = vmatprep.mubr.bf16.mxu0 %v8480_v0  ;;  %v1209_v37 = vmax.f32 %v648_v31, 0.0 }
 0x141   :  { %v8979_v46 = vpack.c.bf16 %v1206_v27, %v1198_v26  ;;  %1145 = vmatprep.mubr.bf16.mxu1 %v8480_v0  ;;  %v8984_v43 = vpack.c.bf16 %v1208_v35, %v1200_v23 }
 0x142   :  { %v8982_v38 = vpack.c.bf16 %v1207_v34, %v1199_v33  ;;  %v458_v39 = vpop.f32.mrb[12].mxu0  ;;  %v651_v53 = vpop.f32.mrb[12].mxu1  ;;  %v8987_v54 = vpack.c.bf16 %v1209_v37, %v1201_v29 }
 0x143   :  { %v459_v51 = vadd.f32 %v458_v39, %v8903_v1  ;;  %v460_v52 = vpop.f32.mrb[13].mxu0  ;;  %v652_v56 = vadd.f32 %v651_v53, %v8916_v5  ;;  %v653_v40 = vpop.f32.mrb[13].mxu1 }
 0x144   :  { %v461_v48 = vadd.f32 %v460_v52, %v8908_v44  ;;  %v462_v55 = vpop.f32.mrb[14].mxu0  ;;  %v654_v59 = vadd.f32 %v653_v40, %v8920_v6  ;;  %v655_v60 = vpop.f32.mrb[14].mxu1 }
 0x145   :  { %v463_v57 = vadd.f32 %v462_v55, %v8903_v1  ;;  %v464_v58 = vpop.f32.mrb[15].mxu0  ;;  %v1216_v62 = vmax.f32 %v652_v56, 0.0  ;;  %v656_v4 = vadd.f32 %v655_v60, %v8916_v5  ;;  %v657_v7 = vpop.f32.mrb[15].mxu1  ;;  %v1214_v9 = vmax.f32 %v459_v51, 0.0 }
 0x146   :  { %v465_v41 = vadd.f32 %v464_v58, %v8908_v44  ;;  %v1217_v12 = vmax.f32 %v654_v59, 0.0  ;;  %v658_v13 = vadd.f32 %v657_v7, %v8920_v6  ;;  %v1215_v47 = vmax.f32 %v461_v48, 0.0 }
 0x147   :  { %v1222_v11 = vmax.f32 %v463_v57, 0.0  ;;  %6640 = vmatmul.mubr.msk.bf16.gmra.mrb[120].mxu0 %vm345_vm0, %v8810_v49  ;;  %v1224_v16 = vmax.f32 %v656_v4, 0.0 }
 0x148   :  { %v1223_v15 = vmax.f32 %v465_v41, 0.0  ;;  %6656 = vmatmul.mubr.msk.bf16.gmra.mrb[120].mxu1 %vm345_vm0, %v8810_v49  ;;  %962 = vmatprep.mubr.bf16.mxu0 %v8480_v0  ;;  %v1225_v18 = vmax.f32 %v658_v13, 0.0 }
 0x149   :  { %v9001_v17 = vpack.c.bf16 %v1222_v11, %v1214_v9  ;;  %1155 = vmatprep.mubr.bf16.mxu1 %v8480_v0  ;;  %v9006_v21 = vpack.c.bf16 %v1224_v16, %v1216_v62  ;;  %v7903_v16 = vld [vmem:[#allocation2 + $0x200] ss:$16 sps:$4 sm:$0xff]  }
 0x14a   :  { %v9004_v19 = vpack.c.bf16 %v1223_v15, %v1215_v47  ;;  %v468_v20 = vpop.f32.mrb[16].mxu0  ;;  %v661_v24 = vpop.f32.mrb[16].mxu1  ;;  %v9009_v25 = vpack.c.bf16 %v1225_v18, %v1217_v12 }
 0x14b   :  { %v469_v22 = vadd.f32 %v468_v20, %v8903_v1  ;;  %v470_v23 = vpop.f32.mrb[17].mxu0  ;;  %v662_v27 = vadd.f32 %v661_v24, %v8916_v5  ;;  %v663_v29 = vpop.f32.mrb[17].mxu1  ;;  %v7930_v24 = vld [vmem:[#allocation2 + $0x208] ss:$16 sps:$4 sm:$0xff]  }
 0x14c   :  { %v471_v49 = vadd.f32 %v470_v23, %v8908_v44  ;;  %v472_v26 = vpop.f32.mrb[18].mxu0  ;;  %v664_v33 = vadd.f32 %v663_v29, %v8920_v6  ;;  %v665_v34 = vpop.f32.mrb[18].mxu1  ;;  %v7908_v23 = vld [vmem:[#allocation2 + $0x224] ss:$16 sps:$4 sm:$0xff]  }
 0x14d   :  { %v473_v0 = vadd.f32 %v472_v26, %v8903_v1  ;;  %v474_v31 = vpop.f32.mrb[19].mxu0  ;;  %v1232_v37 = vmax.f32 %v662_v27, 0.0  ;;  %v666_v39 = vadd.f32 %v665_v34, %v8916_v5  ;;  %v667_v51 = vpop.f32.mrb[19].mxu1  ;;  %v1230_v52 = vmax.f32 %v469_v22, 0.0 }
 0x14e   :  { %v475_v35 = vadd.f32 %v474_v31, %v8908_v44  ;;  %v1233_v48 = vmax.f32 %v664_v33, 0.0  ;;  %v668_v55 = vadd.f32 %v667_v51, %v8920_v6  ;;  %v1231_v56 = vmax.f32 %v471_v49, 0.0  ;;  %v7935_v31 = vld [vmem:[#allocation2 + $0x22c] ss:$16 sps:$4 sm:$0xff]  }
 0x14f   :  { %v1238_v53 = vmax.f32 %v473_v0, 0.0  ;;  %6641 = vmatmul.mubr.msk.bf16.gmra.mrb[124].mxu0 %vm345_vm0, %v8821_v50  ;;  %v1240_v57 = vmax.f32 %v666_v39, 0.0 }
 0x150   :  { %v1239_v40 = vmax.f32 %v475_v35, 0.0  ;;  %6657 = vmatmul.mubr.msk.bf16.gmra.mrb[124].mxu1 %vm345_vm0, %v8821_v50  ;;  %3140 = vmatprep.mubr.bf16.mxu0 %v8938_v30  ;;  %v1241_v59 = vmax.f32 %v668_v55, 0.0 }
 0x151   :  { %v9023_v58 = vpack.c.bf16 %v1238_v53, %v1230_v52  ;;  %3912 = vmatprep.mubr.bf16.mxu1 %v8938_v30  ;;  %v9028_v62 = vpack.c.bf16 %v1240_v57, %v1232_v37  ;;  %v7906_v52 = vld [vmem:[#allocation2 + $0x220] ss:$16 sps:$4 sm:$0xff]  }
 0x152   :  { %v9026_v60 = vpack.c.bf16 %v1239_v40, %v1231_v56  ;;  %v478_v41 = vpop.f32.mrb[20].mxu0  ;;  %v671_v9 = vpop.f32.mrb[20].mxu1  ;;  %v9031_v11 = vpack.c.bf16 %v1241_v59, %v1233_v48  ;;  %v7911_v56 = vld [vmem:[#allocation2 + $0x244] ss:$16 sps:$4 sm:$0xff]   ;;  %v7933_v40 = vld [vmem:[#allocation2 + $0x228] ss:$16 sps:$4 sm:$0xff]  }
 0x153   :  { %v479_v4 = vadd.f32 %v478_v41, %v8903_v1  ;;  %v480_v7 = vpop.f32.mrb[21].mxu0  ;;  %v672_v13 = vadd.f32 %v671_v9, %v8916_v5  ;;  %v673_v47 = vpop.f32.mrb[21].mxu1  ;;  %v7941_v41 = vld [vmem:[#allocation2 + $0x24c] ss:$16 sps:$4 sm:$0xff]  }
 0x154   :  { %v481_v50 = vadd.f32 %v480_v7, %v8908_v44  ;;  %v482_v12 = vpop.f32.mrb[22].mxu0  ;;  %v674_v18 = vadd.f32 %v673_v47, %v8920_v6  ;;  %v675_v20 = vpop.f32.mrb[22].mxu1 }
 0x155   :  { %v483_v30 = vadd.f32 %v482_v12, %v8903_v1  ;;  %v484_v15 = vpop.f32.mrb[23].mxu0  ;;  %v1248_v49 = vmax.f32 %v672_v13, 0.0  ;;  %v676_v26 = vadd.f32 %v675_v20, %v8916_v5  ;;  %v677_v27 = vpop.f32.mrb[23].mxu1  ;;  %v1246_v29 = vmax.f32 %v479_v4, 0.0  ;;  %v7914_v20 = vld [vmem:[#allocation2 + $0x264] ss:$16 sps:$4 sm:$0xff]  }
 0x156   :  { %v485_v22 = vadd.f32 %v484_v15, %v8908_v44  ;;  %v1249_v33 = vmax.f32 %v674_v18, 0.0  ;;  %v678_v34 = vadd.f32 %v677_v27, %v8920_v6  ;;  %v1247_v35 = vmax.f32 %v481_v50, 0.0 }
 0x157   :  { %v1254_v0 = vmax.f32 %v483_v30, 0.0  ;;  %3141 = vmatmul.mubr.bf16.vlgmr.msra.gmra.mrb[128].mxu0 %v8935_v28  ;;  %v1256_v39 = vmax.f32 %v676_v26, 0.0  ;;  %v7909_v30 = vld [vmem:[#allocation2 + $0x240] ss:$16 sps:$4 sm:$0xff]  }
 0x158   :  { %v1255_v37 = vmax.f32 %v485_v22, 0.0  ;;  %3913 = vmatmul.mubr.bf16.vlgmr.msra.gmra.mrb[128].mxu1 %v8935_v28  ;;  %3150 = vmatprep.mubr.bf16.mxu0 %v8960_v8  ;;  %v1257_v53 = vmax.f32 %v678_v34, 0.0  ;;  %v7939_v22 = vld [vmem:[#allocation2 + $0x248] ss:$16 sps:$4 sm:$0xff]  }
 0x159   :  { %v9043_v51 = vpack.c.bf16 %v1254_v0, %v1246_v29  ;;  %3302 = vmatpush1.bf16.msra.mxu0 %v7903_v16  ;;  %3922 = vmatprep.mubr.bf16.mxu1 %v8960_v8  ;;  %v9048_v57 = vpack.c.bf16 %v1256_v39, %v1248_v49  ;;  %v7944_v29 = vld [vmem:[#allocation2 + $0x26c] ss:$16 sps:$4 sm:$0xff]   ;;  %v7912_v39 = vld [vmem:[#allocation2 + $0x260] ss:$16 sps:$4 sm:$0xff]  }
 0x15a   :  { %v9046_v48 = vpack.c.bf16 %v1255_v37, %v1247_v35  ;;  %v488_v55 = vpop.f32.mrb[24].mxu0  ;;  %3303 = vmatprep.subr.bf16.mxu0 %v7908_v23  ;;  %4074 = vmatpush1.bf16.msra.mxu1 %v7930_v24  ;;  %v681_v4 = vpop.f32.mrb[24].mxu1  ;;  %v9051_v7 = vpack.c.bf16 %v1257_v53, %v1249_v33 }
 0x15b   :  { %v489_v28 = vadd.f32 %v488_v55, %v8903_v1  ;;  %v490_v59 = vpop.f32.mrb[25].mxu0  ;;  %4075 = vmatprep.subr.bf16.mxu1 %v7935_v31  ;;  %v682_v50 = vadd.f32 %v681_v4, %v8916_v5  ;;  %v683_v12 = vpop.f32.mrb[25].mxu1 }
 0x15c   :  { %v491_v8 = vadd.f32 %v490_v59, %v8908_v44  ;;  %v492_v9 = vpop.f32.mrb[26].mxu0  ;;  %v684_v15 = vadd.f32 %v683_v12, %v8920_v6  ;;  %v685_v16 = vpop.f32.mrb[26].mxu1 }
 0x15d   :  { %v493_v13 = vadd.f32 %v492_v9, %v8903_v1  ;;  %v494_v47 = vpop.f32.mrb[27].mxu0  ;;  %3304 = vmatpush1.bf16.msra.mxu0 %v7906_v52  ;;  %v1264_v23 = vmax.f32 %v682_v50, 0.0  ;;  %v686_v24 = vadd.f32 %v685_v16, %v8916_v5  ;;  %v687_v49 = vpop.f32.mrb[27].mxu1  ;;  %v1262_v26 = vmax.f32 %v489_v28, 0.0 }
 0x15e   :  { %v495_v18 = vadd.f32 %v494_v47, %v8908_v44  ;;  %3305 = vmatprep.subr.bf16.mxu0 %v7911_v56  ;;  %4076 = vmatpush1.bf16.msra.mxu1 %v7933_v40  ;;  %v1265_v0 = vmax.f32 %v684_v15, 0.0  ;;  %v688_v31 = vadd.f32 %v687_v49, %v8920_v6  ;;  %v1263_v33 = vmax.f32 %v491_v8, 0.0  ;;  %v7917_v56 = vld [vmem:[#allocation2 + $0x284] ss:$16 sps:$4 sm:$0xff]   ;;  %v7942_v40 = vld [vmem:[#allocation2 + $0x268] ss:$16 sps:$4 sm:$0xff]  }
 0x15f   :  { %v1270_v27 = vmax.f32 %v493_v13, 0.0  ;;  %3151 = vmatmul.mubr.bf16.gmra.mrb[132].mxu0 %v8957_v45  ;;  %4077 = vmatprep.subr.bf16.mxu1 %v7941_v41  ;;  %v1272_v35 = vmax.f32 %v686_v24, 0.0  ;;  %v7950_v41 = vld [vmem:[#allocation2 + $0x28c] ss:$16 sps:$4 sm:$0xff]  }
 0x160   :  { %v1271_v34 = vmax.f32 %v495_v18, 0.0  ;;  %3923 = vmatmul.mubr.bf16.gmra.mrb[132].mxu1 %v8957_v45  ;;  %3160 = vmatprep.mubr.bf16.mxu0 %v8982_v38  ;;  %v1273_v52 = vmax.f32 %v688_v31, 0.0 }
 0x161   :  { %v9063_v37 = vpack.c.bf16 %v1270_v27, %v1262_v26  ;;  %3932 = vmatprep.mubr.bf16.mxu1 %v8982_v38  ;;  %3306 = vmatpush1.bf16.msra.mxu0 %v7909_v30  ;;  %v9068_v28 = vpack.c.bf16 %v1272_v35, %v1264_v23  ;;  %v7915_v30 = vld [vmem:[#allocation2 + $0x280] ss:$16 sps:$4 sm:$0xff]  }
 0x162   :  { %v9066_v53 = vpack.c.bf16 %v1271_v34, %v1263_v33  ;;  %v498_v55 = vpop.f32.mrb[28].mxu0  ;;  %3307 = vmatprep.subr.bf16.mxu0 %v7914_v20  ;;  %4078 = vmatpush1.bf16.msra.mxu1 %v7939_v22  ;;  %v691_v4 = vpop.f32.mrb[28].mxu1  ;;  %v9071_v8 = vpack.c.bf16 %v1273_v52, %v1265_v0  ;;  %v7920_v20 = vld [vmem:[#allocation2 + $0x2a4] ss:$16 sps:$4 sm:$0xff]   ;;  %v7948_v22 = vld [vmem:[#allocation2 + $0x288] ss:$16 sps:$4 sm:$0xff]  }
 0x163   :  { %v499_v45 = vadd.f32 %v498_v55, %v8903_v1  ;;  %v500_v59 = vpop.f32.mrb[29].mxu0  ;;  %4079 = vmatprep.subr.bf16.mxu1 %v7944_v29  ;;  %v692_v50 = vadd.f32 %v691_v4, %v8916_v5  ;;  %v693_v12 = vpop.f32.mrb[29].mxu1  ;;  %v7953_v29 = vld [vmem:[#allocation2 + $0x2ac] ss:$16 sps:$4 sm:$0xff]   ;;  %v7918_v52 = vld [vmem:[#allocation2 + $0x2a0] ss:$16 sps:$4 sm:$0xff]  }
 0x164   :  { %v501_v38 = vadd.f32 %v500_v59, %v8908_v44  ;;  %v502_v9 = vpop.f32.mrb[30].mxu0  ;;  %v694_v15 = vadd.f32 %v693_v12, %v8920_v6  ;;  %v695_v16 = vpop.f32.mrb[30].mxu1  ;;  %v7951_v59 = vld [vmem:[#allocation2 + $0x2a8] ss:$16 sps:$4 sm:$0xff]  }
 0x165   :  { %v503_v13 = vadd.f32 %v502_v9, %v8903_v1  ;;  %v504_v47 = vpop.f32.mrb[31].mxu0  ;;  %3308 = vmatpush1.bf16.msra.mxu0 %v7912_v39  ;;  %v1280_v23 = vmax.f32 %v692_v50, 0.0  ;;  %v696_v24 = vadd.f32 %v695_v16, %v8916_v5  ;;  %v697_v49 = vpop.f32.mrb[31].mxu1  ;;  %v1278_v26 = vmax.f32 %v499_v45, 0.0  ;;  %v7923_v45 = vld [vmem:[#allocation2 + $0x2c4] ss:$16 sps:$4 sm:$0xff]  }
 0x166   :  { %v505_v18 = vadd.f32 %v504_v47, %v8908_v44  ;;  %3309 = vmatprep.subr.bf16.mxu0 %v7917_v56  ;;  %4080 = vmatpush1.bf16.msra.mxu1 %v7942_v40  ;;  %v1281_v0 = vmax.f32 %v694_v15, 0.0  ;;  %v698_v31 = vadd.f32 %v697_v49, %v8920_v6  ;;  %v1279_v33 = vmax.f32 %v501_v38, 0.0  ;;  %v7959_v38 = vld [vmem:[#allocation2 + $0x2cc] ss:$16 sps:$4 sm:$0xff]   ;;  %v7921_v16 = vld [vmem:[#allocation2 + $0x2c0] ss:$16 sps:$4 sm:$0xff]  }
 0x167   :  { %v1286_v27 = vmax.f32 %v503_v13, 0.0  ;;  %3161 = vmatmul.mubr.bf16.gmra.mrb[136].mxu0 %v8979_v46  ;;  %4081 = vmatprep.subr.bf16.mxu1 %v7950_v41  ;;  %v1288_v35 = vmax.f32 %v696_v24, 0.0  ;;  %v7957_v24 = vld [vmem:[#allocation2 + $0x2c8] ss:$16 sps:$4 sm:$0xff]  }
 0x168   :  { %v1287_v34 = vmax.f32 %v505_v18, 0.0  ;;  %3933 = vmatmul.mubr.bf16.gmra.mrb[136].mxu1 %v8979_v46  ;;  %3170 = vmatprep.mubr.bf16.mxu0 %v9004_v19  ;;  %v1289_v55 = vmax.f32 %v698_v31, 0.0  ;;  %v7962_v31 = vld [vmem:[#allocation2 + $0x2ec] ss:$16 sps:$4 sm:$0xff]  }
 0x169   :  { %v9083_v39 = vpack.c.bf16 %v1286_v27, %v1278_v26  ;;  %3942 = vmatprep.mubr.bf16.mxu1 %v9004_v19  ;;  %3310 = vmatpush1.bf16.msra.mxu0 %v7915_v30  ;;  %v9088_v41 = vpack.c.bf16 %v1288_v35, %v1280_v23  ;;  %v7926_v23 = vld [vmem:[#allocation2 + $0x2e4] ss:$16 sps:$4 sm:$0xff]  }
 0x16a   :  { %v9086_v56 = vpack.c.bf16 %v1287_v34, %v1279_v33  ;;  %v508_v40 = vpop.f32.mrb[32].mxu0  ;;  %3311 = vmatprep.subr.bf16.mxu0 %v7920_v20  ;;  %4082 = vmatpush1.bf16.msra.mxu1 %v7948_v22  ;;  %v701_v9 = vpop.f32.mrb[32].mxu1  ;;  %v9091_v50 = vpack.c.bf16 %v1289_v55, %v1281_v0 }
 0x16b   :  { %v509_v46 = vadd.f32 %v508_v40, %v8903_v1  ;;  %v510_v4 = vpop.f32.mrb[33].mxu0  ;;  %4083 = vmatprep.subr.bf16.mxu1 %v7953_v29  ;;  %v702_v13 = vadd.f32 %v701_v9, %v8916_v5  ;;  %v703_v47 = vpop.f32.mrb[33].mxu1  ;;  %v7960_v9 = vld [vmem:[#allocation2 + $0x2e8] ss:$16 sps:$4 sm:$0xff]  }
 0x16c   :  { %v511_v19 = vadd.f32 %v510_v4, %v8908_v44  ;;  %v512_v12 = vpop.f32.mrb[34].mxu0  ;;  %v704_v18 = vadd.f32 %v703_v47, %v8920_v6  ;;  %v705_v20 = vpop.f32.mrb[34].mxu1 }
 0x16d   :  { %v513_v30 = vadd.f32 %v512_v12, %v8903_v1  ;;  %v514_v15 = vpop.f32.mrb[35].mxu0  ;;  %3312 = vmatpush1.bf16.msra.mxu0 %v7918_v52  ;;  %v1296_v49 = vmax.f32 %v702_v13, 0.0  ;;  %v706_v26 = vadd.f32 %v705_v20, %v8916_v5  ;;  %v707_v27 = vpop.f32.mrb[35].mxu1  ;;  %v1294_v29 = vmax.f32 %v509_v46, 0.0  ;;  %v7968_v13 = vld [vmem:[#allocation2 + $0x30c] ss:$16 sps:$4 sm:$0xff]  }
 0x16e   :  { %v515_v22 = vadd.f32 %v514_v15, %v8908_v44  ;;  %3313 = vmatprep.subr.bf16.mxu0 %v7923_v45  ;;  %4084 = vmatpush1.bf16.msra.mxu1 %v7951_v59  ;;  %v1297_v33 = vmax.f32 %v704_v18, 0.0  ;;  %v708_v34 = vadd.f32 %v707_v27, %v8920_v6  ;;  %v1295_v35 = vmax.f32 %v511_v19, 0.0  ;;  %v7924_v45 = vld [vmem:[#allocation2 + $0x2e0] ss:$16 sps:$4 sm:$0xff]   ;;  %v7938_v27 = vld [vmem:[#allocation2 + $0x324] ss:$16 sps:$4 sm:$0xff]  }
 0x16f   :  { %v1302_v0 = vmax.f32 %v513_v30, 0.0  ;;  %3171 = vmatmul.mubr.bf16.gmra.mrb[140].mxu0 %v9001_v17  ;;  %4085 = vmatprep.subr.bf16.mxu1 %v7959_v38  ;;  %v1304_v55 = vmax.f32 %v706_v26, 0.0  ;;  %v7929_v38 = vld [vmem:[#allocation2 + $0x304] ss:$16 sps:$4 sm:$0xff]  }
 0x170   :  { %v1303_v52 = vmax.f32 %v515_v22, 0.0  ;;  %3943 = vmatmul.mubr.bf16.gmra.mrb[140].mxu1 %v9001_v17  ;;  %3180 = vmatprep.mubr.bf16.mxu0 %v9026_v60  ;;  %v1305_v59 = vmax.f32 %v708_v34, 0.0 }
 0x171   :  { %v9103_v40 = vpack.c.bf16 %v1302_v0, %v1294_v29  ;;  %3952 = vmatprep.mubr.bf16.mxu1 %v9026_v60  ;;  %3314 = vmatpush1.bf16.msra.mxu0 %v7921_v16  ;;  %v9108_v19 = vpack.c.bf16 %v1304_v55, %v1296_v49  ;;  %v7966_v29 = vld [vmem:[#allocation2 + $0x308] ss:$16 sps:$4 sm:$0xff]  }
 0x172   :  { %v9106_v46 = vpack.c.bf16 %v1303_v52, %v1295_v35  ;;  %v518_v4 = vpop.f32.mrb[36].mxu0  ;;  %3315 = vmatprep.subr.bf16.mxu0 %v7926_v23  ;;  %4086 = vmatpush1.bf16.msra.mxu1 %v7957_v24  ;;  %v711_v47 = vpop.f32.mrb[36].mxu1  ;;  %v9111_v30 = vpack.c.bf16 %v1305_v59, %v1297_v33  ;;  %v7927_v23 = vld [vmem:[#allocation2 + $0x300] ss:$16 sps:$4 sm:$0xff]   ;;  %v7971_v52 = vld [vmem:[#allocation2 + $0x32c] ss:$16 sps:$4 sm:$0xff]  }
 0x173   :  { %v519_v17 = vadd.f32 %v518_v4, %v8903_v1  ;;  %v520_v12 = vpop.f32.mrb[37].mxu0  ;;  %4087 = vmatprep.subr.bf16.mxu1 %v7962_v31  ;;  %v712_v16 = vadd.f32 %v711_v47, %v8916_v5  ;;  %v713_v18 = vpop.f32.mrb[37].mxu1 }
 0x174   :  { %v521_v60 = vadd.f32 %v520_v12, %v8908_v44  ;;  %v522_v15 = vpop.f32.mrb[38].mxu0  ;;  %v714_v24 = vadd.f32 %v713_v18, %v8920_v6  ;;  %v715_v49 = vpop.f32.mrb[38].mxu1 }
 0x175   :  { %v523_v20 = vadd.f32 %v522_v15, %v8903_v1  ;;  %v524_v22 = vpop.f32.mrb[39].mxu0  ;;  %3316 = vmatpush1.bf16.msra.mxu0 %v7924_v45  ;;  %v1312_v0 = vmax.f32 %v712_v16, 0.0  ;;  %v716_v31 = vadd.f32 %v715_v49, %v8916_v5  ;;  %v717_v33 = vpop.f32.mrb[39].mxu1  ;;  %v1310_v34 = vmax.f32 %v519_v17, 0.0  ;;  %v7936_v17 = vld [vmem:[#allocation2 + $0x320] ss:$16 sps:$4 sm:$0xff]  }
 0x176   :  { %v525_v26 = vadd.f32 %v524_v22, %v8908_v44  ;;  %3317 = vmatprep.subr.bf16.mxu0 %v7929_v38  ;;  %4088 = vmatpush1.bf16.msra.mxu1 %v7960_v9  ;;  %v1313_v55 = vmax.f32 %v714_v24, 0.0  ;;  %v718_v45 = vadd.f32 %v717_v33, %v8920_v6  ;;  %v1311_v59 = vmax.f32 %v521_v60, 0.0  ;;  %v7947_v15 = vld [vmem:[#allocation2 + $0x344] ss:$16 sps:$4 sm:$0xff]   ;;  %v7969_v60 = vld [vmem:[#allocation2 + $0x328] ss:$16 sps:$4 sm:$0xff]  }
 0x177   :  { %v1318_v35 = vmax.f32 %v523_v20, 0.0  ;;  %3181 = vmatmul.mubr.bf16.gmra.mrb[144].mxu0 %v9023_v58  ;;  %4089 = vmatprep.subr.bf16.mxu1 %v7968_v13  ;;  %v1320_v38 = vmax.f32 %v716_v31, 0.0  ;;  %v7977_v20 = vld [vmem:[#allocation2 + $0x34c] ss:$16 sps:$4 sm:$0xff]  }
 0x178   :  { %v1319_v4 = vmax.f32 %v525_v26, 0.0  ;;  %3953 = vmatmul.mubr.bf16.gmra.mrb[144].mxu1 %v9023_v58  ;;  %3190 = vmatprep.mubr.bf16.mxu0 %v9046_v48  ;;  %v1321_v12 = vmax.f32 %v718_v45, 0.0 }
 0x179   :  { %v9123_v9 = vpack.c.bf16 %v1318_v35, %v1310_v34  ;;  %3962 = vmatprep.mubr.bf16.mxu1 %v9046_v48  ;;  %3318 = vmatpush1.bf16.msra.mxu0 %v7927_v23  ;;  %v9128_v16 = vpack.c.bf16 %v1320_v38, %v1312_v0  ;;  %v7945_v0 = vld [vmem:[#allocation2 + $0x340] ss:$16 sps:$4 sm:$0xff]   ;;  %v7956_v35 = vld [vmem:[#allocation2 + $0x364] ss:$16 sps:$4 sm:$0xff]  }
 0x17a   :  { %v9126_v47 = vpack.c.bf16 %v1319_v4, %v1311_v59  ;;  %v528_v13 = vpop.f32.mrb[40].mxu0  ;;  %3319 = vmatprep.subr.bf16.mxu0 %v7938_v27  ;;  %4090 = vmatpush1.bf16.msra.mxu1 %v7966_v29  ;;  %v721_v22 = vpop.f32.mrb[40].mxu1  ;;  %v9131_v24 = vpack.c.bf16 %v1321_v12, %v1313_v55 }
 0x17b   :  { %v529_v58 = vadd.f32 %v528_v13, %v8903_v1  ;;  %v530_v18 = vpop.f32.mrb[41].mxu0  ;;  %4091 = vmatprep.subr.bf16.mxu1 %v7971_v52  ;;  %v722_v49 = vadd.f32 %v721_v22, %v8916_v5  ;;  %v723_v26 = vpop.f32.mrb[41].mxu1  ;;  %v7975_v52 = vld [vmem:[#allocation2 + $0x348] ss:$16 sps:$4 sm:$0xff]  }
 0x17c   :  { %v531_v48 = vadd.f32 %v530_v18, %v8908_v44  ;;  %v532_v23 = vpop.f32.mrb[42].mxu0  ;;  %v724_v31 = vadd.f32 %v723_v26, %v8920_v6  ;;  %v725_v33 = vpop.f32.mrb[42].mxu1  ;;  %v7965_v26 = vld [vmem:[#allocation2 + $0x384] ss:$16 sps:$4 sm:$0xff]  }
 0x17d   :  { %v533_v27 = vadd.f32 %v532_v23, %v8903_v1  ;;  %v534_v29 = vpop.f32.mrb[43].mxu0  ;;  %3320 = vmatpush1.bf16.msra.mxu0 %v7936_v17  ;;  %v1328_v55 = vmax.f32 %v722_v49, 0.0  ;;  %v726_v45 = vadd.f32 %v725_v33, %v8916_v5  ;;  %v727_v59 = vpop.f32.mrb[43].mxu1  ;;  %v1326_v4 = vmax.f32 %v529_v58, 0.0  ;;  %v7980_v17 = vld [vmem:[#allocation2 + $0x36c] ss:$16 sps:$4 sm:$0xff]  }
 0x17e   :  { %v535_v34 = vadd.f32 %v534_v29, %v8908_v44  ;;  %3321 = vmatprep.subr.bf16.mxu0 %v7947_v15  ;;  %4092 = vmatpush1.bf16.msra.mxu1 %v7969_v60  ;;  %v1329_v12 = vmax.f32 %v724_v31, 0.0  ;;  %v728_v13 = vadd.f32 %v727_v59, %v8920_v6  ;;  %v1327_v18 = vmax.f32 %v531_v48, 0.0  ;;  %v7954_v58 = vld [vmem:[#allocation2 + $0x360] ss:$16 sps:$4 sm:$0xff]   ;;  %v7978_v48 = vld [vmem:[#allocation2 + $0x368] ss:$16 sps:$4 sm:$0xff]  }
 0x17f   :  { %v1334_v38 = vmax.f32 %v533_v27, 0.0  ;;  %3191 = vmatmul.mubr.bf16.gmra.mrb[148].mxu0 %v9043_v51  ;;  %4093 = vmatprep.subr.bf16.mxu1 %v7977_v20  ;;  %v1336_v15 = vmax.f32 %v726_v45, 0.0  ;;  %v7986_v31 = vld [vmem:[#allocation2 + $0x38c] ss:$16 sps:$4 sm:$0xff]  }
 0x180   :  { %v1335_v22 = vmax.f32 %v535_v34, 0.0  ;;  %3963 = vmatmul.mubr.bf16.gmra.mrb[148].mxu1 %v9043_v51  ;;  %3200 = vmatprep.mubr.bf16.mxu0 %v9066_v53  ;;  %v1337_v23 = vmax.f32 %v728_v13, 0.0  ;;  %v7974_v13 = vld [vmem:[#allocation2 + $0x3a4] ss:$16 sps:$4 sm:$0xff]  }
 0x181   :  { %v9143_v60 = vpack.c.bf16 %v1334_v38, %v1326_v4  ;;  %3972 = vmatprep.mubr.bf16.mxu1 %v9066_v53  ;;  %3322 = vmatpush1.bf16.msra.mxu0 %v7945_v0  ;;  %v9148_v27 = vpack.c.bf16 %v1336_v15, %v1328_v55  ;;  %v7963_v55 = vld [vmem:[#allocation2 + $0x380] ss:$16 sps:$4 sm:$0xff]  }
 0x182   :  { %v9146_v49 = vpack.c.bf16 %v1335_v22, %v1327_v18  ;;  %v538_v20 = vpop.f32.mrb[44].mxu0  ;;  %3323 = vmatprep.subr.bf16.mxu0 %v7956_v35  ;;  %4094 = vmatpush1.bf16.msra.mxu1 %v7975_v52  ;;  %v731_v33 = vpop.f32.mrb[44].mxu1  ;;  %v9151_v34 = vpack.c.bf16 %v1337_v23, %v1329_v12  ;;  %v7984_v12 = vld [vmem:[#allocation2 + $0x388] ss:$16 sps:$4 sm:$0xff]  }
 0x183   :  { %v539_v51 = vadd.f32 %v538_v20, %v8903_v1  ;;  %v540_v29 = vpop.f32.mrb[45].mxu0  ;;  %4095 = vmatprep.subr.bf16.mxu1 %v7980_v17  ;;  %v732_v45 = vadd.f32 %v731_v33, %v8916_v5  ;;  %v733_v59 = vpop.f32.mrb[45].mxu1 }
 0x184   :  { %v541_v53 = vadd.f32 %v540_v29, %v8908_v44  ;;  %v542_v0 = vpop.f32.mrb[46].mxu0  ;;  %v734_v4 = vadd.f32 %v733_v59, %v8920_v6  ;;  %v735_v38 = vpop.f32.mrb[46].mxu1 }
 0x185   :  { %v543_v35 = vadd.f32 %v542_v0, %v8903_v1  ;;  %v544_v52 = vpop.f32.mrb[47].mxu0  ;;  %3324 = vmatpush1.bf16.msra.mxu0 %v7954_v58  ;;  %v1344_v18 = vmax.f32 %v732_v45, 0.0  ;;  %v736_v22 = vadd.f32 %v735_v38, %v8916_v5  ;;  %v737_v15 = vpop.f32.mrb[47].mxu1  ;;  %v1342_v23 = vmax.f32 %v539_v51, 0.0  ;;  %v7989_v58 = vld [vmem:[#allocation2 + $0x3ac] ss:$16 sps:$4 sm:$0xff]  }
 0x186   :  { %v545_v17 = vadd.f32 %v544_v52, %v8908_v44  ;;  %3325 = vmatprep.subr.bf16.mxu0 %v7965_v26  ;;  %4096 = vmatpush1.bf16.msra.mxu1 %v7978_v48  ;;  %v1345_v29 = vmax.f32 %v734_v4, 0.0  ;;  %v738_v33 = vadd.f32 %v737_v15, %v8920_v6  ;;  %v1343_v0 = vmax.f32 %v541_v53, 0.0  ;;  %v7972_v51 = vld [vmem:[#allocation2 + $0x3a0] ss:$16 sps:$4 sm:$0xff]   ;;  %v7983_v52 = vld [vmem:[#allocation2 + $0x3c4] ss:$16 sps:$4 sm:$0xff]  }
 0x187   :  { %v1350_v20 = vmax.f32 %v543_v35, 0.0  ;;  %3201 = vmatmul.mubr.bf16.gmra.mrb[152].mxu0 %v9063_v37  ;;  %4097 = vmatprep.subr.bf16.mxu1 %v7986_v31  ;;  %v1352_v26 = vmax.f32 %v736_v22, 0.0  ;;  %v7987_v53 = vld [vmem:[#allocation2 + $0x3a8] ss:$16 sps:$4 sm:$0xff]  }
 0x188   :  { %v1351_v59 = vmax.f32 %v545_v17, 0.0  ;;  %3973 = vmatmul.mubr.bf16.gmra.mrb[152].mxu1 %v9063_v37  ;;  %3210 = vmatprep.mubr.bf16.mxu0 %v9086_v56  ;;  %v1353_v45 = vmax.f32 %v738_v33, 0.0  ;;  %v7995_v17 = vld [vmem:[#allocation2 + $0x3cc] ss:$16 sps:$4 sm:$0xff]  }
 0x189   :  { %v9163_v48 = vpack.c.bf16 %v1350_v20, %v1342_v23  ;;  %3982 = vmatprep.mubr.bf16.mxu1 %v9086_v56  ;;  %3326 = vmatpush1.bf16.msra.mxu0 %v7963_v55  ;;  %v9168_v4 = vpack.c.bf16 %v1352_v26, %v1344_v18  ;;  %v7981_v18 = vld [vmem:[#allocation2 + $0x3c0] ss:$16 sps:$4 sm:$0xff]  }
 0x18a   :  { %v9166_v35 = vpack.c.bf16 %v1351_v59, %v1343_v0  ;;  %v548_v31 = vpop.f32.mrb[48].mxu0  ;;  %3327 = vmatprep.subr.bf16.mxu0 %v7974_v13  ;;  %4098 = vmatpush1.bf16.msra.mxu1 %v7984_v12  ;;  %v741_v22 = vpop.f32.mrb[48].mxu1  ;;  %v9171_v15 = vpack.c.bf16 %v1353_v45, %v1345_v29  ;;  %v7992_v29 = vld [vmem:[#allocation2 + $0x3e4] ss:$16 sps:$4 sm:$0xff]   ;;  %v7993_v59 = vld [vmem:[#allocation2 + $0x3c8] ss:$16 sps:$4 sm:$0xff]  }
 0x18b   :  { %v549_v37 = vadd.f32 %v548_v31, %v8903_v1  ;;  %v550_v38 = vpop.f32.mrb[49].mxu0  ;;  %4099 = vmatprep.subr.bf16.mxu1 %v7989_v58  ;;  %v742_v23 = vadd.f32 %v741_v22, %v8916_v5  ;;  %v743_v20 = vpop.f32.mrb[49].mxu1 }
 0x18c   :  { %v551_v56 = vadd.f32 %v550_v38, %v8908_v44  ;;  %v552_v55 = vpop.f32.mrb[50].mxu0  ;;  %v744_v33 = vadd.f32 %v743_v20, %v8920_v6  ;;  %v745_v0 = vpop.f32.mrb[50].mxu1 }
 0x18d   :  { %v553_v13 = vadd.f32 %v552_v55, %v8903_v1  ;;  %v554_v12 = vpop.f32.mrb[51].mxu0  ;;  %3328 = vmatpush1.bf16.msra.mxu0 %v7972_v51  ;;  %v1360_v26 = vmax.f32 %v742_v23, 0.0  ;;  %v746_v45 = vadd.f32 %v745_v0, %v8916_v5  ;;  %v747_v31 = vpop.f32.mrb[51].mxu1  ;;  %v1358_v38 = vmax.f32 %v549_v37, 0.0  ;;  %v7998_v51 = vld [vmem:[#allocation2 + $0x3ec] ss:$16 sps:$4 sm:$0xff]  }
 0x18e   :  { %v555_v58 = vadd.f32 %v554_v12, %v8908_v44  ;;  %3329 = vmatprep.subr.bf16.mxu0 %v7983_v52  ;;  %4100 = vmatpush1.bf16.msra.mxu1 %v7987_v53  ;;  %v1361_v55 = vmax.f32 %v744_v33, 0.0  ;;  %v748_v20 = vadd.f32 %v747_v31, %v8920_v6  ;;  %v1359_v3 = vmax.f32 %v551_v56, 0.0  ;;  %v7990_v37 = vld [vmem:[#allocation2 + $0x3e0] ss:$16 sps:$4 sm:$0xff]   ;;  %v7996_v12 = vld [vmem:[#allocation2 + $0x3e8] ss:$16 sps:$4 sm:$0xff]  }
 0x18f   :  { %v1366_v22 = vmax.f32 %v553_v13, 0.0  ;;  %3211 = vmatmul.mubr.bf16.gmra.mrb[156].mxu0 %v9083_v39  ;;  %4101 = vmatprep.subr.bf16.mxu1 %v7995_v17  ;;  %v1368_v52 = vmax.f32 %v746_v45, 0.0  ;;  %v8001_v56 = vld [vmem:[#allocation2 + $0x404] ss:$16 sps:$4 sm:$0xff]  }
 0x190   :  { %v1367_v2 = vmax.f32 %v555_v58, 0.0  ;;  %3983 = vmatmul.mubr.bf16.gmra.mrb[156].mxu1 %v9083_v39  ;;  %3220 = vmatprep.mubr.bf16.mxu0 %v9106_v46  ;;  %v1369_v23 = vmax.f32 %v748_v20, 0.0  ;;  %v8028_v20 = vld [vmem:[#allocation2 + $0x40c] ss:$16 sps:$4 sm:$0xff]  }
 0x191   :  { %v9183_v53 = vpack.c.bf16 %v1366_v22, %v1358_v38  ;;  %3992 = vmatprep.mubr.bf16.mxu1 %v9106_v46  ;;  %3330 = vmatpush1.bf16.msra.mxu0 %v7981_v18  ;;  %v9188_v33 = vpack.c.bf16 %v1368_v52, %v1360_v26 }
 0x192   :  { %v9186_v13 = vpack.c.bf16 %v1367_v2, %v1359_v3  ;;  %v558_v17 = vpop.f32.mrb[52].mxu0  ;;  %3331 = vmatprep.subr.bf16.mxu0 %v7992_v29  ;;  %4102 = vmatpush1.bf16.msra.mxu1 %v7993_v59  ;;  %v751_v58 = vpop.f32.mrb[52].mxu1  ;;  %v9191_v45 = vpack.c.bf16 %v1369_v23, %v1361_v55 }
 0x193   :  { %v559_v39 = vadd.f32 %v558_v17, %v8903_v1  ;;  %v560_v0 = vpop.f32.mrb[53].mxu0  ;;  %4103 = vmatprep.subr.bf16.mxu1 %v7998_v51  ;;  %v752_v2 = vadd.f32 %v751_v58, %v8916_v5  ;;  %v753_v3 = vpop.f32.mrb[53].mxu1 }
 0x194   :  { %v561_v46 = vadd.f32 %v560_v0, %v8908_v44  ;;  %v562_v18 = vpop.f32.mrb[54].mxu0  ;;  %v754_v26 = vadd.f32 %v753_v3, %v8920_v6  ;;  %v755_v31 = vpop.f32.mrb[54].mxu1 }
 0x195   :  { %v563_v29 = vadd.f32 %v562_v18, %v8903_v1  ;;  %v564_v59 = vpop.f32.mrb[55].mxu0  ;;  %3332 = vmatpush1.bf16.msra.mxu0 %v7990_v37  ;;  %v1376_v22 = vmax.f32 %v752_v2, 0.0  ;;  %v756_v51 = vadd.f32 %v755_v31, %v8916_v5  ;;  %v757_v55 = vpop.f32.mrb[55].mxu1  ;;  %v1374_v52 = vmax.f32 %v559_v39, 0.0 }
 0x196   :  { %v565_v38 = vadd.f32 %v564_v59, %v8908_v44  ;;  %4104 = vmatpush1.bf16.msra.mxu1 %v7996_v12  ;;  %3494 = vmatprep.subr.bf16.mxu0 %v8001_v56  ;;  %v1377_v17 = vmax.f32 %v754_v26, 0.0  ;;  %v758_v0 = vadd.f32 %v757_v55, %v8920_v6  ;;  %v1375_v37 = vmax.f32 %v561_v46, 0.0 }
 0x197   :  { %v1382_v23 = vmax.f32 %v563_v29, 0.0  ;;  %3221 = vmatmul.mubr.bf16.gmra.mrb[160].mxu0 %v9103_v40  ;;  %v1384_v12 = vmax.f32 %v756_v51, 0.0  ;;  %4266 = vmatprep.subr.bf16.mxu1 %v8028_v20 }
 0x198   :  { %v1383_v58 = vmax.f32 %v565_v38, 0.0  ;;  %3993 = vmatmul.mubr.bf16.gmra.mrb[160].mxu1 %v9103_v40  ;;  %3230 = vmatprep.mubr.bf16.mxu0 %v9126_v47  ;;  %v1385_v18 = vmax.f32 %v758_v0, 0.0 }
 0x199   :  { %v9203_v56 = vpack.c.bf16 %v1382_v23, %v1374_v52  ;;  %4002 = vmatprep.mubr.bf16.mxu1 %v9126_v47  ;;  %v9208_v3 = vpack.c.bf16 %v1384_v12, %v1376_v22 }
 0x19a   :  { %v9206_v39 = vpack.c.bf16 %v1383_v58, %v1375_v37  ;;  %v568_v2 = vpop.f32.mrb[56].mxu0  ;;  %v761_v59 = vpop.f32.mrb[56].mxu1  ;;  %v9211_v26 = vpack.c.bf16 %v1385_v18, %v1377_v17 }
 0x19b   :  { %v569_v29 = vadd.f32 %v568_v2, %v8903_v1  ;;  %v570_v46 = vpop.f32.mrb[57].mxu0  ;;  %v762_v38 = vadd.f32 %v761_v59, %v8916_v5  ;;  %v763_v51 = vpop.f32.mrb[57].mxu1 }
 0x19c   :  { %v571_v40 = vadd.f32 %v570_v46, %v8908_v44  ;;  %v572_v31 = vpop.f32.mrb[58].mxu0  ;;  %v764_v20 = vadd.f32 %v763_v51, %v8920_v6  ;;  %v765_v52 = vpop.f32.mrb[58].mxu1 }
 0x19d   :  { %v573_v47 = vadd.f32 %v572_v31, %v8903_v1  ;;  %v574_v55 = vpop.f32.mrb[59].mxu0  ;;  %v1392_v23 = vmax.f32 %v762_v38, 0.0  ;;  %v766_v0 = vadd.f32 %v765_v52, %v8916_v5  ;;  %v767_v37 = vpop.f32.mrb[59].mxu1  ;;  %v1390_v17 = vmax.f32 %v569_v29, 0.0 }
 0x19e   :  { %v575_v22 = vadd.f32 %v574_v55, %v8908_v44  ;;  %v1393_v12 = vmax.f32 %v764_v20, 0.0  ;;  %v768_v18 = vadd.f32 %v767_v37, %v8920_v6  ;;  %v1391_v2 = vmax.f32 %v571_v40, 0.0 }
 0x19f   :  { %v1398_v58 = vmax.f32 %v573_v47, 0.0  ;;  %3231 = vmatmul.mubr.bf16.gmra.mrb[164].mxu0 %v9123_v9  ;;  %v1400_v59 = vmax.f32 %v766_v0, 0.0  ;;  %v163_v38 = vsub.s32 4, %v8885_v61  ;;  %v167_v29 = vsub.s32 5, %v8885_v61 }
 0x1a0   :  { %v1399_v46 = vmax.f32 %v575_v22, 0.0  ;;  %4003 = vmatmul.mubr.bf16.gmra.mrb[164].mxu1 %v9123_v9  ;;  %3240 = vmatprep.mubr.bf16.mxu0 %v9146_v49  ;;  %v1401_v51 = vmax.f32 %v768_v18, 0.0 }
 0x1a1   :  { %v9223_v31 = vpack.c.bf16 %v1398_v58, %v1390_v17  ;;  %4012 = vmatprep.mubr.bf16.mxu1 %v9146_v49  ;;  %v9230_v20 = vpack.c.bf16 %v1400_v59, %v1392_v23  ;;  %v8351_v23 = vld [vmem:[%s10174_s2] sm:$0xff] }
 0x1a2   :  { %v9228_v47 = vpack.c.bf16 %v1399_v46, %v1391_v2  ;;  %v578_v55 = vpop.f32.mrb[60].mxu0  ;;  %v771_v52 = vpop.f32.mrb[60].mxu1  ;;  %v9233_v22 = vpack.c.bf16 %v1401_v51, %v1393_v12  ;;  %v9241_v2 = vrot.slane %v8351_v23, %v163_v38  ;;  %v9243_v46 = vrot.slane %v8351_v23, %v167_v29 }
 0x1a3   :  { %10225 = vst [vmem:[#allocation18_spill] sm:$0xff] %v9230_v20  ;;  %v579_v40 = vadd.f32 %v578_v55, %v8903_v1  ;;  %v580_v9 = vpop.f32.mrb[61].mxu0  ;;  %v772_v49 = vadd.f32 %v771_v52, %v8916_v5  ;;  %v773_v17 = vpop.f32.mrb[61].mxu1 }
 0x1a4   :  { %v581_v0 = vadd.f32 %v580_v9, %v8908_v44  ;;  %v582_v37 = vpop.f32.mrb[62].mxu0  ;;  %v774_v12 = vadd.f32 %v773_v17, %v8920_v6  ;;  %v775_v59 = vpop.f32.mrb[62].mxu1 }
 0x1a5   :  { %v583_v58 = vadd.f32 %v582_v37, %v8903_v1  ;;  %v584_v18 = vpop.f32.mrb[63].mxu0  ;;  %v1406_v51 = vmax.f32 %v579_v40, 0.0  ;;  %v1408_v9 = vmax.f32 %v772_v49, 0.0  ;;  %v776_v52 = vadd.f32 %v775_v59, %v8916_v5  ;;  %v777_v63 = vpop.f32.mrb[63].mxu1 }
 0x1a6   :  { %v585_v55 = vadd.f32 %v584_v18, %v8908_v44  ;;  %v1407_v1 = vmax.f32 %v581_v0, 0.0  ;;  %v1409_v42 = vmax.f32 %v774_v12, 0.0  ;;  %v778_v38 = vadd.f32 %v777_v63, %v8920_v6 }
 0x1a7   :  { %v1414_v37 = vmax.f32 %v583_v58, 0.0  ;;  %3241 = vmatmul.mubr.bf16.gmra.mrb[168].mxu0 %v9143_v60  ;;  %v1416_v29 = vmax.f32 %v776_v52, 0.0  ;;  %v171_v40 = vsub.s32 6, %v8885_v61  ;;  %v175_v44 = vsub.s32 7, %v8885_v61 }
 0x1a8   :  { %v1415_v20 = vmax.f32 %v585_v55, 0.0  ;;  %4013 = vmatmul.mubr.bf16.gmra.mrb[168].mxu1 %v9143_v60  ;;  %3250 = vmatprep.mubr.bf16.mxu0 %v9166_v35  ;;  %v1417_v5 = vmax.f32 %v778_v38, 0.0 }
 0x1a9   :  { %v9254_v49 = vpack.c.bf16 %v1414_v37, %v1406_v51  ;;  %4022 = vmatprep.mubr.bf16.mxu1 %v9166_v35  ;;  %v9259_v58 = vrot.slane %v8351_v23, %v171_v40  ;;  %v9261_v63 = vrot.slane %v8351_v23, %v175_v44  ;;  %v9263_v6 = vpack.c.bf16 %v1416_v29, %v1408_v9 }
 0x1aa   :  { %v9257_v0 = vpack.c.bf16 %v1415_v20, %v1407_v1  ;;  %v814_v17 = vpop.f32.mrb[64].mxu0  ;;  %v1007_v12 = vpop.f32.mrb[64].mxu1  ;;  %v9266_v59 = vpack.c.bf16 %v1417_v5, %v1409_v42 }
 0x1ab   :  { %v815_v60 = vadd.f32 %v814_v17, %v9241_v2  ;;  %v816_v18 = vpop.f32.mrb[65].mxu0  ;;  %v1008_v35 = vadd.f32 %v1007_v12, %v9259_v58  ;;  %v1009_v20 = vpop.f32.mrb[65].mxu1 }
 0x1ac   :  { %v817_v51 = vadd.f32 %v816_v18, %v9243_v46  ;;  %v818_v55 = vpop.f32.mrb[66].mxu0  ;;  %v1010_v23 = vadd.f32 %v1009_v20, %v9261_v63  ;;  %v1011_v37 = vpop.f32.mrb[66].mxu1 }
 0x1ad   :  { %v819_v52 = vadd.f32 %v818_v55, %v9241_v2  ;;  %v820_v1 = vpop.f32.mrb[67].mxu0  ;;  %v1172_v38 = vmax.f32 %v1008_v35, 0.0  ;;  %v1012_v29 = vadd.f32 %v1011_v37, %v9259_v58  ;;  %v1013_v40 = vpop.f32.mrb[67].mxu1  ;;  %v1170_v42 = vmax.f32 %v815_v60, 0.0 }
 0x1ae   :  { %v821_v9 = vadd.f32 %v820_v1, %v9243_v46  ;;  %v1173_v5 = vmax.f32 %v1010_v23, 0.0  ;;  %v1014_v17 = vadd.f32 %v1013_v40, %v9261_v63  ;;  %v1171_v18 = vmax.f32 %v817_v51, 0.0 }
 0x1af   :  { %v1178_v44 = vmax.f32 %v819_v52, 0.0  ;;  %3251 = vmatmul.mubr.bf16.gmra.mrb[172].mxu0 %v9163_v48  ;;  %v1180_v55 = vmax.f32 %v1012_v29, 0.0 }
 0x1b0   :  { %v1179_v12 = vmax.f32 %v821_v9, 0.0  ;;  %4023 = vmatmul.mubr.bf16.gmra.mrb[172].mxu1 %v9163_v48  ;;  %3260 = vmatprep.mubr.bf16.mxu0 %v9186_v13  ;;  %v1181_v35 = vmax.f32 %v1014_v17, 0.0 }
 0x1b1   :  { %v9278_v20 = vpack.c.bf16 %v1178_v44, %v1170_v42  ;;  %4032 = vmatprep.mubr.bf16.mxu1 %v9186_v13  ;;  %v9283_v52 = vpack.c.bf16 %v1180_v55, %v1172_v38 }
 0x1b2   :  { %v9281_v1 = vpack.c.bf16 %v1179_v12, %v1171_v18  ;;  %v824_v60 = vpop.f32.mrb[68].mxu0  ;;  %v9286_v51 = vpack.c.bf16 %v1181_v35, %v1173_v5 }
 0x1b3   :  { %10226 = vst [vmem:[#allocation19_spill] sm:$0xff] %v9283_v52  ;;  %v825_v23 = vadd.f32 %v824_v60, %v9241_v2  ;;  %v826_v37 = vpop.f32.mrb[69].mxu0  ;;  %v1017_v9 = vpop.f32.mrb[68].mxu1 }
 0x1b4   :  { %10227 = vst [vmem:[#allocation20_spill] sm:$0xff] %v9286_v51  ;;  %v827_v48 = vadd.f32 %v826_v37, %v9243_v46  ;;  %v828_v40 = vpop.f32.mrb[70].mxu0  ;;  %v1018_v29 = vadd.f32 %v1017_v9, %v9259_v58  ;;  %v1019_v42 = vpop.f32.mrb[69].mxu1 }
 0x1b5   :  { %v829_v13 = vadd.f32 %v828_v40, %v9241_v2  ;;  %v830_v44 = vpop.f32.mrb[71].mxu0  ;;  %v1020_v17 = vadd.f32 %v1019_v42, %v9261_v63  ;;  %v1021_v18 = vpop.f32.mrb[70].mxu1  ;;  %v1186_v35 = vmax.f32 %v825_v23, 0.0 }
 0x1b6   :  { %v831_v38 = vadd.f32 %v830_v44, %v9243_v46  ;;  %v1188_v12 = vmax.f32 %v1018_v29, 0.0  ;;  %v1022_v55 = vadd.f32 %v1021_v18, %v9259_v58  ;;  %v1023_v5 = vpop.f32.mrb[71].mxu1  ;;  %v1187_v61 = vmax.f32 %v827_v48, 0.0 }
 0x1b7   :  { %v1194_v60 = vmax.f32 %v829_v13, 0.0  ;;  %3261 = vmatmul.mubr.bf16.gmra.mrb[176].mxu0 %v9183_v53  ;;  %v1189_v37 = vmax.f32 %v1020_v17, 0.0  ;;  %v1024_v9 = vadd.f32 %v1023_v5, %v9261_v63 }
 0x1b8   :  { %v1195_v52 = vmax.f32 %v831_v38, 0.0  ;;  %4033 = vmatmul.mubr.bf16.gmra.mrb[176].mxu1 %v9183_v53  ;;  %3270 = vmatprep.mubr.bf16.mxu0 %v9206_v39  ;;  %v1196_v40 = vmax.f32 %v1022_v55, 0.0 }
 0x1b9   :  { %v9298_v42 = vpack.c.bf16 %v1194_v60, %v1186_v35  ;;  %4042 = vmatprep.mubr.bf16.mxu1 %v9206_v39  ;;  %v1197_v29 = vmax.f32 %v1024_v9, 0.0 }
 0x1ba   :  { %v9301_v44 = vpack.c.bf16 %v1195_v52, %v1187_v61  ;;  %v834_v23 = vpop.f32.mrb[72].mxu0  ;;  %v9303_v13 = vpack.c.bf16 %v1196_v40, %v1188_v12 }
 0x1bb   :  { %v835_v17 = vadd.f32 %v834_v23, %v9241_v2  ;;  %v836_v18 = vpop.f32.mrb[73].mxu0  ;;  %v9306_v48 = vpack.c.bf16 %v1197_v29, %v1189_v37  ;;  %v1027_v38 = vpop.f32.mrb[72].mxu1 }
 0x1bc   :  { %10228 = vst [vmem:[#allocation21_spill] sm:$0xff] %v9303_v13  ;;  %v837_v53 = vadd.f32 %v836_v18, %v9243_v46  ;;  %v838_v5 = vpop.f32.mrb[74].mxu0  ;;  %v1028_v55 = vadd.f32 %v1027_v38, %v9259_v58  ;;  %v1029_v35 = vpop.f32.mrb[73].mxu1 }
 0x1bd   :  { %10229 = vst [vmem:[#allocation22_spill] sm:$0xff] %v9306_v48  ;;  %v839_v39 = vadd.f32 %v838_v5, %v9241_v2  ;;  %v840_v60 = vpop.f32.mrb[75].mxu0  ;;  %v1030_v61 = vadd.f32 %v1029_v35, %v9261_v63  ;;  %v1031_v52 = vpop.f32.mrb[74].mxu1  ;;  %v1202_v29 = vmax.f32 %v835_v17, 0.0 }
 0x1be   :  { %v841_v12 = vadd.f32 %v840_v60, %v9243_v46  ;;  %v1204_v9 = vmax.f32 %v1028_v55, 0.0  ;;  %v1032_v40 = vadd.f32 %v1031_v52, %v9259_v58  ;;  %v1033_v37 = vpop.f32.mrb[75].mxu1  ;;  %v1203_v13 = vmax.f32 %v837_v53, 0.0 }
 0x1bf   :  { %v1210_v23 = vmax.f32 %v839_v39, 0.0  ;;  %3271 = vmatmul.mubr.bf16.gmra.mrb[180].mxu0 %v9203_v56  ;;  %v1205_v18 = vmax.f32 %v1030_v61, 0.0  ;;  %v1034_v38 = vadd.f32 %v1033_v37, %v9261_v63 }
 0x1c0   :  { %v1211_v48 = vmax.f32 %v841_v12, 0.0  ;;  %4043 = vmatmul.mubr.bf16.gmra.mrb[180].mxu1 %v9203_v56  ;;  %3280 = vmatprep.mubr.bf16.mxu0 %v9228_v47  ;;  %v1212_v5 = vmax.f32 %v1032_v40, 0.0 }
 0x1c1   :  { %v9318_v35 = vpack.c.bf16 %v1210_v23, %v1202_v29  ;;  %4052 = vmatprep.mubr.bf16.mxu1 %v9228_v47  ;;  %v1213_v55 = vmax.f32 %v1034_v38, 0.0 }
 0x1c2   :  { %v9321_v60 = vpack.c.bf16 %v1211_v48, %v1203_v13  ;;  %v844_v17 = vpop.f32.mrb[76].mxu0  ;;  %v9323_v39 = vpack.c.bf16 %v1212_v5, %v1204_v9 }
 0x1c3   :  { %v845_v61 = vadd.f32 %v844_v17, %v9241_v2  ;;  %v846_v52 = vpop.f32.mrb[77].mxu0  ;;  %v9326_v53 = vpack.c.bf16 %v1213_v55, %v1205_v18  ;;  %v1037_v12 = vpop.f32.mrb[76].mxu1 }
 0x1c4   :  { %10230 = vst [vmem:[#allocation23_spill] sm:$0xff] %v9323_v39  ;;  %v847_v56 = vadd.f32 %v846_v52, %v9243_v46  ;;  %v848_v37 = vpop.f32.mrb[78].mxu0  ;;  %v1038_v40 = vadd.f32 %v1037_v12, %v9259_v58  ;;  %v1039_v29 = vpop.f32.mrb[77].mxu1 }
 0x1c5   :  { %10231 = vst [vmem:[#allocation24_spill] sm:$0xff] %v9326_v53  ;;  %v849_v47 = vadd.f32 %v848_v37, %v9241_v2  ;;  %v850_v23 = vpop.f32.mrb[79].mxu0  ;;  %v1040_v13 = vadd.f32 %v1039_v29, %v9261_v63  ;;  %v1041_v48 = vpop.f32.mrb[78].mxu1  ;;  %v1218_v55 = vmax.f32 %v845_v61, 0.0 }
 0x1c6   :  { %v851_v9 = vadd.f32 %v850_v23, %v9243_v46  ;;  %v1220_v38 = vmax.f32 %v1038_v40, 0.0  ;;  %v1042_v5 = vadd.f32 %v1041_v48, %v9259_v58  ;;  %v1043_v18 = vpop.f32.mrb[79].mxu1  ;;  %v1219_v39 = vmax.f32 %v847_v56, 0.0 }
 0x1c7   :  { %v1226_v17 = vmax.f32 %v849_v47, 0.0  ;;  %3281 = vmatmul.mubr.bf16.gmra.mrb[184].mxu0 %v9223_v31  ;;  %v1221_v52 = vmax.f32 %v1040_v13, 0.0  ;;  %v1044_v12 = vadd.f32 %v1043_v18, %v9261_v63 }
 0x1c8   :  { %v1227_v53 = vmax.f32 %v851_v9, 0.0  ;;  %4053 = vmatmul.mubr.bf16.gmra.mrb[184].mxu1 %v9223_v31  ;;  %3290 = vmatprep.mubr.bf16.mxu0 %v9257_v0  ;;  %v1228_v37 = vmax.f32 %v1042_v5, 0.0 }
 0x1c9   :  { %v9338_v29 = vpack.c.bf16 %v1226_v17, %v1218_v55  ;;  %4062 = vmatprep.mubr.bf16.mxu1 %v9257_v0  ;;  %v1229_v40 = vmax.f32 %v1044_v12, 0.0 }
 0x1ca   :  { %v9341_v23 = vpack.c.bf16 %v1227_v53, %v1219_v39  ;;  %v854_v61 = vpop.f32.mrb[80].mxu0  ;;  %v9343_v47 = vpack.c.bf16 %v1228_v37, %v1220_v38 }
 0x1cb   :  { %v855_v13 = vadd.f32 %v854_v61, %v9241_v2  ;;  %v856_v48 = vpop.f32.mrb[81].mxu0  ;;  %v9346_v56 = vpack.c.bf16 %v1229_v40, %v1221_v52  ;;  %v1047_v9 = vpop.f32.mrb[80].mxu1 }
 0x1cc   :  { %10232 = vst [vmem:[#allocation25_spill] sm:$0xff] %v9343_v47  ;;  %v857_v31 = vadd.f32 %v856_v48, %v9243_v46  ;;  %v858_v18 = vpop.f32.mrb[82].mxu0  ;;  %v1048_v5 = vadd.f32 %v1047_v9, %v9259_v58  ;;  %v1049_v55 = vpop.f32.mrb[81].mxu1 }
 0x1cd   :  { %10233 = vst [vmem:[#allocation26_spill] sm:$0xff] %v9346_v56  ;;  %v859_v0 = vadd.f32 %v858_v18, %v9241_v2  ;;  %v860_v17 = vpop.f32.mrb[83].mxu0  ;;  %v1050_v39 = vadd.f32 %v1049_v55, %v9261_v63  ;;  %v1051_v53 = vpop.f32.mrb[82].mxu1  ;;  %v1234_v40 = vmax.f32 %v855_v13, 0.0 }
 0x1ce   :  { %v861_v38 = vadd.f32 %v860_v17, %v9243_v46  ;;  %v1236_v12 = vmax.f32 %v1048_v5, 0.0  ;;  %v1052_v37 = vadd.f32 %v1051_v53, %v9259_v58  ;;  %v1053_v52 = vpop.f32.mrb[83].mxu1  ;;  %v1235_v47 = vmax.f32 %v857_v31, 0.0 }
 0x1cf   :  { %v1242_v61 = vmax.f32 %v859_v0, 0.0  ;;  %3291 = vmatmul.mubr.bf16.gmra.mrb[188].mxu0 %v9254_v49  ;;  %v1237_v48 = vmax.f32 %v1050_v39, 0.0  ;;  %v1054_v9 = vadd.f32 %v1053_v52, %v9261_v63 }
 0x1d0   :  { %v1243_v56 = vmax.f32 %v861_v38, 0.0  ;;  %4063 = vmatmul.mubr.bf16.gmra.mrb[188].mxu1 %v9254_v49  ;;  %3333 = vmatprep.mubr.bf16.mxu0 %v8943_v36  ;;  %v1244_v18 = vmax.f32 %v1052_v37, 0.0 }
 0x1d1   :  { %v9358_v55 = vpack.c.bf16 %v1242_v61, %v1234_v40  ;;  %4105 = vmatprep.mubr.bf16.mxu1 %v8943_v36  ;;  %v1245_v5 = vmax.f32 %v1054_v9, 0.0 }
 0x1d2   :  { %v9361_v17 = vpack.c.bf16 %v1243_v56, %v1235_v47  ;;  %v864_v13 = vpop.f32.mrb[84].mxu0  ;;  %v9363_v0 = vpack.c.bf16 %v1244_v18, %v1236_v12  ;;  %v7999_v47 = vld [vmem:[#allocation2 + $0x400] ss:$16 sps:$4 sm:$0xff]   ;;  %v8004_v18 = vld [vmem:[#allocation2 + $0x424] ss:$16 sps:$4 sm:$0xff]  }
 0x1d3   :  { %10234 = vst [vmem:[#allocation27_spill] sm:$0xff] %v9358_v55  ;;  %v865_v39 = vadd.f32 %v864_v13, %v9241_v2  ;;  %v866_v53 = vpop.f32.mrb[85].mxu0  ;;  %v9366_v31 = vpack.c.bf16 %v1245_v5, %v1237_v48  ;;  %v1057_v38 = vpop.f32.mrb[84].mxu1  ;;  %v8026_v13 = vld [vmem:[#allocation2 + $0x408] ss:$16 sps:$4 sm:$0xff]  }
 0x1d4   :  { %10235 = vst [vmem:[#allocation28_spill] sm:$0xff] %v9361_v17  ;;  %10236 = vst [vmem:[#allocation29_spill] sm:$0xff] %v9363_v0  ;;  %v867_v49 = vadd.f32 %v866_v53, %v9243_v46  ;;  %v868_v52 = vpop.f32.mrb[86].mxu0  ;;  %v1058_v37 = vadd.f32 %v1057_v38, %v9259_v58  ;;  %v1059_v40 = vpop.f32.mrb[85].mxu1  ;;  %v8031_v38 = vld [vmem:[#allocation2 + $0x42c] ss:$16 sps:$4 sm:$0xff]  }
 0x1d5   :  { %10237 = vst [vmem:[#allocation30_spill] sm:$0xff] %v9366_v31  ;;  %v869_v36 = vadd.f32 %v868_v52, %v9241_v2  ;;  %v870_v61 = vpop.f32.mrb[87].mxu0  ;;  %v1060_v56 = vadd.f32 %v1059_v40, %v9261_v63  ;;  %v1061_v12 = vpop.f32.mrb[86].mxu1  ;;  %v1250_v53 = vmax.f32 %v865_v39, 0.0  ;;  %v8002_v39 = vld [vmem:[#allocation2 + $0x420] ss:$16 sps:$4 sm:$0xff]  }
 0x1d6   :  { %v871_v9 = vadd.f32 %v870_v61, %v9243_v46  ;;  %v1252_v48 = vmax.f32 %v1058_v37, 0.0  ;;  %v1062_v5 = vadd.f32 %v1061_v12, %v9259_v58  ;;  %v1063_v0 = vpop.f32.mrb[87].mxu1  ;;  %v1251_v55 = vmax.f32 %v867_v49, 0.0 }
 0x1d7   :  { %v1258_v31 = vmax.f32 %v869_v36, 0.0  ;;  %3334 = vmatmul.mubr.bf16.vlgmr.msra.gmra.mrb[128].mxu0 %v8940_v32  ;;  %v1253_v51 = vmax.f32 %v1060_v56, 0.0  ;;  %v1064_v52 = vadd.f32 %v1063_v0, %v9261_v63  ;;  %v8007_v56 = vld [vmem:[#allocation2 + $0x444] ss:$16 sps:$4 sm:$0xff]   ;;  %v8029_v0 = vld [vmem:[#allocation2 + $0x428] ss:$16 sps:$4 sm:$0xff]  }
 0x1d8   :  { %v1259_v17 = vmax.f32 %v871_v9, 0.0  ;;  %4106 = vmatmul.mubr.bf16.vlgmr.msra.gmra.mrb[128].mxu1 %v8940_v32  ;;  %3343 = vmatprep.mubr.bf16.mxu0 %v8965_v14  ;;  %v1260_v40 = vmax.f32 %v1062_v5, 0.0 }
 0x1d9   :  { %v9378_v61 = vpack.c.bf16 %v1258_v31, %v1250_v53  ;;  %3495 = vmatpush1.bf16.msra.mxu0 %v7999_v47  ;;  %4115 = vmatprep.mubr.bf16.mxu1 %v8965_v14  ;;  %v1261_v37 = vmax.f32 %v1064_v52, 0.0  ;;  %v8037_v31 = vld [vmem:[#allocation2 + $0x44c] ss:$16 sps:$4 sm:$0xff]  }
 0x1da   :  { %v9381_v36 = vpack.c.bf16 %v1259_v17, %v1251_v55  ;;  %v874_v12 = vpop.f32.mrb[88].mxu0  ;;  %3496 = vmatprep.subr.bf16.mxu0 %v8004_v18  ;;  %4267 = vmatpush1.bf16.msra.mxu1 %v8026_v13  ;;  %v9383_v49 = vpack.c.bf16 %v1260_v40, %v1252_v48  ;;  %v8005_v48 = vld [vmem:[#allocation2 + $0x440] ss:$16 sps:$4 sm:$0xff]  }
 0x1db   :  { %10238 = vst [vmem:[#allocation31_spill] sm:$0xff] %v9378_v61  ;;  %v875_v32 = vadd.f32 %v874_v12, %v9241_v2  ;;  %v876_v9 = vpop.f32.mrb[89].mxu0  ;;  %4268 = vmatprep.subr.bf16.mxu1 %v8031_v38  ;;  %v9386_v5 = vpack.c.bf16 %v1261_v37, %v1253_v51  ;;  %v1067_v47 = vpop.f32.mrb[88].mxu1  ;;  %v8010_v51 = vld [vmem:[#allocation2 + $0x464] ss:$16 sps:$4 sm:$0xff]  }
 0x1dc   :  { %10239 = vst [vmem:[#allocation32_spill] sm:$0xff] %v9381_v36  ;;  %10240 = vst [vmem:[#allocation33_spill] sm:$0xff] %v9383_v49  ;;  %v877_v14 = vadd.f32 %v876_v9, %v9243_v46  ;;  %v878_v53 = vpop.f32.mrb[90].mxu0  ;;  %v1068_v55 = vadd.f32 %v1067_v47, %v9259_v58  ;;  %v1069_v17 = vpop.f32.mrb[89].mxu1  ;;  %v8035_v37 = vld [vmem:[#allocation2 + $0x448] ss:$16 sps:$4 sm:$0xff]  }
 0x1dd   :  { %10241 = vst [vmem:[#allocation34_spill] sm:$0xff] %v9386_v5  ;;  %v879_v18 = vadd.f32 %v878_v53, %v9241_v2  ;;  %v880_v13 = vpop.f32.mrb[91].mxu0  ;;  %3497 = vmatpush1.bf16.msra.mxu0 %v8002_v39  ;;  %v1070_v52 = vadd.f32 %v1069_v17, %v9261_v63  ;;  %v1071_v40 = vpop.f32.mrb[90].mxu1  ;;  %v1266_v47 = vmax.f32 %v875_v32, 0.0  ;;  %v8040_v39 = vld [vmem:[#allocation2 + $0x46c] ss:$16 sps:$4 sm:$0xff]  }
 0x1de   :  { %v881_v38 = vadd.f32 %v880_v13, %v9243_v46  ;;  %3498 = vmatprep.subr.bf16.mxu0 %v8007_v56  ;;  %4269 = vmatpush1.bf16.msra.mxu1 %v8029_v0  ;;  %v1268_v12 = vmax.f32 %v1068_v55, 0.0  ;;  %v1072_v9 = vadd.f32 %v1071_v40, %v9259_v58  ;;  %v1073_v49 = vpop.f32.mrb[91].mxu1  ;;  %v1267_v61 = vmax.f32 %v877_v14, 0.0  ;;  %v8008_v32 = vld [vmem:[#allocation2 + $0x460] ss:$16 sps:$4 sm:$0xff]  }
 0x1df   :  { %v1274_v5 = vmax.f32 %v879_v18, 0.0  ;;  %3344 = vmatmul.mubr.bf16.gmra.mrb[132].mxu0 %v8962_v10  ;;  %4270 = vmatprep.subr.bf16.mxu1 %v8037_v31  ;;  %v1269_v53 = vmax.f32 %v1070_v52, 0.0  ;;  %v1074_v17 = vadd.f32 %v1073_v49, %v9261_v63  ;;  %v8013_v13 = vld [vmem:[#allocation2 + $0x484] ss:$16 sps:$4 sm:$0xff]   ;;  %v8038_v49 = vld [vmem:[#allocation2 + $0x468] ss:$16 sps:$4 sm:$0xff]  }
 0x1e0   :  { %v1275_v36 = vmax.f32 %v881_v38, 0.0  ;;  %4116 = vmatmul.mubr.bf16.gmra.mrb[132].mxu1 %v8962_v10  ;;  %3353 = vmatprep.mubr.bf16.mxu0 %v8987_v54  ;;  %v1276_v56 = vmax.f32 %v1072_v9, 0.0 }
 0x1e1   :  { %v9398_v0 = vpack.c.bf16 %v1274_v5, %v1266_v47  ;;  %4125 = vmatprep.mubr.bf16.mxu1 %v8987_v54  ;;  %3499 = vmatpush1.bf16.msra.mxu0 %v8005_v48  ;;  %v1277_v55 = vmax.f32 %v1074_v17, 0.0  ;;  %v8046_v5 = vld [vmem:[#allocation2 + $0x48c] ss:$16 sps:$4 sm:$0xff]   ;;  %v8044_v17 = vld [vmem:[#allocation2 + $0x488] ss:$16 sps:$4 sm:$0xff]  }
 0x1e2   :  { %v9401_v18 = vpack.c.bf16 %v1275_v36, %v1267_v61  ;;  %v884_v31 = vpop.f32.mrb[92].mxu0  ;;  %3500 = vmatprep.subr.bf16.mxu0 %v8010_v51  ;;  %4271 = vmatpush1.bf16.msra.mxu1 %v8035_v37  ;;  %v9403_v14 = vpack.c.bf16 %v1276_v56, %v1268_v12  ;;  %v8011_v12 = vld [vmem:[#allocation2 + $0x480] ss:$16 sps:$4 sm:$0xff]  }
 0x1e3   :  { %v885_v10 = vadd.f32 %v884_v31, %v9241_v2  ;;  %v886_v52 = vpop.f32.mrb[93].mxu0  ;;  %4272 = vmatprep.subr.bf16.mxu1 %v8040_v39  ;;  %v9406_v40 = vpack.c.bf16 %v1277_v55, %v1269_v53  ;;  %v1077_v54 = vpop.f32.mrb[92].mxu1  ;;  %v8016_v53 = vld [vmem:[#allocation2 + $0x4a4] ss:$16 sps:$4 sm:$0xff]  }
 0x1e4   :  { %10242 = vst [vmem:[#allocation35_spill] sm:$0xff] %v9403_v14  ;;  %v887_v48 = vadd.f32 %v886_v52, %v9243_v46  ;;  %v888_v38 = vpop.f32.mrb[94].mxu0  ;;  %v1078_v61 = vadd.f32 %v1077_v54, %v9259_v58  ;;  %v1079_v36 = vpop.f32.mrb[93].mxu1 }
 0x1e5   :  { %10243 = vst [vmem:[#allocation36_spill] sm:$0xff] %v9406_v40  ;;  %v889_v51 = vadd.f32 %v888_v38, %v9241_v2  ;;  %v890_v37 = vpop.f32.mrb[95].mxu0  ;;  %3501 = vmatpush1.bf16.msra.mxu0 %v8008_v32  ;;  %v1080_v9 = vadd.f32 %v1079_v36, %v9261_v63  ;;  %v1081_v47 = vpop.f32.mrb[94].mxu1  ;;  %v1282_v52 = vmax.f32 %v885_v10, 0.0  ;;  %v8049_v32 = vld [vmem:[#allocation2 + $0x4ac] ss:$16 sps:$4 sm:$0xff]  }
 0x1e6   :  { %v891_v39 = vadd.f32 %v890_v37, %v9243_v46  ;;  %3502 = vmatprep.subr.bf16.mxu0 %v8013_v13  ;;  %4273 = vmatpush1.bf16.msra.mxu1 %v8038_v49  ;;  %v1284_v56 = vmax.f32 %v1078_v61, 0.0  ;;  %v1082_v55 = vadd.f32 %v1081_v47, %v9259_v58  ;;  %v1083_v31 = vpop.f32.mrb[95].mxu1  ;;  %v1283_v14 = vmax.f32 %v887_v48, 0.0  ;;  %v8014_v10 = vld [vmem:[#allocation2 + $0x4a0] ss:$16 sps:$4 sm:$0xff]  }
 0x1e7   :  { %v1290_v54 = vmax.f32 %v889_v51, 0.0  ;;  %3354 = vmatmul.mubr.bf16.gmra.mrb[136].mxu0 %v8984_v43  ;;  %4274 = vmatprep.subr.bf16.mxu1 %v8046_v5  ;;  %v1285_v38 = vmax.f32 %v1080_v9, 0.0  ;;  %v1084_v36 = vadd.f32 %v1083_v31, %v9261_v63  ;;  %v8019_v37 = vld [vmem:[#allocation2 + $0x4c4] ss:$16 sps:$4 sm:$0xff]   ;;  %v8047_v48 = vld [vmem:[#allocation2 + $0x4a8] ss:$16 sps:$4 sm:$0xff]  }
 0x1e8   :  { %v1291_v40 = vmax.f32 %v891_v39, 0.0  ;;  %4126 = vmatmul.mubr.bf16.gmra.mrb[136].mxu1 %v8984_v43  ;;  %3363 = vmatprep.mubr.bf16.mxu0 %v9009_v25  ;;  %v1292_v13 = vmax.f32 %v1082_v55, 0.0  ;;  %v8055_v39 = vld [vmem:[#allocation2 + $0x4cc] ss:$16 sps:$4 sm:$0xff]  }
 0x1e9   :  { %v9418_v49 = vpack.c.bf16 %v1290_v54, %v1282_v52  ;;  %4135 = vmatprep.mubr.bf16.mxu1 %v9009_v25  ;;  %3503 = vmatpush1.bf16.msra.mxu0 %v8011_v12  ;;  %v1293_v61 = vmax.f32 %v1084_v36, 0.0  ;;  %v8053_v36 = vld [vmem:[#allocation2 + $0x4c8] ss:$16 sps:$4 sm:$0xff]  }
 0x1ea   :  { %v9421_v51 = vpack.c.bf16 %v1291_v40, %v1283_v14  ;;  %v894_v5 = vpop.f32.mrb[96].mxu0  ;;  %3504 = vmatprep.subr.bf16.mxu0 %v8016_v53  ;;  %4275 = vmatpush1.bf16.msra.mxu1 %v8044_v17  ;;  %v9423_v9 = vpack.c.bf16 %v1292_v13, %v1284_v56  ;;  %v8017_v56 = vld [vmem:[#allocation2 + $0x4c0] ss:$16 sps:$4 sm:$0xff]  }
 0x1eb   :  { %v895_v43 = vadd.f32 %v894_v5, %v9241_v2  ;;  %v896_v47 = vpop.f32.mrb[97].mxu0  ;;  %4276 = vmatprep.subr.bf16.mxu1 %v8049_v32  ;;  %v9426_v55 = vpack.c.bf16 %v1293_v61, %v1285_v38  ;;  %v1087_v25 = vpop.f32.mrb[96].mxu1  ;;  %v8022_v38 = vld [vmem:[#allocation2 + $0x4e4] ss:$16 sps:$4 sm:$0xff]  }
 0x1ec   :  { %10244 = vst [vmem:[#allocation37_spill] sm:$0xff] %v9423_v9  ;;  %v897_v12 = vadd.f32 %v896_v47, %v9243_v46  ;;  %v898_v31 = vpop.f32.mrb[98].mxu0  ;;  %v1088_v14 = vadd.f32 %v1087_v25, %v9259_v58  ;;  %v1089_v40 = vpop.f32.mrb[97].mxu1 }
 0x1ed   :  { %10245 = vst [vmem:[#allocation38_spill] sm:$0xff] %v9426_v55  ;;  %v899_v53 = vadd.f32 %v898_v31, %v9241_v2  ;;  %v900_v17 = vpop.f32.mrb[99].mxu0  ;;  %3505 = vmatpush1.bf16.msra.mxu0 %v8014_v10  ;;  %v1090_v52 = vadd.f32 %v1089_v40, %v9261_v63  ;;  %v1091_v54 = vpop.f32.mrb[98].mxu1  ;;  %v1298_v47 = vmax.f32 %v895_v43, 0.0  ;;  %v8058_v10 = vld [vmem:[#allocation2 + $0x4ec] ss:$16 sps:$4 sm:$0xff]  }
 0x1ee   :  { %v901_v32 = vadd.f32 %v900_v17, %v9243_v46  ;;  %3506 = vmatprep.subr.bf16.mxu0 %v8019_v37  ;;  %4277 = vmatpush1.bf16.msra.mxu1 %v8047_v48  ;;  %v1300_v13 = vmax.f32 %v1088_v14, 0.0  ;;  %v1092_v61 = vadd.f32 %v1091_v54, %v9259_v58  ;;  %v1093_v5 = vpop.f32.mrb[99].mxu1  ;;  %v1299_v9 = vmax.f32 %v897_v12, 0.0  ;;  %v8020_v43 = vld [vmem:[#allocation2 + $0x4e0] ss:$16 sps:$4 sm:$0xff]  }
 0x1ef   :  { %v1306_v25 = vmax.f32 %v899_v53, 0.0  ;;  %3364 = vmatmul.mubr.bf16.gmra.mrb[140].mxu0 %v9006_v21  ;;  %4278 = vmatprep.subr.bf16.mxu1 %v8055_v39  ;;  %v1301_v31 = vmax.f32 %v1090_v52, 0.0  ;;  %v1094_v40 = vadd.f32 %v1093_v5, %v9261_v63  ;;  %v8025_v17 = vld [vmem:[#allocation2 + $0x504] ss:$16 sps:$4 sm:$0xff]   ;;  %v8056_v12 = vld [vmem:[#allocation2 + $0x4e8] ss:$16 sps:$4 sm:$0xff]  }
 0x1f0   :  { %v1307_v55 = vmax.f32 %v901_v32, 0.0  ;;  %4136 = vmatmul.mubr.bf16.gmra.mrb[140].mxu1 %v9006_v21  ;;  %3373 = vmatprep.mubr.bf16.mxu0 %v9031_v11  ;;  %v1308_v37 = vmax.f32 %v1092_v61, 0.0  ;;  %v8064_v32 = vld [vmem:[#allocation2 + $0x50c] ss:$16 sps:$4 sm:$0xff]  }
 0x1f1   :  { %v9438_v48 = vpack.c.bf16 %v1306_v25, %v1298_v47  ;;  %4145 = vmatprep.mubr.bf16.mxu1 %v9031_v11  ;;  %3507 = vmatpush1.bf16.msra.mxu0 %v8017_v56  ;;  %v1309_v14 = vmax.f32 %v1094_v40, 0.0  ;;  %v8062_v40 = vld [vmem:[#allocation2 + $0x508] ss:$16 sps:$4 sm:$0xff]  }
 0x1f2   :  { %v9441_v53 = vpack.c.bf16 %v1307_v55, %v1299_v9  ;;  %v904_v39 = vpop.f32.mrb[100].mxu0  ;;  %3508 = vmatprep.subr.bf16.mxu0 %v8022_v38  ;;  %4279 = vmatpush1.bf16.msra.mxu1 %v8053_v36  ;;  %v9443_v52 = vpack.c.bf16 %v1308_v37, %v1300_v13  ;;  %v8023_v13 = vld [vmem:[#allocation2 + $0x500] ss:$16 sps:$4 sm:$0xff]  }
 0x1f3   :  { %v905_v21 = vadd.f32 %v904_v39, %v9241_v2  ;;  %v906_v54 = vpop.f32.mrb[101].mxu0  ;;  %4280 = vmatprep.subr.bf16.mxu1 %v8058_v10  ;;  %v9446_v61 = vpack.c.bf16 %v1309_v14, %v1301_v31  ;;  %v1097_v11 = vpop.f32.mrb[100].mxu1  ;;  %v8034_v31 = vld [vmem:[#allocation2 + $0x524] ss:$16 sps:$4 sm:$0xff]  }
 0x1f4   :  { %10246 = vst [vmem:[#allocation39_spill] sm:$0xff] %v9443_v52  ;;  %v907_v56 = vadd.f32 %v906_v54, %v9243_v46  ;;  %v908_v5 = vpop.f32.mrb[102].mxu0  ;;  %v1098_v9 = vadd.f32 %v1097_v11, %v9259_v58  ;;  %v1099_v55 = vpop.f32.mrb[101].mxu1 }
 0x1f5   :  { %10247 = vst [vmem:[#allocation40_spill] sm:$0xff] %v9446_v61  ;;  %v909_v38 = vadd.f32 %v908_v5, %v9241_v2  ;;  %v910_v36 = vpop.f32.mrb[103].mxu0  ;;  %3509 = vmatpush1.bf16.msra.mxu0 %v8020_v43  ;;  %v1100_v47 = vadd.f32 %v1099_v55, %v9261_v63  ;;  %v1101_v25 = vpop.f32.mrb[102].mxu1  ;;  %v1314_v54 = vmax.f32 %v905_v21, 0.0  ;;  %v8067_v43 = vld [vmem:[#allocation2 + $0x52c] ss:$16 sps:$4 sm:$0xff]  }
 0x1f6   :  { %v911_v10 = vadd.f32 %v910_v36, %v9243_v46  ;;  %3510 = vmatprep.subr.bf16.mxu0 %v8025_v17  ;;  %4281 = vmatpush1.bf16.msra.mxu1 %v8056_v12  ;;  %v1316_v37 = vmax.f32 %v1098_v9, 0.0  ;;  %v1102_v14 = vadd.f32 %v1101_v25, %v9259_v58  ;;  %v1103_v39 = vpop.f32.mrb[103].mxu1  ;;  %v1315_v52 = vmax.f32 %v907_v56, 0.0  ;;  %v8032_v21 = vld [vmem:[#allocation2 + $0x520] ss:$16 sps:$4 sm:$0xff]  }
 0x1f7   :  { %v1322_v11 = vmax.f32 %v909_v38, 0.0  ;;  %3374 = vmatmul.mubr.bf16.gmra.mrb[144].mxu0 %v9028_v62  ;;  %4282 = vmatprep.subr.bf16.mxu1 %v8064_v32  ;;  %v1317_v5 = vmax.f32 %v1100_v47, 0.0  ;;  %v1104_v55 = vadd.f32 %v1103_v39, %v9261_v63  ;;  %v8043_v36 = vld [vmem:[#allocation2 + $0x544] ss:$16 sps:$4 sm:$0xff]   ;;  %v8065_v56 = vld [vmem:[#allocation2 + $0x528] ss:$16 sps:$4 sm:$0xff]  }
 0x1f8   :  { %v1323_v61 = vmax.f32 %v911_v10, 0.0  ;;  %4146 = vmatmul.mubr.bf16.gmra.mrb[144].mxu1 %v9028_v62  ;;  %3383 = vmatprep.mubr.bf16.mxu0 %v9051_v7  ;;  %v1324_v17 = vmax.f32 %v1102_v14, 0.0  ;;  %v8073_v10 = vld [vmem:[#allocation2 + $0x54c] ss:$16 sps:$4 sm:$0xff]  }
 0x1f9   :  { %v9458_v12 = vpack.c.bf16 %v1322_v11, %v1314_v54  ;;  %4155 = vmatprep.mubr.bf16.mxu1 %v9051_v7  ;;  %3511 = vmatpush1.bf16.msra.mxu0 %v8023_v13  ;;  %v1325_v9 = vmax.f32 %v1104_v55, 0.0  ;;  %v8071_v55 = vld [vmem:[#allocation2 + $0x548] ss:$16 sps:$4 sm:$0xff]  }
 0x1fa   :  { %v9461_v38 = vpack.c.bf16 %v1323_v61, %v1315_v52  ;;  %v914_v32 = vpop.f32.mrb[104].mxu0  ;;  %3512 = vmatprep.subr.bf16.mxu0 %v8034_v31  ;;  %4283 = vmatpush1.bf16.msra.mxu1 %v8062_v40  ;;  %v9463_v47 = vpack.c.bf16 %v1324_v17, %v1316_v37  ;;  %v8041_v37 = vld [vmem:[#allocation2 + $0x540] ss:$16 sps:$4 sm:$0xff]  }
 0x1fb   :  { %v915_v62 = vadd.f32 %v914_v32, %v9241_v2  ;;  %v916_v25 = vpop.f32.mrb[105].mxu0  ;;  %4284 = vmatprep.subr.bf16.mxu1 %v8067_v43  ;;  %v9466_v14 = vpack.c.bf16 %v1325_v9, %v1317_v5  ;;  %v1107_v7 = vpop.f32.mrb[104].mxu1  ;;  %v8052_v5 = vld [vmem:[#allocation2 + $0x564] ss:$16 sps:$4 sm:$0xff]  }
 0x1fc   :  { %10248 = vst [vmem:[#allocation41_spill] sm:$0xff] %v9463_v47  ;;  %v917_v13 = vadd.f32 %v916_v25, %v9243_v46  ;;  %v918_v39 = vpop.f32.mrb[106].mxu0  ;;  %v1108_v52 = vadd.f32 %v1107_v7, %v9259_v58  ;;  %v1109_v61 = vpop.f32.mrb[105].mxu1 }
 0x1fd   :  { %10249 = vst [vmem:[#allocation42_spill] sm:$0xff] %v9466_v14  ;;  %v919_v31 = vadd.f32 %v918_v39, %v9241_v2  ;;  %v920_v40 = vpop.f32.mrb[107].mxu0  ;;  %3513 = vmatpush1.bf16.msra.mxu0 %v8032_v21  ;;  %v1110_v54 = vadd.f32 %v1109_v61, %v9261_v63  ;;  %v1111_v11 = vpop.f32.mrb[106].mxu1  ;;  %v1330_v25 = vmax.f32 %v915_v62, 0.0  ;;  %v8076_v21 = vld [vmem:[#allocation2 + $0x56c] ss:$16 sps:$4 sm:$0xff]  }
 0x1fe   :  { %v921_v43 = vadd.f32 %v920_v40, %v9243_v46  ;;  %3514 = vmatprep.subr.bf16.mxu0 %v8043_v36  ;;  %4285 = vmatpush1.bf16.msra.mxu1 %v8065_v56  ;;  %v1332_v17 = vmax.f32 %v1108_v52, 0.0  ;;  %v1112_v9 = vadd.f32 %v1111_v11, %v9259_v58  ;;  %v1113_v32 = vpop.f32.mrb[107].mxu1  ;;  %v1331_v47 = vmax.f32 %v917_v13, 0.0  ;;  %v8050_v62 = vld [vmem:[#allocation2 + $0x560] ss:$16 sps:$4 sm:$0xff]  }
 0x1ff   :  { %v1338_v7 = vmax.f32 %v919_v31, 0.0  ;;  %3384 = vmatmul.mubr.bf16.gmra.mrb[148].mxu0 %v9048_v57  ;;  %4286 = vmatprep.subr.bf16.mxu1 %v8073_v10  ;;  %v1333_v39 = vmax.f32 %v1110_v54, 0.0  ;;  %v1114_v61 = vadd.f32 %v1113_v32, %v9261_v63  ;;  %v8061_v40 = vld [vmem:[#allocation2 + $0x584] ss:$16 sps:$4 sm:$0xff]   ;;  %v8074_v13 = vld [vmem:[#allocation2 + $0x568] ss:$16 sps:$4 sm:$0xff]  }
 0x200   :  { %v1339_v14 = vmax.f32 %v921_v43, 0.0  ;;  %4156 = vmatmul.mubr.bf16.gmra.mrb[148].mxu1 %v9048_v57  ;;  %3393 = vmatprep.mubr.bf16.mxu0 %v9071_v8  ;;  %v1340_v36 = vmax.f32 %v1112_v9, 0.0  ;;  %v8082_v43 = vld [vmem:[#allocation2 + $0x58c] ss:$16 sps:$4 sm:$0xff]  }
 0x201   :  { %v9478_v56 = vpack.c.bf16 %v1338_v7, %v1330_v25  ;;  %4165 = vmatprep.mubr.bf16.mxu1 %v9071_v8  ;;  %3515 = vmatpush1.bf16.msra.mxu0 %v8041_v37  ;;  %v1341_v52 = vmax.f32 %v1114_v61, 0.0  ;;  %v8080_v61 = vld [vmem:[#allocation2 + $0x588] ss:$16 sps:$4 sm:$0xff]  }
 0x202   :  { %v9481_v31 = vpack.c.bf16 %v1339_v14, %v1331_v47  ;;  %v924_v10 = vpop.f32.mrb[108].mxu0  ;;  %3516 = vmatprep.subr.bf16.mxu0 %v8052_v5  ;;  %4287 = vmatpush1.bf16.msra.mxu1 %v8071_v55  ;;  %v9483_v54 = vpack.c.bf16 %v1340_v36, %v1332_v17  ;;  %v8059_v17 = vld [vmem:[#allocation2 + $0x580] ss:$16 sps:$4 sm:$0xff]  }
 0x203   :  { %v925_v57 = vadd.f32 %v924_v10, %v9241_v2  ;;  %v926_v11 = vpop.f32.mrb[109].mxu0  ;;  %4288 = vmatprep.subr.bf16.mxu1 %v8076_v21  ;;  %v9486_v9 = vpack.c.bf16 %v1341_v52, %v1333_v39  ;;  %v1117_v8 = vpop.f32.mrb[108].mxu1  ;;  %v8070_v39 = vld [vmem:[#allocation2 + $0x5a4] ss:$16 sps:$4 sm:$0xff]  }
 0x204   :  { %10250 = vst [vmem:[#allocation43_spill] sm:$0xff] %v9483_v54  ;;  %v927_v37 = vadd.f32 %v926_v11, %v9243_v46  ;;  %v928_v32 = vpop.f32.mrb[110].mxu0  ;;  %v1118_v47 = vadd.f32 %v1117_v8, %v9259_v58  ;;  %v1119_v14 = vpop.f32.mrb[109].mxu1 }
 0x205   :  { %10251 = vst [vmem:[#allocation44_spill] sm:$0xff] %v9486_v9  ;;  %v929_v5 = vadd.f32 %v928_v32, %v9241_v2  ;;  %v930_v55 = vpop.f32.mrb[111].mxu0  ;;  %3517 = vmatpush1.bf16.msra.mxu0 %v8050_v62  ;;  %v1120_v25 = vadd.f32 %v1119_v14, %v9261_v63  ;;  %v1121_v7 = vpop.f32.mrb[110].mxu1  ;;  %v1346_v11 = vmax.f32 %v925_v57, 0.0  ;;  %v8085_v62 = vld [vmem:[#allocation2 + $0x5ac] ss:$16 sps:$4 sm:$0xff]  }
 0x206   :  { %v931_v21 = vadd.f32 %v930_v55, %v9243_v46  ;;  %3518 = vmatprep.subr.bf16.mxu0 %v8061_v40  ;;  %4289 = vmatpush1.bf16.msra.mxu1 %v8074_v13  ;;  %v1348_v36 = vmax.f32 %v1118_v47, 0.0  ;;  %v1122_v52 = vadd.f32 %v1121_v7, %v9259_v58  ;;  %v1123_v10 = vpop.f32.mrb[111].mxu1  ;;  %v1347_v54 = vmax.f32 %v927_v37, 0.0  ;;  %v8068_v57 = vld [vmem:[#allocation2 + $0x5a0] ss:$16 sps:$4 sm:$0xff]  }
 0x207   :  { %v1354_v8 = vmax.f32 %v929_v5, 0.0  ;;  %3394 = vmatmul.mubr.bf16.gmra.mrb[152].mxu0 %v9068_v28  ;;  %4290 = vmatprep.subr.bf16.mxu1 %v8082_v43  ;;  %v1349_v32 = vmax.f32 %v1120_v25, 0.0  ;;  %v1124_v14 = vadd.f32 %v1123_v10, %v9261_v63  ;;  %v8079_v55 = vld [vmem:[#allocation2 + $0x5c4] ss:$16 sps:$4 sm:$0xff]   ;;  %v8083_v37 = vld [vmem:[#allocation2 + $0x5a8] ss:$16 sps:$4 sm:$0xff]  }
 0x208   :  { %v1355_v9 = vmax.f32 %v931_v21, 0.0  ;;  %4166 = vmatmul.mubr.bf16.gmra.mrb[152].mxu1 %v9068_v28  ;;  %3403 = vmatprep.mubr.bf16.mxu0 %v9091_v50  ;;  %v1356_v40 = vmax.f32 %v1122_v52, 0.0  ;;  %v8091_v21 = vld [vmem:[#allocation2 + $0x5cc] ss:$16 sps:$4 sm:$0xff]  }
 0x209   :  { %v9498_v13 = vpack.c.bf16 %v1354_v8, %v1346_v11  ;;  %4175 = vmatprep.mubr.bf16.mxu1 %v9091_v50  ;;  %3519 = vmatpush1.bf16.msra.mxu0 %v8059_v17  ;;  %v1357_v47 = vmax.f32 %v1124_v14, 0.0  ;;  %v8089_v14 = vld [vmem:[#allocation2 + $0x5c8] ss:$16 sps:$4 sm:$0xff]  }
 0x20a   :  { %v9501_v5 = vpack.c.bf16 %v1355_v9, %v1347_v54  ;;  %v934_v43 = vpop.f32.mrb[112].mxu0  ;;  %3520 = vmatprep.subr.bf16.mxu0 %v8070_v39  ;;  %4291 = vmatpush1.bf16.msra.mxu1 %v8080_v61  ;;  %v9503_v25 = vpack.c.bf16 %v1356_v40, %v1348_v36  ;;  %v8077_v36 = vld [vmem:[#allocation2 + $0x5c0] ss:$16 sps:$4 sm:$0xff]  }
 0x20b   :  { %v935_v28 = vadd.f32 %v934_v43, %v9241_v2  ;;  %v936_v7 = vpop.f32.mrb[113].mxu0  ;;  %4292 = vmatprep.subr.bf16.mxu1 %v8085_v62  ;;  %v9506_v52 = vpack.c.bf16 %v1357_v47, %v1349_v32  ;;  %v1127_v50 = vpop.f32.mrb[112].mxu1  ;;  %v8088_v32 = vld [vmem:[#allocation2 + $0x5e4] ss:$16 sps:$4 sm:$0xff]  }
 0x20c   :  { %10252 = vst [vmem:[#allocation45_spill] sm:$0xff] %v9503_v25  ;;  %v937_v17 = vadd.f32 %v936_v7, %v9243_v46  ;;  %v938_v10 = vpop.f32.mrb[114].mxu0  ;;  %v1128_v54 = vadd.f32 %v1127_v50, %v9259_v58  ;;  %v1129_v9 = vpop.f32.mrb[113].mxu1 }
 0x20d   :  { %10253 = vst [vmem:[#allocation46_spill] sm:$0xff] %v9506_v52  ;;  %v939_v39 = vadd.f32 %v938_v10, %v9241_v2  ;;  %v940_v61 = vpop.f32.mrb[115].mxu0  ;;  %3521 = vmatpush1.bf16.msra.mxu0 %v8068_v57  ;;  %v1130_v11 = vadd.f32 %v1129_v9, %v9261_v63  ;;  %v1131_v8 = vpop.f32.mrb[114].mxu1  ;;  %v1362_v7 = vmax.f32 %v935_v28, 0.0  ;;  %v8094_v57 = vld [vmem:[#allocation2 + $0x5ec] ss:$16 sps:$4 sm:$0xff]  }
 0x20e   :  { %v941_v62 = vadd.f32 %v940_v61, %v9243_v46  ;;  %3522 = vmatprep.subr.bf16.mxu0 %v8079_v55  ;;  %4293 = vmatpush1.bf16.msra.mxu1 %v8083_v37  ;;  %v1364_v40 = vmax.f32 %v1128_v54, 0.0  ;;  %v1132_v47 = vadd.f32 %v1131_v8, %v9259_v58  ;;  %v1133_v43 = vpop.f32.mrb[115].mxu1  ;;  %v1363_v25 = vmax.f32 %v937_v17, 0.0  ;;  %v8086_v28 = vld [vmem:[#allocation2 + $0x5e0] ss:$16 sps:$4 sm:$0xff]  }
 0x20f   :  { %v1370_v50 = vmax.f32 %v939_v39, 0.0  ;;  %3404 = vmatmul.mubr.bf16.gmra.mrb[156].mxu0 %v9088_v41  ;;  %4294 = vmatprep.subr.bf16.mxu1 %v8091_v21  ;;  %v1365_v10 = vmax.f32 %v1130_v11, 0.0  ;;  %v1134_v9 = vadd.f32 %v1133_v43, %v9261_v63  ;;  %v8092_v61 = vld [vmem:[#allocation2 + $0x5e8] ss:$16 sps:$4 sm:$0xff]   ;;  %v8097_v17 = vld [vmem:[#allocation2 + $0x604] ss:$16 sps:$4 sm:$0xff]  }
 0x210   :  { %v1371_v52 = vmax.f32 %v941_v62, 0.0  ;;  %4176 = vmatmul.mubr.bf16.gmra.mrb[156].mxu1 %v9088_v41  ;;  %3413 = vmatprep.mubr.bf16.mxu0 %v9111_v30  ;;  %v1372_v55 = vmax.f32 %v1132_v47, 0.0 }
 0x211   :  { %v9518_v37 = vpack.c.bf16 %v1370_v50, %v1362_v7  ;;  %4185 = vmatprep.mubr.bf16.mxu1 %v9111_v30  ;;  %3523 = vmatpush1.bf16.msra.mxu0 %v8077_v36  ;;  %v1373_v54 = vmax.f32 %v1134_v9, 0.0  ;;  %v8124_v9 = vld [vmem:[#allocation2 + $0x60c] ss:$16 sps:$4 sm:$0xff]  }
 0x212   :  { %v9521_v39 = vpack.c.bf16 %v1371_v52, %v1363_v25  ;;  %v944_v21 = vpop.f32.mrb[116].mxu0  ;;  %3524 = vmatprep.subr.bf16.mxu0 %v8088_v32  ;;  %4295 = vmatpush1.bf16.msra.mxu1 %v8089_v14  ;;  %v9523_v11 = vpack.c.bf16 %v1372_v55, %v1364_v40 }
 0x213   :  { %v945_v41 = vadd.f32 %v944_v21, %v9241_v2  ;;  %v946_v8 = vpop.f32.mrb[117].mxu0  ;;  %4296 = vmatprep.subr.bf16.mxu1 %v8094_v57  ;;  %v9526_v62 = vpack.c.bf16 %v1373_v54, %v1365_v10  ;;  %v1137_v47 = vpop.f32.mrb[116].mxu1 }
 0x214   :  { %v947_v30 = vadd.f32 %v946_v8, %v9243_v46  ;;  %v948_v36 = vpop.f32.mrb[118].mxu0  ;;  %v1138_v25 = vadd.f32 %v1137_v47, %v9259_v58  ;;  %v1139_v52 = vpop.f32.mrb[117].mxu1 }
 0x215   :  { %v949_v32 = vadd.f32 %v948_v36, %v9241_v2  ;;  %v950_v14 = vpop.f32.mrb[119].mxu0  ;;  %3525 = vmatpush1.bf16.msra.mxu0 %v8086_v28  ;;  %v1140_v40 = vadd.f32 %v1139_v52, %v9261_v63  ;;  %v1141_v43 = vpop.f32.mrb[118].mxu1  ;;  %v1378_v55 = vmax.f32 %v945_v41, 0.0 }
 0x216   :  { %v951_v7 = vadd.f32 %v950_v14, %v9243_v46  ;;  %4297 = vmatpush1.bf16.msra.mxu1 %v8092_v61  ;;  %3687 = vmatprep.subr.bf16.mxu0 %v8097_v17  ;;  %v1380_v50 = vmax.f32 %v1138_v25, 0.0  ;;  %v1142_v57 = vadd.f32 %v1141_v43, %v9259_v58  ;;  %v1143_v10 = vpop.f32.mrb[119].mxu1  ;;  %v1379_v28 = vmax.f32 %v947_v30, 0.0 }
 0x217   :  { %v1386_v54 = vmax.f32 %v949_v32, 0.0  ;;  %3414 = vmatmul.mubr.bf16.gmra.mrb[160].mxu0 %v9108_v19  ;;  %v1381_v21 = vmax.f32 %v1140_v40, 0.0  ;;  %v1144_v8 = vadd.f32 %v1143_v10, %v9261_v63  ;;  %4459 = vmatprep.subr.bf16.mxu1 %v8124_v9 }
 0x218   :  { %v1387_v47 = vmax.f32 %v951_v7, 0.0  ;;  %4186 = vmatmul.mubr.bf16.gmra.mrb[160].mxu1 %v9108_v19  ;;  %3423 = vmatprep.mubr.bf16.mxu0 %v9131_v24  ;;  %v1388_v61 = vmax.f32 %v1142_v57, 0.0 }
 0x219   :  { %v9538_v17 = vpack.c.bf16 %v1386_v54, %v1378_v55  ;;  %4195 = vmatprep.mubr.bf16.mxu1 %v9131_v24  ;;  %v1389_v36 = vmax.f32 %v1144_v8, 0.0 }
 0x21a   :  { %v9541_v41 = vpack.c.bf16 %v1387_v47, %v1379_v28  ;;  %v954_v25 = vpop.f32.mrb[120].mxu0  ;;  %v9543_v52 = vpack.c.bf16 %v1388_v61, %v1380_v50 }
 0x21b   :  { %v955_v32 = vadd.f32 %v954_v25, %v9241_v2  ;;  %v956_v30 = vpop.f32.mrb[121].mxu0  ;;  %v9546_v14 = vpack.c.bf16 %v1389_v36, %v1381_v21  ;;  %v1147_v19 = vpop.f32.mrb[120].mxu1 }
 0x21c   :  { %v957_v40 = vadd.f32 %v956_v30, %v9243_v46  ;;  %v958_v43 = vpop.f32.mrb[122].mxu0  ;;  %v1148_v7 = vadd.f32 %v1147_v19, %v9259_v58  ;;  %v1149_v57 = vpop.f32.mrb[121].mxu1 }
 0x21d   :  { %v959_v24 = vadd.f32 %v958_v43, %v9241_v2  ;;  %v960_v10 = vpop.f32.mrb[123].mxu0  ;;  %v1150_v9 = vadd.f32 %v1149_v57, %v9261_v63  ;;  %v1151_v55 = vpop.f32.mrb[122].mxu1  ;;  %v1394_v28 = vmax.f32 %v955_v32, 0.0 }
 0x21e   :  { %v961_v50 = vadd.f32 %v960_v10, %v9243_v46  ;;  %v1396_v54 = vmax.f32 %v1148_v7, 0.0  ;;  %v1152_v8 = vadd.f32 %v1151_v55, %v9259_v58  ;;  %v1153_v21 = vpop.f32.mrb[123].mxu1  ;;  %v1395_v25 = vmax.f32 %v957_v40, 0.0 }
 0x21f   :  { %v1402_v47 = vmax.f32 %v959_v24, 0.0  ;;  %3424 = vmatmul.mubr.bf16.gmra.mrb[164].mxu0 %v9128_v16  ;;  %v1397_v61 = vmax.f32 %v1150_v9, 0.0  ;;  %v1154_v36 = vadd.f32 %v1153_v21, %v9261_v63 }
 0x220   :  { %v1403_v30 = vmax.f32 %v961_v50, 0.0  ;;  %4196 = vmatmul.mubr.bf16.gmra.mrb[164].mxu1 %v9128_v16  ;;  %3433 = vmatprep.mubr.bf16.mxu0 %v9151_v34  ;;  %v1404_v19 = vmax.f32 %v1152_v8, 0.0 }
 0x221   :  { %v9558_v43 = vpack.c.bf16 %v1402_v47, %v1394_v28  ;;  %4205 = vmatprep.mubr.bf16.mxu1 %v9151_v34  ;;  %v1405_v7 = vmax.f32 %v1154_v36, 0.0 }
 0x222   :  { %v9561_v57 = vpack.c.bf16 %v1403_v30, %v1395_v25  ;;  %v964_v32 = vpop.f32.mrb[124].mxu0  ;;  %v9563_v24 = vpack.c.bf16 %v1404_v19, %v1396_v54 }
 0x223   :  { %v965_v10 = vadd.f32 %v964_v32, %v9241_v2  ;;  %v966_v9 = vpop.f32.mrb[125].mxu0  ;;  %v9566_v40 = vpack.c.bf16 %v1405_v7, %v1397_v61  ;;  %v1157_v55 = vpop.f32.mrb[124].mxu1 }
 0x224   :  { %10254 = vst [vmem:[#allocation47_spill] sm:$0xff] %v9563_v24  ;;  %v967_v16 = vadd.f32 %v966_v9, %v9243_v46  ;;  %v968_v50 = vpop.f32.mrb[126].mxu0  ;;  %v1158_v8 = vadd.f32 %v1157_v55, %v9259_v58  ;;  %v1159_v21 = vpop.f32.mrb[125].mxu1 }
 0x225   :  { %v969_v34 = vadd.f32 %v968_v50, %v9241_v2  ;;  %v970_v28 = vpop.f32.mrb[127].mxu0  ;;  %v1160_v47 = vadd.f32 %v1159_v21, %v9261_v63  ;;  %v1161_v36 = vpop.f32.mrb[126].mxu1  ;;  %v1410_v19 = vmax.f32 %v965_v10, 0.0  ;;  %v8142_v21 = vld [vmem:[#allocation2 + $0x68c] ss:$16 sps:$4 sm:$0xff]  }
 0x226   :  { %v971_v54 = vadd.f32 %v970_v28, %v9243_v46  ;;  %v1412_v25 = vmax.f32 %v1158_v8, 0.0  ;;  %v1162_v30 = vadd.f32 %v1161_v36, %v9259_v58  ;;  %v1163_v61 = vpop.f32.mrb[127].mxu1  ;;  %v1411_v55 = vmax.f32 %v967_v16, 0.0  ;;  %v8134_v16 = vld [vmem:[#allocation2 + $0x668] ss:$16 sps:$4 sm:$0xff]  }
 0x227   :  { %v1418_v7 = vmax.f32 %v969_v34, 0.0  ;;  %3434 = vmatmul.mubr.bf16.gmra.mrb[168].mxu0 %v9148_v27  ;;  %v1413_v32 = vmax.f32 %v1160_v47, 0.0  ;;  %v1164_v9 = vadd.f32 %v1163_v61, %v9261_v63  ;;  %v8133_v63 = vld [vmem:[#allocation2 + $0x64c] ss:$16 sps:$4 sm:$0xff]   ;;  %v8107_v34 = vld [vmem:[#allocation2 + $0x680] ss:$16 sps:$4 sm:$0xff]  }
 0x228   :  { %v1419_v24 = vmax.f32 %v971_v54, 0.0  ;;  %4206 = vmatmul.mubr.bf16.gmra.mrb[168].mxu1 %v9148_v27  ;;  %3443 = vmatprep.mubr.bf16.mxu0 %v9171_v15  ;;  %v1420_v2 = vmax.f32 %v1162_v30, 0.0  ;;  %v10255_v27 = vld [vmem:[#allocation18_spill] sm:$0xff]  ;;  %v8112_v28 = vld [vmem:[#allocation2 + $0x6a4] ss:$16 sps:$4 sm:$0xff]  }
 0x229   :  { %v9578_v50 = vpack.c.bf16 %v1418_v7, %v1410_v19  ;;  %4215 = vmatprep.mubr.bf16.mxu1 %v9171_v15  ;;  %v1421_v46 = vmax.f32 %v1164_v9, 0.0  ;;  %v8100_v15 = vld [vmem:[#allocation2 + $0x624] ss:$16 sps:$4 sm:$0xff]   ;;  %v8140_v47 = vld [vmem:[#allocation2 + $0x688] ss:$16 sps:$4 sm:$0xff]  }
 0x22a   :  { %v9581_v58 = vpack.c.bf16 %v1419_v24, %v1411_v55  ;;  %v9583_v10 = vpack.c.bf16 %v1420_v2, %v1412_v25  ;;  %v8109_v24 = vld [vmem:[#allocation2 + $0x684] ss:$16 sps:$4 sm:$0xff]   ;;  %v8143_v54 = vld [vmem:[#allocation2 + $0x6a8] ss:$16 sps:$4 sm:$0xff]   ;;  %v8151_v25 = vld [vmem:[#allocation2 + $0x6cc] ss:$16 sps:$4 sm:$0xff]  }
 0x22b   :  { %v9585_v8 = vpack.c.bf16 %v1421_v46, %v1413_v32  ;;  %v8115_v36 = vld [vmem:[#allocation2 + $0x6c4] ss:$16 sps:$4 sm:$0xff]   ;;  %v8113_v30 = vld [vmem:[#allocation2 + $0x6c0] ss:$16 sps:$4 sm:$0xff]   ;;  %v8149_v19 = vld [vmem:[#allocation2 + $0x6c8] ss:$16 sps:$4 sm:$0xff]  }
 0x22c   :  { %v8118_v61 = vld [vmem:[#allocation2 + $0x6e4] ss:$16 sps:$4 sm:$0xff]   ;;  %v8116_v7 = vld [vmem:[#allocation2 + $0x6e0] ss:$16 sps:$4 sm:$0xff]   ;;  %v8152_v9 = vld [vmem:[#allocation2 + $0x6e8] ss:$16 sps:$4 sm:$0xff]  }
 0x22d   :  { %v8121_v32 = vld [vmem:[#allocation2 + $0x704] ss:$16 sps:$4 sm:$0xff]   ;;  %v8160_v55 = vld [vmem:[#allocation2 + $0x70c] ss:$16 sps:$4 sm:$0xff]   ;;  %v8119_v2 = vld [vmem:[#allocation2 + $0x700] ss:$16 sps:$4 sm:$0xff]  }
 0x22e   :  { %v8130_v46 = vld [vmem:[#allocation2 + $0x724] ss:$16 sps:$4 sm:$0xff]  }
 0x22f   :  { %3444 = vmatmul.mubr.bf16.gmra.mrb[172].mxu0 %v9168_v4 }
 0x230   :  { %4216 = vmatmul.mubr.bf16.gmra.mrb[172].mxu1 %v9168_v4  ;;  %3453 = vmatprep.mubr.bf16.mxu0 %v9191_v45  ;;  %v8095_v4 = vld [vmem:[#allocation2 + $0x600] ss:$16 sps:$4 sm:$0xff]  }
 0x231   :  { %4225 = vmatprep.mubr.bf16.mxu1 %v9191_v45  ;;  %v8127_v45 = vld [vmem:[#allocation2 + $0x62c] ss:$16 sps:$4 sm:$0xff]  }
 0x237   :  { %3454 = vmatmul.mubr.bf16.gmra.mrb[176].mxu0 %v9188_v33 }
 0x238   :  { %4226 = vmatmul.mubr.bf16.gmra.mrb[176].mxu1 %v9188_v33  ;;  %3463 = vmatprep.mubr.bf16.mxu0 %v9211_v26  ;;  %v8122_v33 = vld [vmem:[#allocation2 + $0x608] ss:$16 sps:$4 sm:$0xff]  }
 0x239   :  { %4235 = vmatprep.mubr.bf16.mxu1 %v9211_v26  ;;  %v8103_v26 = vld [vmem:[#allocation2 + $0x644] ss:$16 sps:$4 sm:$0xff]  }
 0x23f   :  { %3464 = vmatmul.mubr.bf16.gmra.mrb[180].mxu0 %v9208_v3 }
 0x240   :  { %4236 = vmatmul.mubr.bf16.gmra.mrb[180].mxu1 %v9208_v3  ;;  %3473 = vmatprep.mubr.bf16.mxu0 %v9233_v22  ;;  %v8098_v3 = vld [vmem:[#allocation2 + $0x620] ss:$16 sps:$4 sm:$0xff]  }
 0x241   :  { %4245 = vmatprep.mubr.bf16.mxu1 %v9233_v22  ;;  %v8125_v22 = vld [vmem:[#allocation2 + $0x628] ss:$16 sps:$4 sm:$0xff]  }
 0x247   :  { %3474 = vmatmul.mubr.bf16.gmra.mrb[184].mxu0 %v10255_v27 }
 0x248   :  { %4246 = vmatmul.mubr.bf16.gmra.mrb[184].mxu1 %v10255_v27  ;;  %3483 = vmatprep.mubr.bf16.mxu0 %v9266_v59  ;;  %v8158_v27 = vld [vmem:[#allocation2 + $0x708] ss:$16 sps:$4 sm:$0xff]  }
 0x249   :  { %4255 = vmatprep.mubr.bf16.mxu1 %v9266_v59  ;;  %v8106_v59 = vld [vmem:[#allocation2 + $0x664] ss:$16 sps:$4 sm:$0xff]  }
 0x24f   :  { %3484 = vmatmul.mubr.bf16.gmra.mrb[188].mxu0 %v9263_v6 }
 0x250   :  { %4256 = vmatmul.mubr.bf16.gmra.mrb[188].mxu1 %v9263_v6  ;;  %3526 = vmatprep.mubr.bf16.mxu0 %v9281_v1  ;;  %v8101_v6 = vld [vmem:[#allocation2 + $0x640] ss:$16 sps:$4 sm:$0xff]  }
 0x251   :  { %4298 = vmatprep.mubr.bf16.mxu1 %v9281_v1  ;;  %v8131_v1 = vld [vmem:[#allocation2 + $0x648] ss:$16 sps:$4 sm:$0xff]  }
 0x257   :  { %3527 = vmatmul.mubr.bf16.vlgmr.msra.gmra.mrb[128].mxu0 %v9278_v20 }
 0x258   :  { %4299 = vmatmul.mubr.bf16.vlgmr.msra.gmra.mrb[128].mxu1 %v9278_v20  ;;  %3536 = vmatprep.mubr.bf16.mxu0 %v9301_v44  ;;  %v8136_v20 = vld [vmem:[#allocation2 + $0x66c] ss:$16 sps:$4 sm:$0xff]  }
 0x259   :  { %3688 = vmatpush1.bf16.msra.mxu0 %v8095_v4  ;;  %4308 = vmatprep.mubr.bf16.mxu1 %v9301_v44  ;;  %v8104_v44 = vld [vmem:[#allocation2 + $0x660] ss:$16 sps:$4 sm:$0xff]  }
 0x25a   :  { %3689 = vmatprep.subr.bf16.mxu0 %v8100_v15  ;;  %4460 = vmatpush1.bf16.msra.mxu1 %v8122_v33  ;;  %v10257_v4 = vld [vmem:[#allocation27_spill] sm:$0xff]  ;;  %v10258_v15 = vld [vmem:[#allocation32_spill] sm:$0xff] }
 0x25b   :  { %4461 = vmatprep.subr.bf16.mxu1 %v8127_v45  ;;  %v8128_v33 = vld [vmem:[#allocation2 + $0x720] ss:$16 sps:$4 sm:$0xff]   ;;  %v8139_v45 = vld [vmem:[#allocation2 + $0x744] ss:$16 sps:$4 sm:$0xff]  }
 0x25d   :  { %3690 = vmatpush1.bf16.msra.mxu0 %v8098_v3  ;;  %v8161_v3 = vld [vmem:[#allocation2 + $0x728] ss:$16 sps:$4 sm:$0xff]  }
 0x25e   :  { %3691 = vmatprep.subr.bf16.mxu0 %v8103_v26  ;;  %4462 = vmatpush1.bf16.msra.mxu1 %v8125_v22  ;;  %v8169_v26 = vld [vmem:[#allocation2 + $0x74c] ss:$16 sps:$4 sm:$0xff]   ;;  %v8137_v22 = vld [vmem:[#allocation2 + $0x740] ss:$16 sps:$4 sm:$0xff]  }
 0x25f   :  { %3537 = vmatmul.mubr.bf16.gmra.mrb[132].mxu0 %v9298_v42  ;;  %4463 = vmatprep.subr.bf16.mxu1 %v8133_v63  ;;  %v8148_v63 = vld [vmem:[#allocation2 + $0x764] ss:$16 sps:$4 sm:$0xff]  }
 0x260   :  { %4309 = vmatmul.mubr.bf16.gmra.mrb[132].mxu1 %v9298_v42  ;;  %3546 = vmatprep.mubr.bf16.mxu0 %v9321_v60  ;;  %v8145_v42 = vld [vmem:[#allocation2 + $0x6ac] ss:$16 sps:$4 sm:$0xff]  }
 0x261   :  { %4318 = vmatprep.mubr.bf16.mxu1 %v9321_v60  ;;  %3692 = vmatpush1.bf16.msra.mxu0 %v8101_v6  ;;  %v8110_v60 = vld [vmem:[#allocation2 + $0x6a0] ss:$16 sps:$4 sm:$0xff]   ;;  %v8167_v6 = vld [vmem:[#allocation2 + $0x748] ss:$16 sps:$4 sm:$0xff]  }
 0x262   :  { %3693 = vmatprep.subr.bf16.mxu0 %v8106_v59  ;;  %4464 = vmatpush1.bf16.msra.mxu1 %v8131_v1  ;;  %v10259_v59 = vld [vmem:[#allocation31_spill] sm:$0xff]  ;;  %v8172_v1 = vld [vmem:[#allocation2 + $0x76c] ss:$16 sps:$4 sm:$0xff]  }
 0x263   :  { %4465 = vmatprep.subr.bf16.mxu1 %v8136_v20  ;;  %v8146_v20 = vld [vmem:[#allocation2 + $0x760] ss:$16 sps:$4 sm:$0xff]  }
 0x265   :  { %3694 = vmatpush1.bf16.msra.mxu0 %v8104_v44  ;;  %v8157_v44 = vld [vmem:[#allocation2 + $0x784] ss:$16 sps:$4 sm:$0xff]  }
 0x266   :  { %3695 = vmatprep.subr.bf16.mxu0 %v8109_v24  ;;  %4466 = vmatpush1.bf16.msra.mxu1 %v8134_v16  ;;  %v8170_v24 = vld [vmem:[#allocation2 + $0x768] ss:$16 sps:$4 sm:$0xff]   ;;  %v8178_v16 = vld [vmem:[#allocation2 + $0x78c] ss:$16 sps:$4 sm:$0xff]  }
 0x267   :  { %3547 = vmatmul.mubr.bf16.gmra.mrb[136].mxu0 %v9318_v35  ;;  %4467 = vmatprep.subr.bf16.mxu1 %v8142_v21  ;;  %v8155_v21 = vld [vmem:[#allocation2 + $0x780] ss:$16 sps:$4 sm:$0xff]  }
 0x268   :  { %4319 = vmatmul.mubr.bf16.gmra.mrb[136].mxu1 %v9318_v35  ;;  %3556 = vmatprep.mubr.bf16.mxu0 %v9341_v23  ;;  %v8154_v35 = vld [vmem:[#allocation2 + $0x6ec] ss:$16 sps:$4 sm:$0xff]  }
 0x269   :  { %4328 = vmatprep.mubr.bf16.mxu1 %v9341_v23  ;;  %3696 = vmatpush1.bf16.msra.mxu0 %v8107_v34  ;;  %v10256_v23 = vld [vmem:[#allocation28_spill] sm:$0xff]  ;;  %v8166_v34 = vld [vmem:[#allocation2 + $0x7a4] ss:$16 sps:$4 sm:$0xff]  }
 0x26a   :  { %3697 = vmatprep.subr.bf16.mxu0 %v8112_v28  ;;  %4468 = vmatpush1.bf16.msra.mxu1 %v8140_v47  ;;  %v8176_v28 = vld [vmem:[#allocation2 + $0x788] ss:$16 sps:$4 sm:$0xff]   ;;  %v8181_v47 = vld [vmem:[#allocation2 + $0x7ac] ss:$16 sps:$4 sm:$0xff]  }
 0x26b   :  { %4469 = vmatprep.subr.bf16.mxu1 %v8145_v42  ;;  %v8175_v42 = vld [vmem:[#allocation2 + $0x7c4] ss:$16 sps:$4 sm:$0xff]  }
 0x26d   :  { %3698 = vmatpush1.bf16.msra.mxu0 %v8110_v60  ;;  %v8179_v60 = vld [vmem:[#allocation2 + $0x7a8] ss:$16 sps:$4 sm:$0xff]  }
 0x26e   :  { %3699 = vmatprep.subr.bf16.mxu0 %v8115_v36  ;;  %4470 = vmatpush1.bf16.msra.mxu1 %v8143_v54  ;;  %v8187_v36 = vld [vmem:[#allocation2 + $0x7cc] ss:$16 sps:$4 sm:$0xff]   ;;  %v8173_v54 = vld [vmem:[#allocation2 + $0x7c0] ss:$16 sps:$4 sm:$0xff]  }
 0x26f   :  { %3557 = vmatmul.mubr.bf16.gmra.mrb[140].mxu0 %v9338_v29  ;;  %4471 = vmatprep.subr.bf16.mxu1 %v8151_v25  ;;  %v8184_v25 = vld [vmem:[#allocation2 + $0x7e4] ss:$16 sps:$4 sm:$0xff]  }
 0x270   :  { %4329 = vmatmul.mubr.bf16.gmra.mrb[140].mxu1 %v9338_v29  ;;  %3566 = vmatprep.mubr.bf16.mxu0 %v10256_v23  ;;  %v8163_v29 = vld [vmem:[#allocation2 + $0x72c] ss:$16 sps:$4 sm:$0xff]  }
 0x271   :  { %4338 = vmatprep.mubr.bf16.mxu1 %v10256_v23  ;;  %3700 = vmatpush1.bf16.msra.mxu0 %v8113_v30  ;;  %v8185_v30 = vld [vmem:[#allocation2 + $0x7c8] ss:$16 sps:$4 sm:$0xff]   ;;  %v8211_v23 = vld [vmem:[#allocation5 + $0x64] ss:$8 sps:$4 sm:$0xff]  }
 0x272   :  { %3701 = vmatprep.subr.bf16.mxu0 %v8118_v61  ;;  %4472 = vmatpush1.bf16.msra.mxu1 %v8149_v19  ;;  %v8188_v61 = vld [vmem:[#allocation2 + $0x7e8] ss:$16 sps:$4 sm:$0xff]  }
 0x273   :  { %4473 = vmatprep.subr.bf16.mxu1 %v8154_v35  ;;  %v10266_v19 = vld [vmem:[#allocation26_spill] sm:$0xff] }
 0x274   :  { %v8206_v35 = vld [vmem:[#allocation5 + $0x50] ss:$8 sps:$4 sm:$0xff]  }
 0x275   :  { %3702 = vmatpush1.bf16.msra.mxu0 %v8116_v7  ;;  %v8209_v7 = vld [vmem:[#allocation5 + $0x60] ss:$8 sps:$4 sm:$0xff]  }
 0x276   :  { %3703 = vmatprep.subr.bf16.mxu0 %v8121_v32  ;;  %4474 = vmatpush1.bf16.msra.mxu1 %v8152_v9  ;;  %v8214_v32 = vld [vmem:[#allocation5 + $0x74] ss:$8 sps:$4 sm:$0xff]  }
 0x277   :  { %3567 = vmatmul.mubr.bf16.gmra.mrb[144].mxu0 %v10257_v4  ;;  %4475 = vmatprep.subr.bf16.mxu1 %v8160_v55  ;;  %v10267_v9 = vld [vmem:[#allocation25_spill] sm:$0xff]  ;;  %v10268_v55 = vld [vmem:[#allocation30_spill] sm:$0xff] }
 0x278   :  { %4339 = vmatmul.mubr.bf16.gmra.mrb[144].mxu1 %v10257_v4  ;;  %3576 = vmatprep.mubr.bf16.mxu0 %v10258_v15  ;;  %v8220_v4 = vld [vmem:[#allocation5 + $0x94] ss:$8 sps:$4 sm:$0xff]  }
 0x279   :  { %4348 = vmatprep.mubr.bf16.mxu1 %v10258_v15  ;;  %3704 = vmatpush1.bf16.msra.mxu0 %v8119_v2  ;;  %v8212_v2 = vld [vmem:[#allocation5 + $0x70] ss:$8 sps:$4 sm:$0xff]  }
 0x27a   :  { %3705 = vmatprep.subr.bf16.mxu0 %v8130_v46  ;;  %4476 = vmatpush1.bf16.msra.mxu1 %v8158_v27  ;;  %v8217_v46 = vld [vmem:[#allocation5 + $0x84] ss:$8 sps:$4 sm:$0xff]   ;;  %v8215_v27 = vld [vmem:[#allocation5 + $0x80] ss:$8 sps:$4 sm:$0xff]   ;;  %v10270_v15 = vld [vmem:[#allocation34_spill] sm:$0xff] }
 0x27b   :  { %4477 = vmatprep.subr.bf16.mxu1 %v8163_v29  ;;  %v10269_v29 = vld [vmem:[#allocation29_spill] sm:$0xff] }
 0x27d   :  { %3706 = vmatpush1.bf16.msra.mxu0 %v8128_v33  ;;  %v8218_v33 = vld [vmem:[#allocation5 + $0x90] ss:$8 sps:$4 sm:$0xff]  }
 0x27e   :  { %3707 = vmatprep.subr.bf16.mxu0 %v8139_v45  ;;  %4478 = vmatpush1.bf16.msra.mxu1 %v8161_v3  ;;  %v8223_v45 = vld [vmem:[#allocation5 + $0xa4] ss:$8 sps:$4 sm:$0xff]   ;;  %v8221_v3 = vld [vmem:[#allocation5 + $0xa0] ss:$8 sps:$4 sm:$0xff]  }
 0x27f   :  { %3577 = vmatmul.mubr.bf16.gmra.mrb[148].mxu0 %v10259_v59  ;;  %4479 = vmatprep.subr.bf16.mxu1 %v8169_v26  ;;  %v8226_v26 = vld [vmem:[#allocation5 + $0xb4] ss:$8 sps:$4 sm:$0xff]  }
 0x280   :  { %4349 = vmatmul.mubr.bf16.gmra.mrb[148].mxu1 %v10259_v59  ;;  %3586 = vmatprep.mubr.bf16.mxu0 %v9401_v18  ;;  %v8229_v59 = vld [vmem:[#allocation5 + $0xc4] ss:$8 sps:$4 sm:$0xff]  }
 0x281   :  { %4358 = vmatprep.mubr.bf16.mxu1 %v9401_v18  ;;  %3708 = vmatpush1.bf16.msra.mxu0 %v8137_v22  ;;  %v8164_v18 = vld [vmem:[#allocation2 + $0x7a0] ss:$16 sps:$4 sm:$0xff]  }
 0x282   :  { %3709 = vmatprep.subr.bf16.mxu0 %v8148_v63  ;;  %4480 = vmatpush1.bf16.msra.mxu1 %v8167_v6  ;;  %v10271_v22 = vld [vmem:[#allocation33_spill] sm:$0xff]  ;;  %v10272_v63 = vld [vmem:[#allocation36_spill] sm:$0xff] }
 0x283   :  { %4481 = vmatprep.subr.bf16.mxu1 %v8172_v1  ;;  %v8224_v6 = vld [vmem:[#allocation5 + $0xb0] ss:$8 sps:$4 sm:$0xff]   ;;  %v8227_v1 = vld [vmem:[#allocation5 + $0xc0] ss:$8 sps:$4 sm:$0xff]  }
 0x285   :  { %3710 = vmatpush1.bf16.msra.mxu0 %v8146_v20  ;;  %v8232_v20 = vld [vmem:[#allocation5 + $0xd4] ss:$8 sps:$4 sm:$0xff]  }
 0x286   :  { %3711 = vmatprep.subr.bf16.mxu0 %v8157_v44  ;;  %4482 = vmatpush1.bf16.msra.mxu1 %v8170_v24  ;;  %v10273_v44 = vld [vmem:[#allocation35_spill] sm:$0xff]  ;;  %v10274_v24 = vld [vmem:[#allocation38_spill] sm:$0xff] }
 0x287   :  { %3587 = vmatmul.mubr.bf16.gmra.mrb[152].mxu0 %v9398_v0  ;;  %4483 = vmatprep.subr.bf16.mxu1 %v8178_v16  ;;  %v8230_v16 = vld [vmem:[#allocation5 + $0xd0] ss:$8 sps:$4 sm:$0xff]  }
 0x288   :  { %4359 = vmatmul.mubr.bf16.gmra.mrb[152].mxu1 %v9398_v0  ;;  %3596 = vmatprep.mubr.bf16.mxu0 %v9421_v51  ;;  %v8190_v0 = vld [vmem:[#allocation2 + $0x7ec] ss:$16 sps:$4 sm:$0xff]  }
 0x289   :  { %4368 = vmatprep.mubr.bf16.mxu1 %v9421_v51  ;;  %3712 = vmatpush1.bf16.msra.mxu0 %v8155_v21  ;;  %v8182_v51 = vld [vmem:[#allocation2 + $0x7e0] ss:$16 sps:$4 sm:$0xff]   ;;  %v8235_v21 = vld [vmem:[#allocation5 + $0xe4] ss:$8 sps:$4 sm:$0xff]  }
 0x28a   :  { %3713 = vmatprep.subr.bf16.mxu0 %v8166_v34  ;;  %4484 = vmatpush1.bf16.msra.mxu1 %v8176_v28  ;;  %v8233_v34 = vld [vmem:[#allocation5 + $0xe0] ss:$8 sps:$4 sm:$0xff]   ;;  %v10275_v28 = vld [vmem:[#allocation37_spill] sm:$0xff] }
 0x28b   :  { %4485 = vmatprep.subr.bf16.mxu1 %v8181_v47  ;;  %v10276_v47 = vld [vmem:[#allocation40_spill] sm:$0xff] }
 0x28d   :  { %3714 = vmatpush1.bf16.msra.mxu0 %v8164_v18  ;;  %v10277_v18 = vld [vmem:[#allocation39_spill] sm:$0xff] }
 0x28e   :  { %3715 = vmatprep.subr.bf16.mxu0 %v8175_v42  ;;  %4486 = vmatpush1.bf16.msra.mxu1 %v8179_v60  ;;  %v10278_v42 = vld [vmem:[#allocation42_spill] sm:$0xff]  ;;  %v10279_v60 = vld [vmem:[#allocation41_spill] sm:$0xff] }
 0x28f   :  { %3597 = vmatmul.mubr.bf16.gmra.mrb[156].mxu0 %v9418_v49  ;;  %4487 = vmatprep.subr.bf16.mxu1 %v8187_v36  ;;  %v10280_v36 = vld [vmem:[#allocation44_spill] sm:$0xff] }
 0x290   :  { %4369 = vmatmul.mubr.bf16.gmra.mrb[156].mxu1 %v9418_v49  ;;  %3606 = vmatprep.mubr.bf16.mxu0 %v9441_v53  ;;  %v8193_v49 = vld [vmem:[#allocation5 + $0x4] ss:$8 sps:$4 sm:$0xff]  }
 0x291   :  { %4378 = vmatprep.mubr.bf16.mxu1 %v9441_v53  ;;  %3716 = vmatpush1.bf16.msra.mxu0 %v8173_v54  ;;  %v8191_v53 = vld [vmem:[#allocation5] ss:$8 sps:$4 sm:$0xff]  }
 0x292   :  { %3717 = vmatprep.subr.bf16.mxu0 %v8184_v25  ;;  %4488 = vmatpush1.bf16.msra.mxu1 %v8185_v30  ;;  %v10281_v54 = vld [vmem:[#allocation43_spill] sm:$0xff]  ;;  %v10282_v25 = vld [vmem:[#allocation46_spill] sm:$0xff]  ;;  %v10283_v30 = vld [vmem:[#allocation45_spill] sm:$0xff] }
 0x293   :  { %4489 = vmatprep.subr.bf16.mxu1 %v8190_v0  ;;  %v8238_v0 = vld [vmem:[#allocation5 + $0xf4] ss:$8 sps:$4 sm:$0xff]  }
 0x295   :  { %3718 = vmatpush1.bf16.msra.mxu0 %v8182_v51  ;;  %v8236_v51 = vld [vmem:[#allocation5 + $0xf0] ss:$8 sps:$4 sm:$0xff]  }
 0x296   :  { %4490 = vmatpush1.bf16.msra.mxu1 %v8188_v61  ;;  %5240 = vmatprep.subr.bf16.mxu0 %v8193_v49  ;;  %v8241_v61 = vld [vmem:[#allocation5 + $0x104] ss:$8 sps:$4 sm:$0xff]  }
 0x297   :  { %3607 = vmatmul.mubr.bf16.gmra.mrb[160].mxu0 %v9438_v48 }
 0x298   :  { %4379 = vmatmul.mubr.bf16.gmra.mrb[160].mxu1 %v9438_v48  ;;  %3616 = vmatprep.mubr.bf16.mxu0 %v9461_v38  ;;  %v10260_v48 = vld [vmem:[#allocation20_spill] sm:$0xff] }
 0x299   :  { %4388 = vmatprep.mubr.bf16.mxu1 %v9461_v38  ;;  %v10261_v38 = vld [vmem:[#allocation19_spill] sm:$0xff] }
 0x29f   :  { %3617 = vmatmul.mubr.bf16.gmra.mrb[164].mxu0 %v9458_v12 }
 0x2a0   :  { %4389 = vmatmul.mubr.bf16.gmra.mrb[164].mxu1 %v9458_v12  ;;  %3626 = vmatprep.mubr.bf16.mxu0 %v9481_v31  ;;  %v8196_v12 = vld [vmem:[#allocation5 + $0x14] ss:$8 sps:$4 sm:$0xff]  }
 0x2a1   :  { %4398 = vmatprep.mubr.bf16.mxu1 %v9481_v31  ;;  %v8194_v31 = vld [vmem:[#allocation5 + $0x10] ss:$8 sps:$4 sm:$0xff]  }
 0x2a7   :  { %3627 = vmatmul.mubr.bf16.gmra.mrb[168].mxu0 %v9478_v56 }
 0x2a8   :  { %4399 = vmatmul.mubr.bf16.gmra.mrb[168].mxu1 %v9478_v56  ;;  %3636 = vmatprep.mubr.bf16.mxu0 %v9501_v5  ;;  %v10262_v56 = vld [vmem:[#allocation22_spill] sm:$0xff] }
 0x2a9   :  { %4408 = vmatprep.mubr.bf16.mxu1 %v9501_v5  ;;  %v8197_v5 = vld [vmem:[#allocation5 + $0x20] ss:$8 sps:$4 sm:$0xff]  }
 0x2af   :  { %3637 = vmatmul.mubr.bf16.gmra.mrb[172].mxu0 %v9498_v13 }
 0x2b0   :  { %4409 = vmatmul.mubr.bf16.gmra.mrb[172].mxu1 %v9498_v13  ;;  %3646 = vmatprep.mubr.bf16.mxu0 %v9521_v39  ;;  %v8199_v13 = vld [vmem:[#allocation5 + $0x24] ss:$8 sps:$4 sm:$0xff]  }
 0x2b1   :  { %4418 = vmatprep.mubr.bf16.mxu1 %v9521_v39  ;;  %v10263_v39 = vld [vmem:[#allocation21_spill] sm:$0xff] }
 0x2b7   :  { %3647 = vmatmul.mubr.bf16.gmra.mrb[176].mxu0 %v9518_v37 }
 0x2b8   :  { %4419 = vmatmul.mubr.bf16.gmra.mrb[176].mxu1 %v9518_v37  ;;  %3656 = vmatprep.mubr.bf16.mxu0 %v9541_v41  ;;  %v8202_v37 = vld [vmem:[#allocation5 + $0x34] ss:$8 sps:$4 sm:$0xff]  }
 0x2b9   :  { %4428 = vmatprep.mubr.bf16.mxu1 %v9541_v41  ;;  %v8200_v41 = vld [vmem:[#allocation5 + $0x30] ss:$8 sps:$4 sm:$0xff]  }
 0x2bf   :  { %3657 = vmatmul.mubr.bf16.gmra.mrb[180].mxu0 %v9538_v17 }
 0x2c0   :  { %4429 = vmatmul.mubr.bf16.gmra.mrb[180].mxu1 %v9538_v17  ;;  %3666 = vmatprep.mubr.bf16.mxu0 %v9561_v57  ;;  %v10264_v17 = vld [vmem:[#allocation24_spill] sm:$0xff] }
 0x2c1   :  { %4438 = vmatprep.mubr.bf16.mxu1 %v9561_v57  ;;  %v8203_v57 = vld [vmem:[#allocation5 + $0x40] ss:$8 sps:$4 sm:$0xff]  }
 0x2c7   :  { %3667 = vmatmul.mubr.bf16.gmra.mrb[184].mxu0 %v9558_v43 }
 0x2c8   :  { %4439 = vmatmul.mubr.bf16.gmra.mrb[184].mxu1 %v9558_v43  ;;  %3676 = vmatprep.mubr.bf16.mxu0 %v9581_v58  ;;  %v8205_v43 = vld [vmem:[#allocation5 + $0x44] ss:$8 sps:$4 sm:$0xff]  }
 0x2c9   :  { %4448 = vmatprep.mubr.bf16.mxu1 %v9581_v58  ;;  %v10265_v58 = vld [vmem:[#allocation23_spill] sm:$0xff] }
 0x2cf   :  { %3677 = vmatmul.mubr.bf16.gmra.mrb[188].mxu0 %v9578_v50 }
 0x2d0   :  { %4449 = vmatmul.mubr.bf16.gmra.mrb[188].mxu1 %v9578_v50  ;;  %3719 = vmatprep.mubr.bf16.mxu0 %v10260_v48  ;;  %v8208_v50 = vld [vmem:[#allocation5 + $0x54] ss:$8 sps:$4 sm:$0xff]  }
 0x2d1   :  { %4491 = vmatprep.mubr.bf16.mxu1 %v10260_v48 }
 0x2d7   :  { %3720 = vmatmul.mubr.bf16.vlgmr.msra.gmra.mrb[128].mxu0 %v10261_v38 }
 0x2d8   :  { %4492 = vmatmul.mubr.bf16.vlgmr.msra.gmra.mrb[128].mxu1 %v10261_v38  ;;  %3729 = vmatprep.mubr.bf16.mxu0 %v10262_v56 }
 0x2d9   :  { %4501 = vmatprep.mubr.bf16.mxu1 %v10262_v56  ;;  %5241 = vmatpush1.bf16.msra.mxu0 %v8191_v53  ;;  %v10288_v53 = vld [vmem:[#allocation17_spill] sm:$0xff] }
 0x2da   :  { %5242 = vmatprep.subr.bf16.mxu0 %v8196_v12 }
 0x2dd   :  { %5243 = vmatpush1.bf16.msra.mxu0 %v8194_v31 }
 0x2de   :  { %5244 = vmatprep.subr.bf16.mxu0 %v8199_v13 }
 0x2df   :  { %3730 = vmatmul.mubr.bf16.gmra.mrb[132].mxu0 %v10263_v39 }
 0x2e0   :  { %4502 = vmatmul.mubr.bf16.gmra.mrb[132].mxu1 %v10263_v39  ;;  %3739 = vmatprep.mubr.bf16.mxu0 %v10264_v17 }
 0x2e1   :  { %4511 = vmatprep.mubr.bf16.mxu1 %v10264_v17  ;;  %5245 = vmatpush1.bf16.msra.mxu0 %v8197_v5 }
 0x2e2   :  { %5246 = vmatprep.subr.bf16.mxu0 %v8202_v37 }
 0x2e5   :  { %5247 = vmatpush1.bf16.msra.mxu0 %v8200_v41 }
 0x2e6   :  { %5248 = vmatprep.subr.bf16.mxu0 %v8205_v43 }
 0x2e7   :  { %3740 = vmatmul.mubr.bf16.gmra.mrb[136].mxu0 %v10265_v58 }
 0x2e8   :  { %4512 = vmatmul.mubr.bf16.gmra.mrb[136].mxu1 %v10265_v58  ;;  %3749 = vmatprep.mubr.bf16.mxu0 %v10266_v19 }
 0x2e9   :  { %4521 = vmatprep.mubr.bf16.mxu1 %v10266_v19  ;;  %5249 = vmatpush1.bf16.msra.mxu0 %v8203_v57 }
 0x2ea   :  { %5250 = vmatprep.subr.bf16.mxu0 %v8208_v50 }
 0x2ed   :  { %5251 = vmatpush1.bf16.msra.mxu0 %v8206_v35 }
 0x2ee   :  { %5252 = vmatprep.subr.bf16.mxu0 %v8211_v23 }
 0x2ef   :  { %3750 = vmatmul.mubr.bf16.gmra.mrb[140].mxu0 %v10267_v9 }
 0x2f0   :  { %4522 = vmatmul.mubr.bf16.gmra.mrb[140].mxu1 %v10267_v9  ;;  %3759 = vmatprep.mubr.bf16.mxu0 %v10268_v55 }
 0x2f1   :  { %4531 = vmatprep.mubr.bf16.mxu1 %v10268_v55  ;;  %5253 = vmatpush1.bf16.msra.mxu0 %v8209_v7 }
 0x2f2   :  { %5254 = vmatprep.subr.bf16.mxu0 %v8214_v32 }
 0x2f5   :  { %5255 = vmatpush1.bf16.msra.mxu0 %v8212_v2 }
 0x2f6   :  { %5256 = vmatprep.subr.bf16.mxu0 %v8217_v46 }
 0x2f7   :  { %3760 = vmatmul.mubr.bf16.gmra.mrb[144].mxu0 %v10269_v29 }
 0x2f8   :  { %4532 = vmatmul.mubr.bf16.gmra.mrb[144].mxu1 %v10269_v29  ;;  %3769 = vmatprep.mubr.bf16.mxu0 %v10270_v15 }
 0x2f9   :  { %4541 = vmatprep.mubr.bf16.mxu1 %v10270_v15  ;;  %5257 = vmatpush1.bf16.msra.mxu0 %v8215_v27 }
 0x2fa   :  { %5258 = vmatprep.subr.bf16.mxu0 %v8220_v4 }
 0x2fd   :  { %5259 = vmatpush1.bf16.msra.mxu0 %v8218_v33 }
 0x2fe   :  { %5260 = vmatprep.subr.bf16.mxu0 %v8223_v45 }
 0x2ff   :  { %3770 = vmatmul.mubr.bf16.gmra.mrb[148].mxu0 %v10271_v22 }
 0x300   :  { %4542 = vmatmul.mubr.bf16.gmra.mrb[148].mxu1 %v10271_v22  ;;  %3779 = vmatprep.mubr.bf16.mxu0 %v10272_v63 }
 0x301   :  { %4551 = vmatprep.mubr.bf16.mxu1 %v10272_v63  ;;  %5261 = vmatpush1.bf16.msra.mxu0 %v8221_v3  ;;  %v8239_v3 = vld [vmem:[#allocation5 + $0x100] ss:$8 sps:$4 sm:$0xff]  }
 0x302   :  { %5262 = vmatprep.subr.bf16.mxu0 %v8226_v26 }
 0x305   :  { %5263 = vmatpush1.bf16.msra.mxu0 %v8224_v6 }
 0x306   :  { %5264 = vmatprep.subr.bf16.mxu0 %v8229_v59  ;;  %v8244_v59 = vld [vmem:[#allocation5 + $0x114] ss:$8 sps:$4 sm:$0xff]  }
 0x307   :  { %3780 = vmatmul.mubr.bf16.gmra.mrb[152].mxu0 %v10273_v44 }
 0x308   :  { %4552 = vmatmul.mubr.bf16.gmra.mrb[152].mxu1 %v10273_v44  ;;  %3789 = vmatprep.mubr.bf16.mxu0 %v10274_v24 }
 0x309   :  { %4561 = vmatprep.mubr.bf16.mxu1 %v10274_v24  ;;  %5265 = vmatpush1.bf16.msra.mxu0 %v8227_v1 }
 0x30a   :  { %5266 = vmatprep.subr.bf16.mxu0 %v8232_v20 }
 0x30d   :  { %5267 = vmatpush1.bf16.msra.mxu0 %v8230_v16 }
 0x30e   :  { %5268 = vmatprep.subr.bf16.mxu0 %v8235_v21 }
 0x30f   :  { %3790 = vmatmul.mubr.bf16.gmra.mrb[156].mxu0 %v10275_v28 }
 0x310   :  { %4562 = vmatmul.mubr.bf16.gmra.mrb[156].mxu1 %v10275_v28  ;;  %3799 = vmatprep.mubr.bf16.mxu0 %v10276_v47 }
 0x311   :  { %4571 = vmatprep.mubr.bf16.mxu1 %v10276_v47  ;;  %5269 = vmatpush1.bf16.msra.mxu0 %v8233_v34 }
 0x312   :  { %5270 = vmatprep.subr.bf16.mxu0 %v8238_v0 }
 0x315   :  { %5271 = vmatpush1.bf16.msra.mxu0 %v8236_v51 }
 0x316   :  { %5433 = vmatprep.subr.bf16.mxu0 %v8241_v61 }
 0x317   :  { %3800 = vmatmul.mubr.bf16.gmra.mrb[160].mxu0 %v10277_v18 }
 0x318   :  { %4572 = vmatmul.mubr.bf16.gmra.mrb[160].mxu1 %v10277_v18  ;;  %3809 = vmatprep.mubr.bf16.mxu0 %v10278_v42 }
 0x319   :  { %4581 = vmatprep.mubr.bf16.mxu1 %v10278_v42 }
 0x31f   :  { %3810 = vmatmul.mubr.bf16.gmra.mrb[164].mxu0 %v10279_v60 }
 0x320   :  { %4582 = vmatmul.mubr.bf16.gmra.mrb[164].mxu1 %v10279_v60  ;;  %3819 = vmatprep.mubr.bf16.mxu0 %v10280_v36  ;;  %v8242_v60 = vld [vmem:[#allocation5 + $0x110] ss:$8 sps:$4 sm:$0xff]  }
 0x321   :  { %4591 = vmatprep.mubr.bf16.mxu1 %v10280_v36 }
 0x327   :  { %3820 = vmatmul.mubr.bf16.gmra.mrb[168].mxu0 %v10281_v54 }
 0x328   :  { %4592 = vmatmul.mubr.bf16.gmra.mrb[168].mxu1 %v10281_v54  ;;  %3829 = vmatprep.mubr.bf16.mxu0 %v10282_v25 }
 0x329   :  { %4601 = vmatprep.mubr.bf16.mxu1 %v10282_v25 }
 0x32f   :  { %3830 = vmatmul.mubr.bf16.gmra.mrb[172].mxu0 %v10283_v30 }
 0x330   :  { %4602 = vmatmul.mubr.bf16.gmra.mrb[172].mxu1 %v10283_v30  ;;  %3839 = vmatprep.mubr.bf16.mxu0 %v9526_v62  ;;  %v8247_v30 = vld [vmem:[#allocation5 + $0x124] ss:$8 sps:$4 sm:$0xff]  }
 0x331   :  { %4611 = vmatprep.mubr.bf16.mxu1 %v9526_v62  ;;  %v10284_v62 = vld [vmem:[#allocation47_spill] sm:$0xff] }
 0x337   :  { %3840 = vmatmul.mubr.bf16.gmra.mrb[176].mxu0 %v9523_v11 }
 0x338   :  { %4612 = vmatmul.mubr.bf16.gmra.mrb[176].mxu1 %v9523_v11  ;;  %3849 = vmatprep.mubr.bf16.mxu0 %v9546_v14  ;;  %v1806_v11 = vld [vmem:[%s10176_s4] sm:$0xf] }
 0x339   :  { %4621 = vmatprep.mubr.bf16.mxu1 %v9546_v14  ;;  %v9744_v12 = vrot.slane %v1806_v11, %v10288_v53 }
 0x33f   :  { %3850 = vmatmul.mubr.bf16.gmra.mrb[180].mxu0 %v9543_v52 }
 0x340   :  { %4622 = vmatmul.mubr.bf16.gmra.mrb[180].mxu1 %v9543_v52  ;;  %3859 = vmatprep.mubr.bf16.mxu0 %v9566_v40  ;;  %v10285_v52 = vld [vmem:[#allocation16_spill] sm:$0xff] }
 0x341   :  { %4631 = vmatprep.mubr.bf16.mxu1 %v9566_v40  ;;  %v9737_v14 = vrot.slane %v1806_v11, %v10285_v52  ;;  %v10286_v40 = vld [vmem:[#allocation15_spill] sm:$0xff] }
 0x342   :  { %v10287_v49 = vsub.s32 2, %v10286_v40 }
 0x344   :  { %v9741_v48 = vrot.slane %v1806_v11, %v10287_v49 }
 0x347   :  { %3860 = vmatmul.mubr.bf16.gmra.mrb[184].mxu0 %v10284_v62 }
 0x348   :  { %4632 = vmatmul.mubr.bf16.gmra.mrb[184].mxu1 %v10284_v62  ;;  %3869 = vmatprep.mubr.bf16.mxu0 %v9585_v8 }
 0x349   :  { %4641 = vmatprep.mubr.bf16.mxu1 %v9585_v8  ;;  %v10289_v8 = vsub.s32 3, %v10286_v40 }
 0x34b   :  { %v9748_v38 = vrot.slane %v1806_v11, %v10289_v8 }
 0x34f   :  { %3870 = vmatmul.mubr.bf16.gmra.mrb[188].mxu0 %v9583_v10 }
 0x350   :  { %4642 = vmatmul.mubr.bf16.gmra.mrb[188].mxu1 %v9583_v10 }
 0x3aa   :  { %v3721_v56 = vpop.f32.mrb[128].mxu0 }
 0x3ab   :  { %v7139_v10 = vadd.f32 %v3721_v56, %v9737_v14  ;;  %v4493_v31 = vpop.f32.mrb[128].mxu1  ;;  %v3723_v13 = vpop.f32.mrb[129].mxu0 }
 0x3ac   :  { %v7203_v5 = vadd.f32 %v4493_v31, %v9741_v48  ;;  %v7140_v37 = vadd.f32 %v3723_v13, %v9744_v12  ;;  %v4495_v39 = vpop.f32.mrb[129].mxu1  ;;  %v3725_v17 = vpop.f32.mrb[130].mxu0  ;;  %v8245_v31 = vld [vmem:[#allocation5 + $0x120] ss:$8 sps:$4 sm:$0xff]  }
 0x3ad   :  { %v7204_v41 = vadd.f32 %v4495_v39, %v9748_v38  ;;  %v7141_v43 = vadd.f32 %v3725_v17, %v9737_v14  ;;  %v4497_v57 = vpop.f32.mrb[130].mxu1  ;;  %v3727_v50 = vpop.f32.mrb[131].mxu0  ;;  %v4652_v23 = vmax.f32 %v7139_v10, 0.0  ;;  %v8250_v17 = vld [vmem:[#allocation5 + $0x134] ss:$8 sps:$4 sm:$0xff]  }
 0x3ae   :  { %v7205_v58 = vadd.f32 %v4497_v57, %v9741_v48  ;;  %v7142_v19 = vadd.f32 %v3727_v50, %v9744_v12  ;;  %v4499_v35 = vpop.f32.mrb[131].mxu1  ;;  %v4654_v9 = vmax.f32 %v7203_v5, 0.0  ;;  %v4653_v55 = vmax.f32 %v7140_v37, 0.0 }
 0x3af   :  { %v4656_v7 = vmax.f32 %v7141_v43, 0.0  ;;  %v7206_v32 = vadd.f32 %v4499_v35, %v9748_v38  ;;  %v4655_v27 = vmax.f32 %v7204_v41, 0.0 }
 0x3b0   :  { %v4658_v2 = vmax.f32 %v7205_v58, 0.0  ;;  %v4657_v46 = vmax.f32 %v7142_v19, 0.0 }
 0x3b1   :  { %v4780_v4 = vpack.c.bf16 %v4656_v7, %v4652_v23  ;;  %v4659_v29 = vmax.f32 %v7206_v32, 0.0 }
 0x3b2   :  { %v9758_v15 = vpack.c.bf16 %v4658_v2, %v4654_v9  ;;  %v4781_v33 = vpack.c.bf16 %v4657_v46, %v4653_v55  ;;  %v3731_v45 = vpop.f32.mrb[132].mxu0  ;;  %v8248_v55 = vld [vmem:[#allocation5 + $0x130] ss:$8 sps:$4 sm:$0xff]  }
 0x3b3   :  { %v9760_v26 = vpack.c.bf16 %v4659_v29, %v4655_v27  ;;  %v7143_v22 = vadd.f32 %v3731_v45, %v9737_v14  ;;  %v4503_v63 = vpop.f32.mrb[132].mxu1  ;;  %v3733_v6 = vpop.f32.mrb[133].mxu0 }
 0x3b4   :  { %v7207_v1 = vadd.f32 %v4503_v63, %v9741_v48  ;;  %v7144_v20 = vadd.f32 %v3733_v6, %v9744_v12  ;;  %v4505_v44 = vpop.f32.mrb[133].mxu1  ;;  %v3735_v24 = vpop.f32.mrb[134].mxu0  ;;  %5272 = vmatprep.mubr.bf16.mxu0 %v4781_v33 }
 0x3b5   :  { %v7208_v16 = vadd.f32 %v4505_v44, %v9748_v38  ;;  %v7145_v21 = vadd.f32 %v3735_v24, %v9737_v14  ;;  %v4507_v34 = vpop.f32.mrb[134].mxu1  ;;  %v3737_v28 = vpop.f32.mrb[135].mxu0  ;;  %5273 = vmatmul.mubr.bf16.vlgmr.msra.gmra.mrb[192].mxu0 %v4780_v4  ;;  %v4660_v36 = vmax.f32 %v7143_v22, 0.0  ;;  %v8253_v4 = vld [vmem:[#allocation5 + $0x144] ss:$8 sps:$4 sm:$0xff]  }
 0x3b6   :  { %v7209_v47 = vadd.f32 %v4507_v34, %v9741_v48  ;;  %v7146_v18 = vadd.f32 %v3737_v28, %v9744_v12  ;;  %v4509_v42 = vpop.f32.mrb[135].mxu1  ;;  %5434 = vmatpush1.bf16.msra.mxu0 %v8239_v3  ;;  %v4662_v0 = vmax.f32 %v7207_v1, 0.0  ;;  %v4661_v51 = vmax.f32 %v7144_v20, 0.0  ;;  %v8251_v44 = vld [vmem:[#allocation5 + $0x140] ss:$8 sps:$4 sm:$0xff]  }
 0x3b7   :  { %v4664_v54 = vmax.f32 %v7145_v21, 0.0  ;;  %v7210_v25 = vadd.f32 %v4509_v42, %v9748_v38  ;;  %5435 = vmatprep.subr.bf16.mxu0 %v8244_v59  ;;  %v4663_v11 = vmax.f32 %v7208_v16, 0.0  ;;  %v8256_v28 = vld [vmem:[#allocation5 + $0x154] ss:$8 sps:$4 sm:$0xff]  }
 0x3b8   :  { %v4666_v61 = vmax.f32 %v7209_v47, 0.0  ;;  %v4665_v62 = vmax.f32 %v7146_v18, 0.0 }
 0x3b9   :  { %v4784_v40 = vpack.c.bf16 %v4664_v54, %v4660_v36  ;;  %v4667_v49 = vmax.f32 %v7210_v25, 0.0 }
 0x3ba   :  { %v9770_v8 = vpack.c.bf16 %v4666_v61, %v4662_v0  ;;  %v4785_v56 = vpack.c.bf16 %v4665_v62, %v4661_v51  ;;  %v3741_v10 = vpop.f32.mrb[136].mxu0  ;;  %5436 = vmatpush1.bf16.msra.mxu0 %v8242_v60  ;;  %v8254_v62 = vld [vmem:[#allocation5 + $0x150] ss:$8 sps:$4 sm:$0xff]  }
 0x3bb   :  { %v9772_v13 = vpack.c.bf16 %v4667_v49, %v4663_v11  ;;  %v7147_v5 = vadd.f32 %v3741_v10, %v9737_v14  ;;  %v4513_v37 = vpop.f32.mrb[136].mxu1  ;;  %v3743_v39 = vpop.f32.mrb[137].mxu0  ;;  %5437 = vmatprep.subr.bf16.mxu0 %v8247_v30 }
 0x3bc   :  { %v7211_v41 = vadd.f32 %v4513_v37, %v9741_v48  ;;  %v7148_v43 = vadd.f32 %v3743_v39, %v9744_v12  ;;  %v4515_v57 = vpop.f32.mrb[137].mxu1  ;;  %v3745_v50 = vpop.f32.mrb[138].mxu0  ;;  %5282 = vmatprep.mubr.bf16.mxu0 %v4785_v56  ;;  %v8259_v56 = vld [vmem:[#allocation5 + $0x164] ss:$8 sps:$4 sm:$0xff]  }
 0x3bd   :  { %v7212_v58 = vadd.f32 %v4515_v57, %v9748_v38  ;;  %v7149_v19 = vadd.f32 %v3745_v50, %v9737_v14  ;;  %v4517_v35 = vpop.f32.mrb[138].mxu1  ;;  %v3747_v23 = vpop.f32.mrb[139].mxu0  ;;  %5283 = vmatmul.mubr.bf16.gmra.mrb[196].mxu0 %v4784_v40  ;;  %v4668_v2 = vmax.f32 %v7147_v5, 0.0 }
 0x3be   :  { %v7213_v7 = vadd.f32 %v4517_v35, %v9741_v48  ;;  %v7150_v32 = vadd.f32 %v3747_v23, %v9744_v12  ;;  %v4519_v9 = vpop.f32.mrb[139].mxu1  ;;  %5438 = vmatpush1.bf16.msra.mxu0 %v8245_v31  ;;  %v4670_v29 = vmax.f32 %v7211_v41, 0.0  ;;  %v4669_v33 = vmax.f32 %v7148_v43, 0.0 }
 0x3bf   :  { %v4672_v46 = vmax.f32 %v7149_v19, 0.0  ;;  %v7214_v27 = vadd.f32 %v4519_v9, %v9748_v38  ;;  %5439 = vmatprep.subr.bf16.mxu0 %v8250_v17  ;;  %v4671_v22 = vmax.f32 %v7212_v58, 0.0  ;;  %v8257_v58 = vld [vmem:[#allocation5 + $0x160] ss:$8 sps:$4 sm:$0xff]  }
 0x3c0   :  { %v4674_v45 = vmax.f32 %v7213_v7, 0.0  ;;  %v4673_v3 = vmax.f32 %v7150_v32, 0.0  ;;  %v8262_v32 = vld [vmem:[#allocation5 + $0x174] ss:$8 sps:$4 sm:$0xff]  }
 0x3c1   :  { %v4788_v63 = vpack.c.bf16 %v4672_v46, %v4668_v2  ;;  %v4675_v6 = vmax.f32 %v7214_v27, 0.0 }
 0x3c2   :  { %v9782_v59 = vpack.c.bf16 %v4674_v45, %v4670_v29  ;;  %v4789_v1 = vpack.c.bf16 %v4673_v3, %v4669_v33  ;;  %v3751_v20 = vpop.f32.mrb[140].mxu0  ;;  %5440 = vmatpush1.bf16.msra.mxu0 %v8248_v55 }
 0x3c3   :  { %v9784_v24 = vpack.c.bf16 %v4675_v6, %v4671_v22  ;;  %v7151_v16 = vadd.f32 %v3751_v20, %v9737_v14  ;;  %v4523_v21 = vpop.f32.mrb[140].mxu1  ;;  %v3753_v34 = vpop.f32.mrb[141].mxu0  ;;  %5441 = vmatprep.subr.bf16.mxu0 %v8253_v4 }
 0x3c4   :  { %v7215_v47 = vadd.f32 %v4523_v21, %v9741_v48  ;;  %v7152_v18 = vadd.f32 %v3753_v34, %v9744_v12  ;;  %v4525_v42 = vpop.f32.mrb[141].mxu1  ;;  %v3755_v60 = vpop.f32.mrb[142].mxu0  ;;  %5292 = vmatprep.mubr.bf16.mxu0 %v4789_v1 }
 0x3c5   :  { %v7216_v36 = vadd.f32 %v4525_v42, %v9748_v38  ;;  %v7153_v54 = vadd.f32 %v3755_v60, %v9737_v14  ;;  %v4527_v25 = vpop.f32.mrb[142].mxu1  ;;  %v3757_v30 = vpop.f32.mrb[143].mxu0  ;;  %5293 = vmatmul.mubr.bf16.gmra.mrb[200].mxu0 %v4788_v63  ;;  %v4676_v11 = vmax.f32 %v7151_v16, 0.0  ;;  %v8260_v63 = vld [vmem:[#allocation5 + $0x170] ss:$8 sps:$4 sm:$0xff]  }
 0x3c6   :  { %v7217_v0 = vadd.f32 %v4527_v25, %v9741_v48  ;;  %v7154_v51 = vadd.f32 %v3757_v30, %v9744_v12  ;;  %v4529_v61 = vpop.f32.mrb[143].mxu1  ;;  %5442 = vmatpush1.bf16.msra.mxu0 %v8251_v44  ;;  %v4678_v10 = vmax.f32 %v7215_v47, 0.0  ;;  %v4677_v31 = vmax.f32 %v7152_v18, 0.0  ;;  %v8265_v44 = vld [vmem:[#allocation5 + $0x184] ss:$8 sps:$4 sm:$0xff]  }
 0x3c7   :  { %v4680_v40 = vmax.f32 %v7153_v54, 0.0  ;;  %v7218_v49 = vadd.f32 %v4529_v61, %v9748_v38  ;;  %5443 = vmatprep.subr.bf16.mxu0 %v8256_v28  ;;  %v4679_v39 = vmax.f32 %v7216_v36, 0.0  ;;  %v8263_v25 = vld [vmem:[#allocation5 + $0x180] ss:$8 sps:$4 sm:$0xff]  }
 0x3c8   :  { %v4682_v5 = vmax.f32 %v7217_v0, 0.0  ;;  %v4681_v37 = vmax.f32 %v7154_v51, 0.0 }
 0x3c9   :  { %v4792_v17 = vpack.c.bf16 %v4680_v40, %v4676_v11  ;;  %v4683_v41 = vmax.f32 %v7218_v49, 0.0 }
 0x3ca   :  { %v9794_v43 = vpack.c.bf16 %v4682_v5, %v4678_v10  ;;  %v4793_v57 = vpack.c.bf16 %v4681_v37, %v4677_v31  ;;  %v3761_v50 = vpop.f32.mrb[144].mxu0  ;;  %5444 = vmatpush1.bf16.msra.mxu0 %v8254_v62  ;;  %v8268_v62 = vld [vmem:[#allocation5 + $0x194] ss:$8 sps:$4 sm:$0xff]  }
 0x3cb   :  { %v9796_v19 = vpack.c.bf16 %v4683_v41, %v4679_v39  ;;  %v7155_v35 = vadd.f32 %v3761_v50, %v9737_v14  ;;  %v4533_v23 = vpop.f32.mrb[144].mxu1  ;;  %v3763_v7 = vpop.f32.mrb[145].mxu0  ;;  %5445 = vmatprep.subr.bf16.mxu0 %v8259_v56 }
 0x3cc   :  { %v7219_v9 = vadd.f32 %v4533_v23, %v9741_v48  ;;  %v7156_v55 = vadd.f32 %v3763_v7, %v9744_v12  ;;  %v4535_v2 = vpop.f32.mrb[145].mxu1  ;;  %v3765_v46 = vpop.f32.mrb[146].mxu0  ;;  %5302 = vmatprep.mubr.bf16.mxu0 %v4793_v57  ;;  %v8266_v57 = vld [vmem:[#allocation5 + $0x190] ss:$8 sps:$4 sm:$0xff]   ;;  %v8271_v23 = vld [vmem:[#allocation5 + $0x1a4] ss:$8 sps:$4 sm:$0xff]  }
 0x3cd   :  { %v7220_v27 = vadd.f32 %v4535_v2, %v9748_v38  ;;  %v7157_v4 = vadd.f32 %v3765_v46, %v9737_v14  ;;  %v4537_v29 = vpop.f32.mrb[146].mxu1  ;;  %v3767_v33 = vpop.f32.mrb[147].mxu0  ;;  %5303 = vmatmul.mubr.bf16.gmra.mrb[204].mxu0 %v4792_v17  ;;  %v4684_v6 = vmax.f32 %v7155_v35, 0.0 }
 0x3ce   :  { %v7221_v45 = vadd.f32 %v4537_v29, %v9741_v48  ;;  %v7158_v3 = vadd.f32 %v3767_v33, %v9744_v12  ;;  %v4539_v22 = vpop.f32.mrb[147].mxu1  ;;  %5446 = vmatpush1.bf16.msra.mxu0 %v8257_v58  ;;  %v4686_v16 = vmax.f32 %v7219_v9, 0.0  ;;  %v4685_v21 = vmax.f32 %v7156_v55, 0.0 }
 0x3cf   :  { %v4688_v1 = vmax.f32 %v7157_v4, 0.0  ;;  %v7222_v20 = vadd.f32 %v4539_v22, %v9748_v38  ;;  %5447 = vmatprep.subr.bf16.mxu0 %v8262_v32  ;;  %v4687_v47 = vmax.f32 %v7220_v27, 0.0 }
 0x3d0   :  { %v4690_v34 = vmax.f32 %v7221_v45, 0.0  ;;  %v4689_v28 = vmax.f32 %v7158_v3, 0.0  ;;  %v8269_v45 = vld [vmem:[#allocation5 + $0x1a0] ss:$8 sps:$4 sm:$0xff]  }
 0x3d1   :  { %v4796_v18 = vpack.c.bf16 %v4688_v1, %v4684_v6  ;;  %v4691_v42 = vmax.f32 %v7222_v20, 0.0  ;;  %v8274_v1 = vld [vmem:[#allocation5 + $0x1b4] ss:$8 sps:$4 sm:$0xff]  }
 0x3d2   :  { %v9806_v60 = vpack.c.bf16 %v4690_v34, %v4686_v16  ;;  %v4797_v36 = vpack.c.bf16 %v4689_v28, %v4685_v21  ;;  %v3771_v54 = vpop.f32.mrb[148].mxu0  ;;  %5448 = vmatpush1.bf16.msra.mxu0 %v8260_v63 }
 0x3d3   :  { %v9808_v30 = vpack.c.bf16 %v4691_v42, %v4687_v47  ;;  %v7159_v0 = vadd.f32 %v3771_v54, %v9737_v14  ;;  %v4543_v51 = vpop.f32.mrb[148].mxu1  ;;  %v3773_v61 = vpop.f32.mrb[149].mxu0  ;;  %5449 = vmatprep.subr.bf16.mxu0 %v8265_v44 }
 0x3d4   :  { %v7223_v11 = vadd.f32 %v4543_v51, %v9741_v48  ;;  %v7160_v40 = vadd.f32 %v3773_v61, %v9744_v12  ;;  %v4545_v49 = vpop.f32.mrb[149].mxu1  ;;  %v3775_v56 = vpop.f32.mrb[150].mxu0  ;;  %5312 = vmatprep.mubr.bf16.mxu0 %v4797_v36 }
 0x3d5   :  { %v7224_v10 = vadd.f32 %v4545_v49, %v9748_v38  ;;  %v7161_v31 = vadd.f32 %v3775_v56, %v9737_v14  ;;  %v4547_v5 = vpop.f32.mrb[150].mxu1  ;;  %v3777_v37 = vpop.f32.mrb[151].mxu0  ;;  %5313 = vmatmul.mubr.bf16.gmra.mrb[208].mxu0 %v4796_v18  ;;  %v4692_v50 = vmax.f32 %v7159_v0, 0.0 }
 0x3d6   :  { %v7225_v39 = vadd.f32 %v4547_v5, %v9741_v48  ;;  %v7162_v17 = vadd.f32 %v3777_v37, %v9744_v12  ;;  %v4549_v41 = vpop.f32.mrb[151].mxu1  ;;  %5450 = vmatpush1.bf16.msra.mxu0 %v8263_v25  ;;  %v4694_v7 = vmax.f32 %v7223_v11, 0.0  ;;  %v4693_v32 = vmax.f32 %v7160_v40, 0.0  ;;  %v8272_v25 = vld [vmem:[#allocation5 + $0x1b0] ss:$8 sps:$4 sm:$0xff]  }
 0x3d7   :  { %v4696_v58 = vmax.f32 %v7161_v31, 0.0  ;;  %v7226_v35 = vadd.f32 %v4549_v41, %v9748_v38  ;;  %5451 = vmatprep.subr.bf16.mxu0 %v8268_v62  ;;  %v4695_v2 = vmax.f32 %v7224_v10, 0.0  ;;  %v8277_v62 = vld [vmem:[#allocation5 + $0x1c4] ss:$8 sps:$4 sm:$0xff]   ;;  %v8275_v41 = vld [vmem:[#allocation5 + $0x1c0] ss:$8 sps:$4 sm:$0xff]  }
 0x3d8   :  { %v4698_v9 = vmax.f32 %v7225_v39, 0.0  ;;  %v4697_v55 = vmax.f32 %v7162_v17, 0.0 }
 0x3d9   :  { %v4800_v46 = vpack.c.bf16 %v4696_v58, %v4692_v50  ;;  %v4699_v27 = vmax.f32 %v7226_v35, 0.0 }
 0x3da   :  { %v9818_v4 = vpack.c.bf16 %v4698_v9, %v4694_v7  ;;  %v4801_v29 = vpack.c.bf16 %v4697_v55, %v4693_v32  ;;  %v3781_v33 = vpop.f32.mrb[152].mxu0  ;;  %5452 = vmatpush1.bf16.msra.mxu0 %v8266_v57 }
 0x3db   :  { %v9820_v3 = vpack.c.bf16 %v4699_v27, %v4695_v2  ;;  %v7163_v22 = vadd.f32 %v3781_v33, %v9737_v14  ;;  %v4553_v63 = vpop.f32.mrb[152].mxu1  ;;  %v3783_v6 = vpop.f32.mrb[153].mxu0  ;;  %5453 = vmatprep.subr.bf16.mxu0 %v8271_v23  ;;  %v8280_v23 = vld [vmem:[#allocation5 + $0x1d4] ss:$8 sps:$4 sm:$0xff]  }
 0x3dc   :  { %v7227_v20 = vadd.f32 %v4553_v63, %v9741_v48  ;;  %v7164_v44 = vadd.f32 %v3783_v6, %v9744_v12  ;;  %v4555_v16 = vpop.f32.mrb[153].mxu1  ;;  %v3785_v21 = vpop.f32.mrb[154].mxu0  ;;  %5322 = vmatprep.mubr.bf16.mxu0 %v4801_v29  ;;  %v8278_v63 = vld [vmem:[#allocation5 + $0x1d0] ss:$8 sps:$4 sm:$0xff]  }
 0x3dd   :  { %v7228_v34 = vadd.f32 %v4555_v16, %v9748_v38  ;;  %v7165_v28 = vadd.f32 %v3785_v21, %v9737_v14  ;;  %v4557_v47 = vpop.f32.mrb[154].mxu1  ;;  %v3787_v18 = vpop.f32.mrb[155].mxu0  ;;  %5323 = vmatmul.mubr.bf16.gmra.mrb[212].mxu0 %v4800_v46  ;;  %v4700_v0 = vmax.f32 %v7163_v22, 0.0 }
 0x3de   :  { %v7229_v42 = vadd.f32 %v4557_v47, %v9741_v48  ;;  %v7166_v36 = vadd.f32 %v3787_v18, %v9744_v12  ;;  %v4559_v54 = vpop.f32.mrb[155].mxu1  ;;  %5454 = vmatpush1.bf16.msra.mxu0 %v8269_v45  ;;  %v4702_v11 = vmax.f32 %v7227_v20, 0.0  ;;  %v4701_v40 = vmax.f32 %v7164_v44, 0.0  ;;  %v8283_v44 = vld [vmem:[#allocation5 + $0x1e4] ss:$8 sps:$4 sm:$0xff]  }
 0x3df   :  { %v4704_v51 = vmax.f32 %v7165_v28, 0.0  ;;  %v7230_v61 = vadd.f32 %v4559_v54, %v9748_v38  ;;  %5455 = vmatprep.subr.bf16.mxu0 %v8274_v1  ;;  %v4703_v10 = vmax.f32 %v7228_v34, 0.0 }
 0x3e0   :  { %v4706_v49 = vmax.f32 %v7229_v42, 0.0  ;;  %v4705_v56 = vmax.f32 %v7166_v36, 0.0 }
 0x3e1   :  { %v4804_v31 = vpack.c.bf16 %v4704_v51, %v4700_v0  ;;  %v4707_v5 = vmax.f32 %v7230_v61, 0.0  ;;  %v8281_v0 = vld [vmem:[#allocation5 + $0x1e0] ss:$8 sps:$4 sm:$0xff]  }
 0x3e2   :  { %v9830_v37 = vpack.c.bf16 %v4706_v49, %v4702_v11  ;;  %v4805_v39 = vpack.c.bf16 %v4705_v56, %v4701_v40  ;;  %v3791_v17 = vpop.f32.mrb[156].mxu0  ;;  %5456 = vmatpush1.bf16.msra.mxu0 %v8272_v25  ;;  %v8286_v40 = vld [vmem:[#allocation5 + $0x1f4] ss:$8 sps:$4 sm:$0xff]  }
 0x3e3   :  { %v9832_v57 = vpack.c.bf16 %v4707_v5, %v4703_v10  ;;  %v7167_v50 = vadd.f32 %v3791_v17, %v9737_v14  ;;  %v4563_v58 = vpop.f32.mrb[156].mxu1  ;;  %v3793_v35 = vpop.f32.mrb[157].mxu0  ;;  %5457 = vmatprep.subr.bf16.mxu0 %v8277_v62 }
 0x3e4   :  { %v7231_v7 = vadd.f32 %v4563_v58, %v9741_v48  ;;  %v7168_v32 = vadd.f32 %v3793_v35, %v9744_v12  ;;  %v4565_v9 = vpop.f32.mrb[157].mxu1  ;;  %v3795_v55 = vpop.f32.mrb[158].mxu0  ;;  %5332 = vmatprep.mubr.bf16.mxu0 %v4805_v39 }
 0x3e5   :  { %v7232_v2 = vadd.f32 %v4565_v9, %v9748_v38  ;;  %v7169_v46 = vadd.f32 %v3795_v55, %v9737_v14  ;;  %v4567_v27 = vpop.f32.mrb[158].mxu1  ;;  %v3797_v29 = vpop.f32.mrb[159].mxu0  ;;  %5333 = vmatmul.mubr.bf16.gmra.mrb[216].mxu0 %v4804_v31  ;;  %v4708_v6 = vmax.f32 %v7167_v50, 0.0 }
 0x3e6   :  { %v7233_v33 = vadd.f32 %v4567_v27, %v9741_v48  ;;  %v7170_v45 = vadd.f32 %v3797_v29, %v9744_v12  ;;  %v4569_v22 = vpop.f32.mrb[159].mxu1  ;;  %5458 = vmatpush1.bf16.msra.mxu0 %v8275_v41  ;;  %v4710_v16 = vmax.f32 %v7231_v7, 0.0  ;;  %v4709_v21 = vmax.f32 %v7168_v32, 0.0 }
 0x3e7   :  { %v4712_v1 = vmax.f32 %v7169_v46, 0.0  ;;  %v7234_v20 = vadd.f32 %v4569_v22, %v9748_v38  ;;  %5459 = vmatprep.subr.bf16.mxu0 %v8280_v23  ;;  %v4711_v47 = vmax.f32 %v7232_v2, 0.0  ;;  %v8284_v23 = vld [vmem:[#allocation5 + $0x1f0] ss:$8 sps:$4 sm:$0xff]  }
 0x3e8   :  { %v4714_v34 = vmax.f32 %v7233_v33, 0.0  ;;  %v4713_v28 = vmax.f32 %v7170_v45, 0.0 }
 0x3e9   :  { %v4808_v18 = vpack.c.bf16 %v4712_v1, %v4708_v6  ;;  %v4715_v42 = vmax.f32 %v7234_v20, 0.0 }
 0x3ea   :  { %v9842_v36 = vpack.c.bf16 %v4714_v34, %v4710_v16  ;;  %v4809_v54 = vpack.c.bf16 %v4713_v28, %v4709_v21  ;;  %v3801_v25 = vpop.f32.mrb[160].mxu0  ;;  %5460 = vmatpush1.bf16.msra.mxu0 %v8278_v63 }
 0x3eb   :  { %v9844_v51 = vpack.c.bf16 %v4715_v42, %v4711_v47  ;;  %v7171_v61 = vadd.f32 %v3801_v25, %v9737_v14  ;;  %v4573_v62 = vpop.f32.mrb[160].mxu1  ;;  %v3803_v11 = vpop.f32.mrb[161].mxu0  ;;  %5461 = vmatprep.subr.bf16.mxu0 %v8283_v44 }
 0x3ec   :  { %v7235_v49 = vadd.f32 %v4573_v62, %v9741_v48  ;;  %v7172_v56 = vadd.f32 %v3803_v11, %v9744_v12  ;;  %v4575_v10 = vpop.f32.mrb[161].mxu1  ;;  %v3805_v31 = vpop.f32.mrb[162].mxu0  ;;  %5342 = vmatprep.mubr.bf16.mxu0 %v4809_v54 }
 0x3ed   :  { %v7236_v5 = vadd.f32 %v4575_v10, %v9748_v38  ;;  %v7173_v39 = vadd.f32 %v3805_v31, %v9737_v14  ;;  %v4577_v17 = vpop.f32.mrb[162].mxu1  ;;  %v3807_v41 = vpop.f32.mrb[163].mxu0  ;;  %5343 = vmatmul.mubr.bf16.gmra.mrb[220].mxu0 %v4808_v18  ;;  %v4716_v7 = vmax.f32 %v7171_v61, 0.0 }
 0x3ee   :  { %v7237_v50 = vadd.f32 %v4577_v17, %v9741_v48  ;;  %v7174_v58 = vadd.f32 %v3807_v41, %v9744_v12  ;;  %v4579_v35 = vpop.f32.mrb[163].mxu1  ;;  %5462 = vmatpush1.bf16.msra.mxu0 %v8281_v0  ;;  %v4718_v55 = vmax.f32 %v7235_v49, 0.0  ;;  %v4717_v2 = vmax.f32 %v7172_v56, 0.0 }
 0x3ef   :  { %v4720_v32 = vmax.f32 %v7173_v39, 0.0  ;;  %v7238_v9 = vadd.f32 %v4579_v35, %v9748_v38  ;;  %5463 = vmatprep.subr.bf16.mxu0 %v8286_v40  ;;  %v4719_v29 = vmax.f32 %v7236_v5, 0.0 }
 0x3f0   :  { %v4722_v46 = vmax.f32 %v7237_v50, 0.0  ;;  %v4721_v27 = vmax.f32 %v7174_v58, 0.0 }
 0x3f1   :  { %v4812_v33 = vpack.c.bf16 %v4720_v32, %v4716_v7  ;;  %v4723_v45 = vmax.f32 %v7238_v9, 0.0 }
 0x3f2   :  { %v9854_v22 = vpack.c.bf16 %v4722_v46, %v4718_v55  ;;  %v4813_v63 = vpack.c.bf16 %v4721_v27, %v4717_v2  ;;  %v3811_v6 = vpop.f32.mrb[164].mxu0  ;;  %5464 = vmatpush1.bf16.msra.mxu0 %v8284_v23 }
 0x3f3   :  { %v9856_v1 = vpack.c.bf16 %v4723_v45, %v4719_v29  ;;  %v7175_v20 = vadd.f32 %v3811_v6, %v9737_v14  ;;  %v4583_v44 = vpop.f32.mrb[164].mxu1  ;;  %v3813_v16 = vpop.f32.mrb[165].mxu0 }
 0x3f4   :  { %v7239_v21 = vadd.f32 %v4583_v44, %v9741_v48  ;;  %v7176_v34 = vadd.f32 %v3813_v16, %v9744_v12  ;;  %v4585_v28 = vpop.f32.mrb[165].mxu1  ;;  %v3815_v47 = vpop.f32.mrb[166].mxu0  ;;  %5352 = vmatprep.mubr.bf16.mxu0 %v4813_v63 }
 0x3f5   :  { %v7240_v18 = vadd.f32 %v4585_v28, %v9748_v38  ;;  %v7177_v42 = vadd.f32 %v3815_v47, %v9737_v14  ;;  %v4587_v54 = vpop.f32.mrb[166].mxu1  ;;  %v3817_v25 = vpop.f32.mrb[167].mxu0  ;;  %5353 = vmatmul.mubr.bf16.gmra.mrb[224].mxu0 %v4812_v33  ;;  %v4724_v11 = vmax.f32 %v7175_v20, 0.0 }
 0x3f6   :  { %v7241_v0 = vadd.f32 %v4587_v54, %v9741_v48  ;;  %v7178_v61 = vadd.f32 %v3817_v25, %v9744_v12  ;;  %v4589_v62 = vpop.f32.mrb[167].mxu1  ;;  %v4726_v56 = vmax.f32 %v7239_v21, 0.0  ;;  %v4725_v10 = vmax.f32 %v7176_v34, 0.0 }
 0x3f7   :  { %v4728_v40 = vmax.f32 %v7177_v42, 0.0  ;;  %v7242_v49 = vadd.f32 %v4589_v62, %v9748_v38  ;;  %v4727_v39 = vmax.f32 %v7240_v18, 0.0 }
 0x3f8   :  { %v4730_v31 = vmax.f32 %v7241_v0, 0.0  ;;  %v4729_v5 = vmax.f32 %v7178_v61, 0.0 }
 0x3f9   :  { %v4816_v17 = vpack.c.bf16 %v4728_v40, %v4724_v11  ;;  %v4731_v41 = vmax.f32 %v7242_v49, 0.0 }
 0x3fa   :  { %v9866_v50 = vpack.c.bf16 %v4730_v31, %v4726_v56  ;;  %v4817_v58 = vpack.c.bf16 %v4729_v5, %v4725_v10  ;;  %v3821_v35 = vpop.f32.mrb[168].mxu0 }
 0x3fb   :  { %v9868_v23 = vpack.c.bf16 %v4731_v41, %v4727_v39  ;;  %v7179_v7 = vadd.f32 %v3821_v35, %v9737_v14  ;;  %v4593_v32 = vpop.f32.mrb[168].mxu1  ;;  %v3823_v9 = vpop.f32.mrb[169].mxu0 }
 0x3fc   :  { %v7243_v55 = vadd.f32 %v4593_v32, %v9741_v48  ;;  %v7180_v2 = vadd.f32 %v3823_v9, %v9744_v12  ;;  %v4595_v46 = vpop.f32.mrb[169].mxu1  ;;  %v3825_v27 = vpop.f32.mrb[170].mxu0  ;;  %5362 = vmatprep.mubr.bf16.mxu0 %v4817_v58 }
 0x3fd   :  { %v7244_v29 = vadd.f32 %v4595_v46, %v9748_v38  ;;  %v7181_v33 = vadd.f32 %v3825_v27, %v9737_v14  ;;  %v4597_v45 = vpop.f32.mrb[170].mxu1  ;;  %v3827_v63 = vpop.f32.mrb[171].mxu0  ;;  %5363 = vmatmul.mubr.bf16.gmra.mrb[228].mxu0 %v4816_v17  ;;  %v4732_v16 = vmax.f32 %v7179_v7, 0.0 }
 0x3fe   :  { %v7245_v6 = vadd.f32 %v4597_v45, %v9741_v48  ;;  %v7182_v20 = vadd.f32 %v3827_v63, %v9744_v12  ;;  %v4599_v44 = vpop.f32.mrb[171].mxu1  ;;  %v4734_v28 = vmax.f32 %v7243_v55, 0.0  ;;  %v4733_v47 = vmax.f32 %v7180_v2, 0.0 }
 0x3ff   :  { %v4736_v21 = vmax.f32 %v7181_v33, 0.0  ;;  %v7246_v34 = vadd.f32 %v4599_v44, %v9748_v38  ;;  %v4735_v54 = vmax.f32 %v7244_v29, 0.0 }
 0x400   :  { %v4738_v18 = vmax.f32 %v7245_v6, 0.0  ;;  %v4737_v42 = vmax.f32 %v7182_v20, 0.0 }
 0x401   :  { %v4820_v25 = vpack.c.bf16 %v4736_v21, %v4732_v16  ;;  %v4739_v0 = vmax.f32 %v7246_v34, 0.0 }
 0x402   :  { %v9878_v61 = vpack.c.bf16 %v4738_v18, %v4734_v28  ;;  %v4821_v62 = vpack.c.bf16 %v4737_v42, %v4733_v47  ;;  %v3831_v11 = vpop.f32.mrb[172].mxu0 }
 0x403   :  { %v9880_v40 = vpack.c.bf16 %v4739_v0, %v4735_v54  ;;  %v7183_v49 = vadd.f32 %v3831_v11, %v9737_v14  ;;  %v4603_v56 = vpop.f32.mrb[172].mxu1  ;;  %v3833_v10 = vpop.f32.mrb[173].mxu0 }
 0x404   :  { %v7247_v31 = vadd.f32 %v4603_v56, %v9741_v48  ;;  %v7184_v5 = vadd.f32 %v3833_v10, %v9744_v12  ;;  %v4605_v39 = vpop.f32.mrb[173].mxu1  ;;  %v3835_v17 = vpop.f32.mrb[174].mxu0  ;;  %5372 = vmatprep.mubr.bf16.mxu0 %v4821_v62 }
 0x405   :  { %v7248_v41 = vadd.f32 %v4605_v39, %v9748_v38  ;;  %v7185_v58 = vadd.f32 %v3835_v17, %v9737_v14  ;;  %v4607_v35 = vpop.f32.mrb[174].mxu1  ;;  %v3837_v7 = vpop.f32.mrb[175].mxu0  ;;  %5373 = vmatmul.mubr.bf16.gmra.mrb[232].mxu0 %v4820_v25  ;;  %v4740_v2 = vmax.f32 %v7183_v49, 0.0  ;;  %v8287_v17 = vld [vmem:[#allocation7] ss:$8 sps:$4 sm:$0xff]  }
 0x406   :  { %v7249_v32 = vadd.f32 %v4607_v35, %v9741_v48  ;;  %v7186_v9 = vadd.f32 %v3837_v7, %v9744_v12  ;;  %v4609_v55 = vpop.f32.mrb[175].mxu1  ;;  %v4742_v29 = vmax.f32 %v7247_v31, 0.0  ;;  %v4741_v33 = vmax.f32 %v7184_v5, 0.0  ;;  %v8289_v7 = vld [vmem:[#allocation7 + $0x4] ss:$8 sps:$4 sm:$0xff]  }
 0x407   :  { %v4744_v46 = vmax.f32 %v7185_v58, 0.0  ;;  %v7250_v27 = vadd.f32 %v4609_v55, %v9748_v38  ;;  %v4743_v6 = vmax.f32 %v7248_v41, 0.0  ;;  %5926 = vmatprep.subr.bf16.mxu1 %v8289_v7 }
 0x408   :  { %v4746_v45 = vmax.f32 %v7249_v32, 0.0  ;;  %v4745_v63 = vmax.f32 %v7186_v9, 0.0  ;;  %5927 = vmatpush1.bf16.msra.mxu1 %v8287_v17  ;;  %v8292_v17 = vld [vmem:[#allocation7 + $0x14] ss:$8 sps:$4 sm:$0xff]  }
 0x409   :  { %v4824_v20 = vpack.c.bf16 %v4744_v46, %v4740_v2  ;;  %v4747_v44 = vmax.f32 %v7250_v27, 0.0  ;;  %5928 = vmatprep.subr.bf16.mxu1 %v8292_v17 }
 0x40a   :  { %v9890_v16 = vpack.c.bf16 %v4746_v45, %v4742_v29  ;;  %v4825_v21 = vpack.c.bf16 %v4745_v63, %v4741_v33  ;;  %v3841_v34 = vpop.f32.mrb[176].mxu0 }
 0x40b   :  { %v9892_v28 = vpack.c.bf16 %v4747_v44, %v4743_v6  ;;  %v7187_v47 = vadd.f32 %v3841_v34, %v9737_v14  ;;  %v4613_v18 = vpop.f32.mrb[176].mxu1  ;;  %v3843_v42 = vpop.f32.mrb[177].mxu0 }
 0x40c   :  { %v7251_v54 = vadd.f32 %v4613_v18, %v9741_v48  ;;  %v7188_v25 = vadd.f32 %v3843_v42, %v9744_v12  ;;  %v4615_v0 = vpop.f32.mrb[177].mxu1  ;;  %v3845_v62 = vpop.f32.mrb[178].mxu0  ;;  %5382 = vmatprep.mubr.bf16.mxu0 %v4825_v21 }
 0x40d   :  { %v7252_v11 = vadd.f32 %v4615_v0, %v9748_v38  ;;  %v7189_v49 = vadd.f32 %v3845_v62, %v9737_v14  ;;  %v4617_v56 = vpop.f32.mrb[178].mxu1  ;;  %v3847_v10 = vpop.f32.mrb[179].mxu0  ;;  %5383 = vmatmul.mubr.bf16.gmra.mrb[236].mxu0 %v4824_v20  ;;  %v4748_v41 = vmax.f32 %v7187_v47, 0.0 }
 0x40e   :  { %v7253_v31 = vadd.f32 %v4617_v56, %v9741_v48  ;;  %v7190_v5 = vadd.f32 %v3847_v10, %v9744_v12  ;;  %v4619_v39 = vpop.f32.mrb[179].mxu1  ;;  %v4750_v32 = vmax.f32 %v7251_v54, 0.0  ;;  %v4749_v9 = vmax.f32 %v7188_v25, 0.0  ;;  %v8290_v10 = vld [vmem:[#allocation7 + $0x10] ss:$8 sps:$4 sm:$0xff]  }
 0x40f   :  { %v4752_v58 = vmax.f32 %v7189_v49, 0.0  ;;  %v7254_v35 = vadd.f32 %v4619_v39, %v9748_v38  ;;  %v4751_v46 = vmax.f32 %v7252_v11, 0.0  ;;  %5929 = vmatpush1.bf16.msra.mxu1 %v8290_v10 }
 0x410   :  { %v4754_v55 = vmax.f32 %v7253_v31, 0.0  ;;  %v4753_v2 = vmax.f32 %v7190_v5, 0.0 }
 0x411   :  { %v4828_v27 = vpack.c.bf16 %v4752_v58, %v4748_v41  ;;  %v4755_v29 = vmax.f32 %v7254_v35, 0.0 }
 0x412   :  { %v9902_v33 = vpack.c.bf16 %v4754_v55, %v4750_v32  ;;  %v4829_v45 = vpack.c.bf16 %v4753_v2, %v4749_v9  ;;  %v3851_v63 = vpop.f32.mrb[180].mxu0 }
 0x413   :  { %v9904_v6 = vpack.c.bf16 %v4755_v29, %v4751_v46  ;;  %v7191_v20 = vadd.f32 %v3851_v63, %v9737_v14  ;;  %v4623_v44 = vpop.f32.mrb[180].mxu1  ;;  %v3853_v21 = vpop.f32.mrb[181].mxu0 }
 0x414   :  { %v7255_v34 = vadd.f32 %v4623_v44, %v9741_v48  ;;  %v7192_v47 = vadd.f32 %v3853_v21, %v9744_v12  ;;  %v4625_v18 = vpop.f32.mrb[181].mxu1  ;;  %v3855_v42 = vpop.f32.mrb[182].mxu0  ;;  %5392 = vmatprep.mubr.bf16.mxu0 %v4829_v45 }
 0x415   :  { %v7256_v54 = vadd.f32 %v4625_v18, %v9748_v38  ;;  %v7193_v25 = vadd.f32 %v3855_v42, %v9737_v14  ;;  %v4627_v0 = vpop.f32.mrb[182].mxu1  ;;  %v3857_v62 = vpop.f32.mrb[183].mxu0  ;;  %5393 = vmatmul.mubr.bf16.gmra.mrb[240].mxu0 %v4828_v27  ;;  %v4756_v31 = vmax.f32 %v7191_v20, 0.0 }
 0x416   :  { %v7257_v11 = vadd.f32 %v4627_v0, %v9741_v48  ;;  %v7194_v49 = vadd.f32 %v3857_v62, %v9744_v12  ;;  %v4629_v56 = vpop.f32.mrb[183].mxu1  ;;  %v4758_v41 = vmax.f32 %v7255_v34, 0.0  ;;  %v4757_v58 = vmax.f32 %v7192_v47, 0.0 }
 0x417   :  { %v4760_v5 = vmax.f32 %v7193_v25, 0.0  ;;  %v7258_v39 = vadd.f32 %v4629_v56, %v9748_v38  ;;  %v4759_v32 = vmax.f32 %v7256_v54, 0.0 }
 0x418   :  { %v4762_v35 = vmax.f32 %v7257_v11, 0.0  ;;  %v4761_v7 = vmax.f32 %v7194_v49, 0.0  ;;  %v8293_v49 = vld [vmem:[#allocation7 + $0x20] ss:$8 sps:$4 sm:$0xff]  }
 0x419   :  { %v4832_v9 = vpack.c.bf16 %v4760_v5, %v4756_v31  ;;  %v4763_v55 = vmax.f32 %v7258_v39, 0.0  ;;  %v8295_v5 = vld [vmem:[#allocation7 + $0x24] ss:$8 sps:$4 sm:$0xff]  }
 0x41a   :  { %v9914_v2 = vpack.c.bf16 %v4762_v35, %v4758_v41  ;;  %v4833_v46 = vpack.c.bf16 %v4761_v7, %v4757_v58  ;;  %v3861_v27 = vpop.f32.mrb[184].mxu0  ;;  %5930 = vmatprep.subr.bf16.mxu1 %v8295_v5  ;;  %v8298_v5 = vld [vmem:[#allocation7 + $0x34] ss:$8 sps:$4 sm:$0xff]  }
 0x41b   :  { %v9916_v29 = vpack.c.bf16 %v4763_v55, %v4759_v32  ;;  %v7195_v45 = vadd.f32 %v3861_v27, %v9737_v14  ;;  %v4633_v63 = vpop.f32.mrb[184].mxu1  ;;  %v3863_v20 = vpop.f32.mrb[185].mxu0  ;;  %5931 = vmatpush1.bf16.msra.mxu1 %v8293_v49  ;;  %v8296_v49 = vld [vmem:[#allocation7 + $0x30] ss:$8 sps:$4 sm:$0xff]  }
 0x41c   :  { %v7259_v44 = vadd.f32 %v4633_v63, %v9741_v48  ;;  %v7196_v21 = vadd.f32 %v3863_v20, %v9744_v12  ;;  %v4635_v34 = vpop.f32.mrb[185].mxu1  ;;  %v3865_v47 = vpop.f32.mrb[186].mxu0  ;;  %5402 = vmatprep.mubr.bf16.mxu0 %v4833_v46  ;;  %5932 = vmatprep.subr.bf16.mxu1 %v8298_v5 }
 0x41d   :  { %v7260_v18 = vadd.f32 %v4635_v34, %v9748_v38  ;;  %v7197_v42 = vadd.f32 %v3865_v47, %v9737_v14  ;;  %v4637_v54 = vpop.f32.mrb[186].mxu1  ;;  %v3867_v25 = vpop.f32.mrb[187].mxu0  ;;  %5403 = vmatmul.mubr.bf16.gmra.mrb[244].mxu0 %v4832_v9  ;;  %v4764_v56 = vmax.f32 %v7195_v45, 0.0 }
 0x41e   :  { %v7261_v0 = vadd.f32 %v4637_v54, %v9741_v48  ;;  %v7198_v62 = vadd.f32 %v3867_v25, %v9744_v12  ;;  %v4639_v11 = vpop.f32.mrb[187].mxu1  ;;  %v4766_v39 = vmax.f32 %v7259_v44, 0.0  ;;  %v4765_v17 = vmax.f32 %v7196_v21, 0.0 }
 0x41f   :  { %v4768_v10 = vmax.f32 %v7197_v42, 0.0  ;;  %v7262_v31 = vadd.f32 %v4639_v11, %v9748_v38  ;;  %v4767_v35 = vmax.f32 %v7260_v18, 0.0  ;;  %5933 = vmatpush1.bf16.msra.mxu1 %v8296_v49 }
 0x420   :  { %v4770_v41 = vmax.f32 %v7261_v0, 0.0  ;;  %v4769_v58 = vmax.f32 %v7198_v62, 0.0 }
 0x421   :  { %v4836_v7 = vpack.c.bf16 %v4768_v10, %v4764_v56  ;;  %v4771_v32 = vmax.f32 %v7262_v31, 0.0 }
 0x422   :  { %v9926_v9 = vpack.c.bf16 %v4770_v41, %v4766_v39  ;;  %v4837_v55 = vpack.c.bf16 %v4769_v58, %v4765_v17  ;;  %v3871_v46 = vpop.f32.mrb[188].mxu0 }
 0x423   :  { %v9928_v27 = vpack.c.bf16 %v4771_v32, %v4767_v35  ;;  %v7199_v45 = vadd.f32 %v3871_v46, %v9737_v14  ;;  %v4643_v63 = vpop.f32.mrb[188].mxu1  ;;  %v3873_v20 = vpop.f32.mrb[189].mxu0  ;;  %v8301_v46 = vld [vmem:[#allocation7 + $0x44] ss:$8 sps:$4 sm:$0xff]  }
 0x424   :  { %v7263_v44 = vadd.f32 %v4643_v63, %v9741_v48  ;;  %v7200_v21 = vadd.f32 %v3873_v20, %v9744_v12  ;;  %v4645_v34 = vpop.f32.mrb[189].mxu1  ;;  %v3875_v47 = vpop.f32.mrb[190].mxu0  ;;  %5412 = vmatprep.mubr.bf16.mxu0 %v4837_v55  ;;  %v8299_v55 = vld [vmem:[#allocation7 + $0x40] ss:$8 sps:$4 sm:$0xff]   ;;  %5934 = vmatprep.subr.bf16.mxu1 %v8301_v46  ;;  %v8307_v63 = vld [vmem:[#allocation7 + $0x64] ss:$8 sps:$4 sm:$0xff]  }
 0x425   :  { %v7264_v18 = vadd.f32 %v4645_v34, %v9748_v38  ;;  %v7201_v42 = vadd.f32 %v3875_v47, %v9737_v14  ;;  %v4647_v54 = vpop.f32.mrb[190].mxu1  ;;  %v3877_v25 = vpop.f32.mrb[191].mxu0  ;;  %5413 = vmatmul.mubr.bf16.gmra.mrb[248].mxu0 %v4836_v7  ;;  %v4772_v56 = vmax.f32 %v7199_v45, 0.0  ;;  %5935 = vmatpush1.bf16.msra.mxu1 %v8299_v55  ;;  %v8302_v45 = vld [vmem:[#allocation7 + $0x50] ss:$8 sps:$4 sm:$0xff]  }
 0x426   :  { %v7265_v0 = vadd.f32 %v4647_v54, %v9741_v48  ;;  %v7202_v62 = vadd.f32 %v3877_v25, %v9744_v12  ;;  %v4649_v11 = vpop.f32.mrb[191].mxu1  ;;  %v4774_v39 = vmax.f32 %v7263_v44, 0.0  ;;  %v4773_v17 = vmax.f32 %v7200_v21, 0.0  ;;  %v8305_v20 = vld [vmem:[#allocation7 + $0x60] ss:$8 sps:$4 sm:$0xff]  }
 0x427   :  { %v4776_v10 = vmax.f32 %v7201_v42, 0.0  ;;  %v7266_v31 = vadd.f32 %v4649_v11, %v9748_v38  ;;  %v4775_v35 = vmax.f32 %v7264_v18, 0.0  ;;  %v8304_v38 = vld [vmem:[#allocation7 + $0x54] ss:$8 sps:$4 sm:$0xff]   ;;  %v8308_v21 = vld [vmem:[#allocation7 + $0x70] ss:$8 sps:$4 sm:$0xff]  }
 0x428   :  { %v4778_v41 = vmax.f32 %v7265_v0, 0.0  ;;  %v4777_v58 = vmax.f32 %v7202_v62, 0.0  ;;  %5936 = vmatprep.subr.bf16.mxu1 %v8304_v38  ;;  %v8310_v44 = vld [vmem:[#allocation7 + $0x74] ss:$8 sps:$4 sm:$0xff]   ;;  %v8313_v34 = vld [vmem:[#allocation7 + $0x84] ss:$8 sps:$4 sm:$0xff]  }
 0x429   :  { %v4840_v14 = vpack.c.bf16 %v4776_v10, %v4772_v56  ;;  %v4779_v32 = vmax.f32 %v7266_v31, 0.0  ;;  %5937 = vmatpush1.bf16.msra.mxu1 %v8302_v45  ;;  %v8316_v47 = vld [vmem:[#allocation7 + $0x94] ss:$8 sps:$4 sm:$0xff]   ;;  %v8314_v18 = vld [vmem:[#allocation7 + $0x90] ss:$8 sps:$4 sm:$0xff]   ;;  %v8337_v11 = vld [vmem:[#allocation8 + $0x48] sm:$0xff]  }
 0x42a   :  { %v9938_v7 = vpack.c.bf16 %v4778_v41, %v4774_v39  ;;  %v4841_v48 = vpack.c.bf16 %v4777_v58, %v4773_v17  ;;  %5938 = vmatprep.subr.bf16.mxu1 %v8307_v63  ;;  %v8317_v42 = vld [vmem:[#allocation7 + $0xa0] ss:$8 sps:$4 sm:$0xff]   ;;  %v8320_v54 = vld [vmem:[#allocation7 + $0xb0] ss:$8 sps:$4 sm:$0xff]  }
 0x42b   :  { %v9940_v12 = vpack.c.bf16 %v4779_v32, %v4775_v35  ;;  %v8323_v25 = vld [vmem:[#allocation7 + $0xc0] ss:$8 sps:$4 sm:$0xff]   ;;  %v8326_v0 = vld [vmem:[#allocation7 + $0xd0] ss:$8 sps:$4 sm:$0xff]  }
 0x42c   :  { %5422 = vmatprep.mubr.bf16.mxu0 %v4841_v48  ;;  %v8329_v62 = vld [vmem:[#allocation7 + $0xe0] ss:$8 sps:$4 sm:$0xff]   ;;  %v8339_v58 = vld [vmem:[#allocation8 + $0x50] sm:$0xff]   ;;  %v8341_v38 = vld [vmem:[#allocation8 + $0x58] sm:$0xff]  }
 0x42d   :  { %5423 = vmatmul.mubr.bf16.gmra.mrb[252].mxu0 %v4840_v14  ;;  %5939 = vmatpush1.bf16.msra.mxu1 %v8305_v20  ;;  %v8338_v39 = vld [vmem:[#allocation8 + $0x8] sm:$0xff]  }
 0x42e   :  { %5465 = vmatprep.mubr.bf16.mxu0 %v9760_v26  ;;  %5940 = vmatprep.subr.bf16.mxu1 %v8310_v44  ;;  %v8311_v26 = vld [vmem:[#allocation7 + $0x80] ss:$8 sps:$4 sm:$0xff]  }
 0x431   :  { %5941 = vmatpush1.bf16.msra.mxu1 %v8308_v21 }
 0x432   :  { %5942 = vmatprep.subr.bf16.mxu1 %v8313_v34  ;;  %v8342_v34 = vld [vmem:[#allocation8 + $0x18] sm:$0xff]  }
 0x435   :  { %5466 = vmatmul.mubr.bf16.vlgmr.msra.gmra.mrb[192].mxu0 %v9758_v15  ;;  %5943 = vmatpush1.bf16.msra.mxu1 %v8311_v26  ;;  %v8319_v15 = vld [vmem:[#allocation7 + $0xa4] ss:$8 sps:$4 sm:$0xff]  }
 0x436   :  { %5475 = vmatprep.mubr.bf16.mxu0 %v9772_v13  ;;  %5944 = vmatprep.subr.bf16.mxu1 %v8316_v47  ;;  %v8322_v13 = vld [vmem:[#allocation7 + $0xb4] ss:$8 sps:$4 sm:$0xff]  }
 0x439   :  { %5945 = vmatpush1.bf16.msra.mxu1 %v8314_v18  ;;  %v8343_v18 = vld [vmem:[#allocation8 + $0x60] sm:$0xff]  }
 0x43a   :  { %5946 = vmatprep.subr.bf16.mxu1 %v8319_v15 }
 0x43d   :  { %5476 = vmatmul.mubr.bf16.gmra.mrb[196].mxu0 %v9770_v8  ;;  %5947 = vmatpush1.bf16.msra.mxu1 %v8317_v42  ;;  %v8325_v8 = vld [vmem:[#allocation7 + $0xc4] ss:$8 sps:$4 sm:$0xff]  }
 0x43e   :  { %5485 = vmatprep.mubr.bf16.mxu0 %v9784_v24  ;;  %5948 = vmatprep.subr.bf16.mxu1 %v8322_v13  ;;  %v8328_v24 = vld [vmem:[#allocation7 + $0xd4] ss:$8 sps:$4 sm:$0xff]  }
 0x441   :  { %5949 = vmatpush1.bf16.msra.mxu1 %v8320_v54 }
 0x442   :  { %5950 = vmatprep.subr.bf16.mxu1 %v8325_v8 }
 0x445   :  { %5486 = vmatmul.mubr.bf16.gmra.mrb[200].mxu0 %v9782_v59  ;;  %5951 = vmatpush1.bf16.msra.mxu1 %v8323_v25  ;;  %v8331_v59 = vld [vmem:[#allocation7 + $0xe4] ss:$8 sps:$4 sm:$0xff]  }
 0x446   :  { %5495 = vmatprep.mubr.bf16.mxu0 %v9796_v19  ;;  %5952 = vmatprep.subr.bf16.mxu1 %v8328_v24  ;;  %v8332_v19 = vld [vmem:[#allocation7 + $0xf0] ss:$8 sps:$4 sm:$0xff]   ;;  %v8344_v25 = vld [vmem:[#allocation8 + $0x20] sm:$0xff]  }
 0x449   :  { %5953 = vmatpush1.bf16.msra.mxu1 %v8326_v0 }
 0x44a   :  { %5954 = vmatprep.subr.bf16.mxu1 %v8331_v59  ;;  %v8345_v59 = vld [vmem:[#allocation8 + $0x68] sm:$0xff]  }
 0x44d   :  { %5496 = vmatmul.mubr.bf16.gmra.mrb[204].mxu0 %v9794_v43  ;;  %5955 = vmatpush1.bf16.msra.mxu1 %v8329_v62  ;;  %v8334_v43 = vld [vmem:[#allocation7 + $0xf4] ss:$8 sps:$4 sm:$0xff]  }
 0x44e   :  { %5505 = vmatprep.mubr.bf16.mxu0 %v9808_v30  ;;  %5956 = vmatprep.subr.bf16.mxu1 %v8334_v43  ;;  %v4908_v30 = vld [vmem:[%s10178_s6] sm:$0x3] }
 0x451   :  { %5957 = vmatpush1.bf16.msra.mxu1 %v8332_v19 }
 0x455   :  { %5506 = vmatmul.mubr.bf16.gmra.mrb[208].mxu0 %v9806_v60  ;;  %v8335_v60 = vld [vmem:[#allocation8 + $0x40] sm:$0xff]  }
 0x456   :  { %5515 = vmatprep.mubr.bf16.mxu0 %v9820_v3  ;;  %7027 = vmatprep.subr.bf16.mxu1 %v8335_v60  ;;  %v9981_v3 = vrot.slane %v4908_v30, %v10288_v53 }
 0x45d   :  { %5516 = vmatmul.mubr.bf16.gmra.mrb[212].mxu0 %v9818_v4  ;;  %v9978_v4 = vrot.slane %v4908_v30, %v10285_v52 }
 0x45e   :  { %5525 = vmatprep.mubr.bf16.mxu0 %v9832_v57 }
 0x465   :  { %5526 = vmatmul.mubr.bf16.gmra.mrb[216].mxu0 %v9830_v37 }
 0x466   :  { %5535 = vmatprep.mubr.bf16.mxu0 %v9844_v51 }
 0x46d   :  { %5536 = vmatmul.mubr.bf16.gmra.mrb[220].mxu0 %v9842_v36 }
 0x46e   :  { %5545 = vmatprep.mubr.bf16.mxu0 %v9856_v1 }
 0x475   :  { %5546 = vmatmul.mubr.bf16.gmra.mrb[224].mxu0 %v9854_v22 }
 0x476   :  { %5555 = vmatprep.mubr.bf16.mxu0 %v9868_v23 }
 0x47d   :  { %5556 = vmatmul.mubr.bf16.gmra.mrb[228].mxu0 %v9866_v50 }
 0x47e   :  { %5565 = vmatprep.mubr.bf16.mxu0 %v9880_v40 }
 0x485   :  { %5566 = vmatmul.mubr.bf16.gmra.mrb[232].mxu0 %v9878_v61 }
 0x486   :  { %5575 = vmatprep.mubr.bf16.mxu0 %v9892_v28 }
 0x48d   :  { %5576 = vmatmul.mubr.bf16.gmra.mrb[236].mxu0 %v9890_v16 }
 0x48e   :  { %5585 = vmatprep.mubr.bf16.mxu0 %v9904_v6 }
 0x495   :  { %5586 = vmatmul.mubr.bf16.gmra.mrb[240].mxu0 %v9902_v33 }
 0x496   :  { %5595 = vmatprep.mubr.bf16.mxu0 %v9916_v29  ;;  %v8336_v29 = vld [vmem:[#allocation8] sm:$0xff]  }
 0x49d   :  { %5596 = vmatmul.mubr.bf16.gmra.mrb[244].mxu0 %v9914_v2 }
 0x49e   :  { %5605 = vmatprep.mubr.bf16.mxu0 %v9928_v27 }
 0x4a5   :  { %5606 = vmatmul.mubr.bf16.gmra.mrb[248].mxu0 %v9926_v9 }
 0x4a6   :  { %5615 = vmatprep.mubr.bf16.mxu0 %v9940_v12  ;;  %v8340_v12 = vld [vmem:[#allocation8 + $0x10] sm:$0xff]  }
 0x4ad   :  { %5616 = vmatmul.mubr.bf16.gmra.mrb[252].mxu0 %v9938_v7 }
 0x508   :  { %v5467_v37 = vpop.f32.mrb[192].mxu0 }
 0x509   :  { %v7267_v57 = vadd.f32 %v5467_v37, %v9978_v4  ;;  %v5469_v36 = vpop.f32.mrb[193].mxu0  ;;  %v8346_v37 = vld [vmem:[#allocation8 + $0x28] sm:$0xff]  }
 0x50a   :  { %v7268_v51 = vadd.f32 %v5469_v36, %v9981_v3  ;;  %v5471_v22 = vpop.f32.mrb[194].mxu0 }
 0x50b   :  { %v7269_v1 = vadd.f32 %v5471_v22, %v9978_v4  ;;  %v5473_v50 = vpop.f32.mrb[195].mxu0  ;;  %v5626_v61 = vmax.f32 %v7267_v57, 0.0 }
 0x50c   :  { %v7270_v23 = vadd.f32 %v5473_v50, %v9981_v3  ;;  %v5627_v16 = vmax.f32 %v7268_v51, 0.0  ;;  %v8347_v51 = vld [vmem:[#allocation8 + $0x70] sm:$0xff]  }
 0x50d   :  { %v5628_v40 = vmax.f32 %v7269_v1, 0.0 }
 0x50e   :  { %v5629_v28 = vmax.f32 %v7270_v23, 0.0 }
 0x50f   :  { %v5690_v33 = vpack.c.bf16 %v5628_v40, %v5626_v61  ;;  %v8348_v40 = vld [vmem:[#allocation8 + $0x30] sm:$0xff]  }
 0x510   :  { %v5691_v6 = vpack.c.bf16 %v5629_v28, %v5627_v16  ;;  %v5477_v2 = vpop.f32.mrb[196].mxu0 }
 0x511   :  { %v7271_v9 = vadd.f32 %v5477_v2, %v9978_v4  ;;  %v5479_v27 = vpop.f32.mrb[197].mxu0 }
 0x512   :  { %v7272_v49 = vadd.f32 %v5479_v27, %v9981_v3  ;;  %v5481_v56 = vpop.f32.mrb[198].mxu0  ;;  %5958 = vmatprep.mubr.bf16.mxu1 %v5691_v6 }
 0x513   :  { %v7273_v10 = vadd.f32 %v5481_v56, %v9978_v4  ;;  %v5483_v31 = vpop.f32.mrb[199].mxu0  ;;  %5959 = vmatmul.mubr.bf16.vlgmr.msra.gmra.mrb[192].mxu1 %v5690_v33  ;;  %v5630_v17 = vmax.f32 %v7271_v9, 0.0  ;;  %v8349_v33 = vld [vmem:[#allocation8 + $0x78] sm:$0xff]  }
 0x514   :  { %v7274_v5 = vadd.f32 %v5483_v31, %v9981_v3  ;;  %7028 = vmatpush3.bf16.msra.mxu1 %v8336_v29  ;;  %v5631_v35 = vmax.f32 %v7272_v49, 0.0 }
 0x515   :  { %v5632_v41 = vmax.f32 %v7273_v10, 0.0  ;;  %7029 = vmatprep.subr.bf16.mxu1 %v8337_v11  ;;  %v8350_v11 = vld [vmem:[#allocation8 + $0x38] sm:$0xff]  }
 0x516   :  { %v5633_v14 = vmax.f32 %v7274_v5, 0.0 }
 0x517   :  { %v5692_v32 = vpack.c.bf16 %v5632_v41, %v5630_v17 }
 0x518   :  { %v5693_v7 = vpack.c.bf16 %v5633_v14, %v5631_v35  ;;  %v5487_v48 = vpop.f32.mrb[200].mxu0  ;;  %7030 = vmatpush3.bf16.msra.mxu1 %v8338_v39 }
 0x519   :  { %v7275_v55 = vadd.f32 %v5487_v48, %v9978_v4  ;;  %v5489_v46 = vpop.f32.mrb[201].mxu0  ;;  %7031 = vmatprep.subr.bf16.mxu1 %v8339_v58 }
 0x51a   :  { %v7276_v45 = vadd.f32 %v5489_v46, %v9981_v3  ;;  %v5491_v63 = vpop.f32.mrb[202].mxu0  ;;  %5968 = vmatprep.mubr.bf16.mxu1 %v5693_v7 }
 0x51b   :  { %v7277_v20 = vadd.f32 %v5491_v63, %v9978_v4  ;;  %v5493_v44 = vpop.f32.mrb[203].mxu0  ;;  %5969 = vmatmul.mubr.bf16.gmra.mrb[196].mxu1 %v5692_v32  ;;  %v5634_v26 = vmax.f32 %v7275_v55, 0.0 }
 0x51c   :  { %v7278_v21 = vadd.f32 %v5493_v44, %v9981_v3  ;;  %7032 = vmatpush3.bf16.msra.mxu1 %v8340_v12  ;;  %v5635_v15 = vmax.f32 %v7276_v45, 0.0 }
 0x51d   :  { %v5636_v47 = vmax.f32 %v7277_v20, 0.0  ;;  %7033 = vmatprep.subr.bf16.mxu1 %v8341_v38 }
 0x51e   :  { %v5637_v42 = vmax.f32 %v7278_v21, 0.0 }
 0x51f   :  { %v5694_v13 = vpack.c.bf16 %v5636_v47, %v5634_v26 }
 0x520   :  { %v5695_v54 = vpack.c.bf16 %v5637_v42, %v5635_v15  ;;  %v5497_v8 = vpop.f32.mrb[204].mxu0  ;;  %7034 = vmatpush3.bf16.msra.mxu1 %v8342_v34 }
 0x521   :  { %v7279_v24 = vadd.f32 %v5497_v8, %v9978_v4  ;;  %v5499_v0 = vpop.f32.mrb[205].mxu0  ;;  %7035 = vmatprep.subr.bf16.mxu1 %v8343_v18 }
 0x522   :  { %v7280_v62 = vadd.f32 %v5499_v0, %v9981_v3  ;;  %v5501_v43 = vpop.f32.mrb[206].mxu0  ;;  %5978 = vmatprep.mubr.bf16.mxu1 %v5695_v54 }
 0x523   :  { %v7281_v19 = vadd.f32 %v5501_v43, %v9978_v4  ;;  %v5503_v60 = vpop.f32.mrb[207].mxu0  ;;  %5979 = vmatmul.mubr.bf16.gmra.mrb[200].mxu1 %v5694_v13  ;;  %v5638_v57 = vmax.f32 %v7279_v24, 0.0 }
 0x524   :  { %v7282_v30 = vadd.f32 %v5503_v60, %v9981_v3  ;;  %7036 = vmatpush3.bf16.msra.mxu1 %v8344_v25  ;;  %v5639_v22 = vmax.f32 %v7280_v62, 0.0 }
 0x525   :  { %v5640_v36 = vmax.f32 %v7281_v19, 0.0  ;;  %7037 = vmatprep.subr.bf16.mxu1 %v8345_v59 }
 0x526   :  { %v5641_v1 = vmax.f32 %v7282_v30, 0.0 }
 0x527   :  { %v5696_v50 = vpack.c.bf16 %v5640_v36, %v5638_v57 }
 0x528   :  { %v5697_v23 = vpack.c.bf16 %v5641_v1, %v5639_v22  ;;  %v5507_v61 = vpop.f32.mrb[208].mxu0  ;;  %7038 = vmatpush3.bf16.msra.mxu1 %v8346_v37 }
 0x529   :  { %v7283_v16 = vadd.f32 %v5507_v61, %v9978_v4  ;;  %v5509_v28 = vpop.f32.mrb[209].mxu0  ;;  %7039 = vmatprep.subr.bf16.mxu1 %v8347_v51 }
 0x52a   :  { %v7284_v6 = vadd.f32 %v5509_v28, %v9981_v3  ;;  %v5511_v2 = vpop.f32.mrb[210].mxu0  ;;  %5988 = vmatprep.mubr.bf16.mxu1 %v5697_v23 }
 0x52b   :  { %v7285_v29 = vadd.f32 %v5511_v2, %v9978_v4  ;;  %v5513_v9 = vpop.f32.mrb[211].mxu0  ;;  %5989 = vmatmul.mubr.bf16.gmra.mrb[204].mxu1 %v5696_v50  ;;  %v5642_v49 = vmax.f32 %v7283_v16, 0.0 }
 0x52c   :  { %v7286_v27 = vadd.f32 %v5513_v9, %v9981_v3  ;;  %7040 = vmatpush3.bf16.msra.mxu1 %v8348_v40  ;;  %v5643_v10 = vmax.f32 %v7284_v6, 0.0 }
 0x52d   :  { %v5644_v56 = vmax.f32 %v7285_v29, 0.0  ;;  %7041 = vmatprep.subr.bf16.mxu1 %v8349_v33 }
 0x52e   :  { %v5645_v31 = vmax.f32 %v7286_v27, 0.0 }
 0x52f   :  { %v5698_v5 = vpack.c.bf16 %v5644_v56, %v5642_v49 }
 0x530   :  { %v5699_v39 = vpack.c.bf16 %v5645_v31, %v5643_v10  ;;  %v5517_v17 = vpop.f32.mrb[212].mxu0  ;;  %7042 = vmatpush3.bf16.msra.mxu1 %v8350_v11 }
 0x531   :  { %v7287_v41 = vadd.f32 %v5517_v17, %v9978_v4  ;;  %v5519_v58 = vpop.f32.mrb[213].mxu0 }
 0x532   :  { %v7288_v35 = vadd.f32 %v5519_v58, %v9981_v3  ;;  %v5521_v14 = vpop.f32.mrb[214].mxu0  ;;  %5998 = vmatprep.mubr.bf16.mxu1 %v5699_v39 }
 0x533   :  { %v7289_v32 = vadd.f32 %v5521_v14, %v9978_v4  ;;  %v5523_v7 = vpop.f32.mrb[215].mxu0  ;;  %5999 = vmatmul.mubr.bf16.gmra.mrb[208].mxu1 %v5698_v5  ;;  %v5646_v12 = vmax.f32 %v7287_v41, 0.0 }
 0x534   :  { %v7290_v48 = vadd.f32 %v5523_v7, %v9981_v3  ;;  %v5647_v46 = vmax.f32 %v7288_v35, 0.0 }
 0x535   :  { %v5648_v55 = vmax.f32 %v7289_v32, 0.0 }
 0x536   :  { %v5649_v38 = vmax.f32 %v7290_v48, 0.0 }
 0x537   :  { %v5700_v45 = vpack.c.bf16 %v5648_v55, %v5646_v12 }
 0x538   :  { %v5701_v63 = vpack.c.bf16 %v5649_v38, %v5647_v46  ;;  %v5527_v20 = vpop.f32.mrb[216].mxu0 }
 0x539   :  { %v7291_v44 = vadd.f32 %v5527_v20, %v9978_v4  ;;  %v5529_v21 = vpop.f32.mrb[217].mxu0 }
 0x53a   :  { %v7292_v34 = vadd.f32 %v5529_v21, %v9981_v3  ;;  %v5531_v26 = vpop.f32.mrb[218].mxu0  ;;  %6008 = vmatprep.mubr.bf16.mxu1 %v5701_v63 }
 0x53b   :  { %v7293_v47 = vadd.f32 %v5531_v26, %v9978_v4  ;;  %v5533_v18 = vpop.f32.mrb[219].mxu0  ;;  %6009 = vmatmul.mubr.bf16.gmra.mrb[212].mxu1 %v5700_v45  ;;  %v5650_v42 = vmax.f32 %v7291_v44, 0.0 }
 0x53c   :  { %v7294_v15 = vadd.f32 %v5533_v18, %v9981_v3  ;;  %v5651_v54 = vmax.f32 %v7292_v34, 0.0 }
 0x53d   :  { %v5652_v13 = vmax.f32 %v7293_v47, 0.0 }
 0x53e   :  { %v5653_v8 = vmax.f32 %v7294_v15, 0.0 }
 0x53f   :  { %v5702_v25 = vpack.c.bf16 %v5652_v13, %v5650_v42 }
 0x540   :  { %v5703_v24 = vpack.c.bf16 %v5653_v8, %v5651_v54  ;;  %v5537_v0 = vpop.f32.mrb[220].mxu0 }
 0x541   :  { %v7295_v59 = vadd.f32 %v5537_v0, %v9978_v4  ;;  %v5539_v62 = vpop.f32.mrb[221].mxu0 }
 0x542   :  { %v7296_v43 = vadd.f32 %v5539_v62, %v9981_v3  ;;  %v5541_v19 = vpop.f32.mrb[222].mxu0  ;;  %6018 = vmatprep.mubr.bf16.mxu1 %v5703_v24 }
 0x543   :  { %v7297_v60 = vadd.f32 %v5541_v19, %v9978_v4  ;;  %v5543_v30 = vpop.f32.mrb[223].mxu0  ;;  %6019 = vmatmul.mubr.bf16.gmra.mrb[216].mxu1 %v5702_v25  ;;  %v5654_v57 = vmax.f32 %v7295_v59, 0.0 }
 0x544   :  { %v7298_v37 = vadd.f32 %v5543_v30, %v9981_v3  ;;  %v5655_v51 = vmax.f32 %v7296_v43, 0.0 }
 0x545   :  { %v5656_v36 = vmax.f32 %v7297_v60, 0.0 }
 0x546   :  { %v5657_v22 = vmax.f32 %v7298_v37, 0.0 }
 0x547   :  { %v5704_v1 = vpack.c.bf16 %v5656_v36, %v5654_v57 }
 0x548   :  { %v5705_v50 = vpack.c.bf16 %v5657_v22, %v5655_v51  ;;  %v5547_v23 = vpop.f32.mrb[224].mxu0 }
 0x549   :  { %v7299_v61 = vadd.f32 %v5547_v23, %v9978_v4  ;;  %v5549_v40 = vpop.f32.mrb[225].mxu0 }
 0x54a   :  { %v7300_v16 = vadd.f32 %v5549_v40, %v9981_v3  ;;  %v5551_v28 = vpop.f32.mrb[226].mxu0  ;;  %6028 = vmatprep.mubr.bf16.mxu1 %v5705_v50 }
 0x54b   :  { %v7301_v33 = vadd.f32 %v5551_v28, %v9978_v4  ;;  %v5553_v6 = vpop.f32.mrb[227].mxu0  ;;  %6029 = vmatmul.mubr.bf16.gmra.mrb[220].mxu1 %v5704_v1  ;;  %v5658_v29 = vmax.f32 %v7299_v61, 0.0 }
 0x54c   :  { %v7302_v2 = vadd.f32 %v5553_v6, %v9981_v3  ;;  %v5659_v27 = vmax.f32 %v7300_v16, 0.0 }
 0x54d   :  { %v5660_v9 = vmax.f32 %v7301_v33, 0.0 }
 0x54e   :  { %v5661_v11 = vmax.f32 %v7302_v2, 0.0 }
 0x54f   :  { %v5706_v49 = vpack.c.bf16 %v5660_v9, %v5658_v29 }
 0x550   :  { %v5707_v56 = vpack.c.bf16 %v5661_v11, %v5659_v27  ;;  %v5557_v10 = vpop.f32.mrb[228].mxu0 }
 0x551   :  { %v7303_v31 = vadd.f32 %v5557_v10, %v9978_v4  ;;  %v5559_v5 = vpop.f32.mrb[229].mxu0 }
 0x552   :  { %v7304_v39 = vadd.f32 %v5559_v5, %v9981_v3  ;;  %v5561_v17 = vpop.f32.mrb[230].mxu0  ;;  %6038 = vmatprep.mubr.bf16.mxu1 %v5707_v56 }
 0x553   :  { %v7305_v41 = vadd.f32 %v5561_v17, %v9978_v4  ;;  %v5563_v58 = vpop.f32.mrb[231].mxu0  ;;  %6039 = vmatmul.mubr.bf16.gmra.mrb[224].mxu1 %v5706_v49  ;;  %v5662_v14 = vmax.f32 %v7303_v31, 0.0 }
 0x554   :  { %v7306_v35 = vadd.f32 %v5563_v58, %v9981_v3  ;;  %v5663_v7 = vmax.f32 %v7304_v39, 0.0 }
 0x555   :  { %v5664_v32 = vmax.f32 %v7305_v41, 0.0 }
 0x556   :  { %v5665_v48 = vmax.f32 %v7306_v35, 0.0 }
 0x557   :  { %v5708_v12 = vpack.c.bf16 %v5664_v32, %v5662_v14 }
 0x558   :  { %v5709_v55 = vpack.c.bf16 %v5665_v48, %v5663_v7  ;;  %v5567_v46 = vpop.f32.mrb[232].mxu0 }
 0x559   :  { %v7307_v38 = vadd.f32 %v5567_v46, %v9978_v4  ;;  %v5569_v45 = vpop.f32.mrb[233].mxu0 }
 0x55a   :  { %v7308_v63 = vadd.f32 %v5569_v45, %v9981_v3  ;;  %v5571_v20 = vpop.f32.mrb[234].mxu0  ;;  %6048 = vmatprep.mubr.bf16.mxu1 %v5709_v55 }
 0x55b   :  { %v7309_v44 = vadd.f32 %v5571_v20, %v9978_v4  ;;  %v5573_v21 = vpop.f32.mrb[235].mxu0  ;;  %6049 = vmatmul.mubr.bf16.gmra.mrb[228].mxu1 %v5708_v12  ;;  %v5666_v26 = vmax.f32 %v7307_v38, 0.0 }
 0x55c   :  { %v7310_v34 = vadd.f32 %v5573_v21, %v9981_v3  ;;  %v5667_v18 = vmax.f32 %v7308_v63, 0.0 }
 0x55d   :  { %v5668_v47 = vmax.f32 %v7309_v44, 0.0 }
 0x55e   :  { %v5669_v15 = vmax.f32 %v7310_v34, 0.0 }
 0x55f   :  { %v5710_v42 = vpack.c.bf16 %v5668_v47, %v5666_v26 }
 0x560   :  { %v5711_v13 = vpack.c.bf16 %v5669_v15, %v5667_v18  ;;  %v5577_v54 = vpop.f32.mrb[236].mxu0 }
 0x561   :  { %v7311_v8 = vadd.f32 %v5577_v54, %v9978_v4  ;;  %v5579_v25 = vpop.f32.mrb[237].mxu0 }
 0x562   :  { %v7312_v24 = vadd.f32 %v5579_v25, %v9981_v3  ;;  %v5581_v0 = vpop.f32.mrb[238].mxu0  ;;  %6058 = vmatprep.mubr.bf16.mxu1 %v5711_v13 }
 0x563   :  { %v7313_v59 = vadd.f32 %v5581_v0, %v9978_v4  ;;  %v5583_v62 = vpop.f32.mrb[239].mxu0  ;;  %6059 = vmatmul.mubr.bf16.gmra.mrb[232].mxu1 %v5710_v42  ;;  %v5670_v19 = vmax.f32 %v7311_v8, 0.0 }
 0x564   :  { %v7314_v43 = vadd.f32 %v5583_v62, %v9981_v3  ;;  %v5671_v30 = vmax.f32 %v7312_v24, 0.0 }
 0x565   :  { %v5672_v60 = vmax.f32 %v7313_v59, 0.0 }
 0x566   :  { %v5673_v37 = vmax.f32 %v7314_v43, 0.0 }
 0x567   :  { %v5712_v57 = vpack.c.bf16 %v5672_v60, %v5670_v19 }
 0x568   :  { %v5713_v36 = vpack.c.bf16 %v5673_v37, %v5671_v30  ;;  %v5587_v51 = vpop.f32.mrb[240].mxu0  ;;  %v5754_v30 = vld [vmem:[%s10180_s8] sm:$0x3] }
 0x569   :  { %v7315_v22 = vadd.f32 %v5587_v51, %v9978_v4  ;;  %v5589_v1 = vpop.f32.mrb[241].mxu0  ;;  %v10051_v37 = vrot.slane %v5754_v30, %v10285_v52 }
 0x56a   :  { %v7316_v50 = vadd.f32 %v5589_v1, %v9981_v3  ;;  %v5591_v23 = vpop.f32.mrb[242].mxu0  ;;  %6068 = vmatprep.mubr.bf16.mxu1 %v5713_v36 }
 0x56b   :  { %v7317_v61 = vadd.f32 %v5591_v23, %v9978_v4  ;;  %v5593_v40 = vpop.f32.mrb[243].mxu0  ;;  %6069 = vmatmul.mubr.bf16.gmra.mrb[236].mxu1 %v5712_v57  ;;  %v5674_v28 = vmax.f32 %v7315_v22, 0.0 }
 0x56c   :  { %v7318_v16 = vadd.f32 %v5593_v40, %v9981_v3  ;;  %v5675_v6 = vmax.f32 %v7316_v50, 0.0 }
 0x56d   :  { %v5676_v33 = vmax.f32 %v7317_v61, 0.0 }
 0x56e   :  { %v5677_v2 = vmax.f32 %v7318_v16, 0.0 }
 0x56f   :  { %v5714_v29 = vpack.c.bf16 %v5676_v33, %v5674_v28 }
 0x570   :  { %v5715_v9 = vpack.c.bf16 %v5677_v2, %v5675_v6  ;;  %v5597_v27 = vpop.f32.mrb[244].mxu0 }
 0x571   :  { %v7319_v11 = vadd.f32 %v5597_v27, %v9978_v4  ;;  %v5599_v49 = vpop.f32.mrb[245].mxu0 }
 0x572   :  { %v7320_v56 = vadd.f32 %v5599_v49, %v9981_v3  ;;  %v5601_v10 = vpop.f32.mrb[246].mxu0  ;;  %6078 = vmatprep.mubr.bf16.mxu1 %v5715_v9 }
 0x573   :  { %v7321_v31 = vadd.f32 %v5601_v10, %v9978_v4  ;;  %v5603_v5 = vpop.f32.mrb[247].mxu0  ;;  %6079 = vmatmul.mubr.bf16.gmra.mrb[240].mxu1 %v5714_v29  ;;  %v5678_v17 = vmax.f32 %v7319_v11, 0.0 }
 0x574   :  { %v7322_v39 = vadd.f32 %v5603_v5, %v9981_v3  ;;  %v5679_v58 = vmax.f32 %v7320_v56, 0.0 }
 0x575   :  { %v5680_v41 = vmax.f32 %v7321_v31, 0.0 }
 0x576   :  { %v5681_v35 = vmax.f32 %v7322_v39, 0.0 }
 0x577   :  { %v5716_v14 = vpack.c.bf16 %v5680_v41, %v5678_v17 }
 0x578   :  { %v5717_v32 = vpack.c.bf16 %v5681_v35, %v5679_v58  ;;  %v5607_v7 = vpop.f32.mrb[248].mxu0 }
 0x579   :  { %v7323_v48 = vadd.f32 %v5607_v7, %v9978_v4  ;;  %v5609_v12 = vpop.f32.mrb[249].mxu0 }
 0x57a   :  { %v7324_v55 = vadd.f32 %v5609_v12, %v9981_v3  ;;  %v5611_v46 = vpop.f32.mrb[250].mxu0  ;;  %6088 = vmatprep.mubr.bf16.mxu1 %v5717_v32 }
 0x57b   :  { %v7325_v38 = vadd.f32 %v5611_v46, %v9978_v4  ;;  %v5613_v45 = vpop.f32.mrb[251].mxu0  ;;  %6089 = vmatmul.mubr.bf16.gmra.mrb[244].mxu1 %v5716_v14  ;;  %v5682_v20 = vmax.f32 %v7323_v48, 0.0 }
 0x57c   :  { %v7326_v63 = vadd.f32 %v5613_v45, %v9981_v3  ;;  %v5683_v21 = vmax.f32 %v7324_v55, 0.0 }
 0x57d   :  { %v5684_v44 = vmax.f32 %v7325_v38, 0.0 }
 0x57e   :  { %v5685_v34 = vmax.f32 %v7326_v63, 0.0 }
 0x57f   :  { %v5718_v26 = vpack.c.bf16 %v5684_v44, %v5682_v20 }
 0x580   :  { %v5719_v47 = vpack.c.bf16 %v5685_v34, %v5683_v21  ;;  %v5617_v18 = vpop.f32.mrb[252].mxu0 }
 0x581   :  { %v7327_v15 = vadd.f32 %v5617_v18, %v9978_v4  ;;  %v5619_v42 = vpop.f32.mrb[253].mxu0 }
 0x582   :  { %v7328_v13 = vadd.f32 %v5619_v42, %v9981_v3  ;;  %v5621_v54 = vpop.f32.mrb[254].mxu0  ;;  %6098 = vmatprep.mubr.bf16.mxu1 %v5719_v47 }
 0x583   :  { %v7329_v8 = vadd.f32 %v5621_v54, %v9978_v4  ;;  %v5623_v25 = vpop.f32.mrb[255].mxu0  ;;  %6099 = vmatmul.mubr.bf16.gmra.mrb[248].mxu1 %v5718_v26  ;;  %v5686_v0 = vmax.f32 %v7327_v15, 0.0  ;;  %v10054_v4 = vrot.slane %v5754_v30, %v10288_v53 }
 0x584   :  { %v7330_v24 = vadd.f32 %v5623_v25, %v9981_v3  ;;  %v5687_v62 = vmax.f32 %v7328_v13, 0.0 }
 0x585   :  { %v5688_v59 = vmax.f32 %v7329_v8, 0.0 }
 0x586   :  { %v5689_v43 = vmax.f32 %v7330_v24, 0.0 }
 0x587   :  { %v5720_v19 = vpack.c.bf16 %v5688_v59, %v5686_v0 }
 0x588   :  { %v5721_v60 = vpack.c.bf16 %v5689_v43, %v5687_v62 }
 0x58a   :  { %6108 = vmatprep.mubr.bf16.mxu1 %v5721_v60 }
 0x58b   :  { %6109 = vmatmul.mubr.bf16.gmra.mrb[252].mxu1 %v5720_v19 }
 0x5e6   :  { %v5960_v57 = vpop.f32.mrb[192].mxu1 }
 0x5e7   :  { %v5961_v3 = vadd.f32 %v5960_v57, %v10051_v37  ;;  %v5962_v36 = vpop.f32.mrb[193].mxu1 }
 0x5e8   :  { %v5963_v51 = vadd.f32 %v5962_v36, %v10054_v4  ;;  %v5964_v22 = vpop.f32.mrb[194].mxu1 }
 0x5e9   :  { %v5965_v1 = vadd.f32 %v5964_v22, %v10051_v37  ;;  %v5966_v50 = vpop.f32.mrb[195].mxu1  ;;  %v6119_v61 = vmax.f32 %v5961_v3, 0.0 }
 0x5ea   :  { %v5967_v23 = vadd.f32 %v5966_v50, %v10054_v4  ;;  %v6120_v16 = vmax.f32 %v5963_v51, 0.0 }
 0x5eb   :  { %v6121_v40 = vmax.f32 %v5965_v1, 0.0 }
 0x5ec   :  { %v6122_v52 = vmax.f32 %v5967_v23, 0.0 }
 0x5ed   :  { %v6183_v28 = vpack.c.bf16 %v6121_v40, %v6119_v61 }
 0x5ee   :  { %v6184_v33 = vpack.c.bf16 %v6122_v52, %v6120_v16  ;;  %v5970_v53 = vpop.f32.mrb[196].mxu1 }
 0x5ef   :  { %v5971_v6 = vadd.f32 %v5970_v53, %v10051_v37  ;;  %v5972_v2 = vpop.f32.mrb[197].mxu1 }
 0x5f0   :  { %v5973_v29 = vadd.f32 %v5972_v2, %v10054_v4  ;;  %v5974_v9 = vpop.f32.mrb[198].mxu1  ;;  %6382 = vmatprep.mubr.bf16.mxu1 %v6184_v33 }
 0x5f1   :  { %v5975_v27 = vadd.f32 %v5974_v9, %v10051_v37  ;;  %v5976_v11 = vpop.f32.mrb[199].mxu1  ;;  %6383 = vmatmul.mubr.bf16.vlgmr.msra.gmra.mrb[0].mxu1 %v6183_v28  ;;  %v6123_v56 = vmax.f32 %v5971_v6, 0.0 }
 0x5f2   :  { %v5977_v49 = vadd.f32 %v5976_v11, %v10054_v4  ;;  %v6124_v31 = vmax.f32 %v5973_v29, 0.0 }
 0x5f3   :  { %v6125_v10 = vmax.f32 %v5975_v27, 0.0 }
 0x5f4   :  { %v6126_v5 = vmax.f32 %v5977_v49, 0.0 }
 0x5f5   :  { %v6185_v39 = vpack.c.bf16 %v6125_v10, %v6123_v56 }
 0x5f6   :  { %v6186_v17 = vpack.c.bf16 %v6126_v5, %v6124_v31  ;;  %v5980_v41 = vpop.f32.mrb[200].mxu1 }
 0x5f7   :  { %v5981_v58 = vadd.f32 %v5980_v41, %v10051_v37  ;;  %v5982_v35 = vpop.f32.mrb[201].mxu1 }
 0x5f8   :  { %v5983_v14 = vadd.f32 %v5982_v35, %v10054_v4  ;;  %v5984_v32 = vpop.f32.mrb[202].mxu1  ;;  %6390 = vmatprep.mubr.bf16.mxu1 %v6186_v17 }
 0x5f9   :  { %v5985_v7 = vadd.f32 %v5984_v32, %v10051_v37  ;;  %v5986_v48 = vpop.f32.mrb[203].mxu1  ;;  %6391 = vmatmul.mubr.bf16.gmra.mrb[4].mxu1 %v6185_v39  ;;  %v6127_v55 = vmax.f32 %v5981_v58, 0.0 }
 0x5fa   :  { %v5987_v12 = vadd.f32 %v5986_v48, %v10054_v4  ;;  %v6128_v38 = vmax.f32 %v5983_v14, 0.0 }
 0x5fb   :  { %v6129_v46 = vmax.f32 %v5985_v7, 0.0 }
 0x5fc   :  { %v6130_v45 = vmax.f32 %v5987_v12, 0.0 }
 0x5fd   :  { %v6187_v63 = vpack.c.bf16 %v6129_v46, %v6127_v55 }
 0x5fe   :  { %v6188_v20 = vpack.c.bf16 %v6130_v45, %v6128_v38  ;;  %v5990_v44 = vpop.f32.mrb[204].mxu1 }
 0x5ff   :  { %v5991_v21 = vadd.f32 %v5990_v44, %v10051_v37  ;;  %v5992_v34 = vpop.f32.mrb[205].mxu1 }
 0x600   :  { %v5993_v26 = vadd.f32 %v5992_v34, %v10054_v4  ;;  %v5994_v47 = vpop.f32.mrb[206].mxu1  ;;  %6398 = vmatprep.mubr.bf16.mxu1 %v6188_v20 }
 0x601   :  { %v5995_v18 = vadd.f32 %v5994_v47, %v10051_v37  ;;  %v5996_v15 = vpop.f32.mrb[207].mxu1  ;;  %6399 = vmatmul.mubr.bf16.gmra.mrb[8].mxu1 %v6187_v63  ;;  %v6131_v13 = vmax.f32 %v5991_v21, 0.0 }
 0x602   :  { %v5997_v42 = vadd.f32 %v5996_v15, %v10054_v4  ;;  %v6132_v8 = vmax.f32 %v5993_v26, 0.0 }
 0x603   :  { %v6133_v54 = vmax.f32 %v5995_v18, 0.0 }
 0x604   :  { %v6134_v25 = vmax.f32 %v5997_v42, 0.0 }
 0x605   :  { %v6189_v24 = vpack.c.bf16 %v6133_v54, %v6131_v13 }
 0x606   :  { %v6190_v0 = vpack.c.bf16 %v6134_v25, %v6132_v8  ;;  %v6000_v59 = vpop.f32.mrb[208].mxu1 }
 0x607   :  { %v6001_v62 = vadd.f32 %v6000_v59, %v10051_v37  ;;  %v6002_v43 = vpop.f32.mrb[209].mxu1 }
 0x608   :  { %v6003_v19 = vadd.f32 %v6002_v43, %v10054_v4  ;;  %v6004_v60 = vpop.f32.mrb[210].mxu1  ;;  %6406 = vmatprep.mubr.bf16.mxu1 %v6190_v0 }
 0x609   :  { %v6005_v30 = vadd.f32 %v6004_v60, %v10051_v37  ;;  %v6006_v57 = vpop.f32.mrb[211].mxu1  ;;  %6407 = vmatmul.mubr.bf16.gmra.mrb[12].mxu1 %v6189_v24  ;;  %v6135_v36 = vmax.f32 %v6001_v62, 0.0 }
 0x60a   :  { %v6007_v3 = vadd.f32 %v6006_v57, %v10054_v4  ;;  %v6136_v22 = vmax.f32 %v6003_v19, 0.0 }
 0x60b   :  { %v6137_v51 = vmax.f32 %v6005_v30, 0.0 }
 0x60c   :  { %v6138_v1 = vmax.f32 %v6007_v3, 0.0 }
 0x60d   :  { %v6191_v50 = vpack.c.bf16 %v6137_v51, %v6135_v36 }
 0x60e   :  { %v6192_v23 = vpack.c.bf16 %v6138_v1, %v6136_v22  ;;  %v6010_v61 = vpop.f32.mrb[212].mxu1 }
 0x60f   :  { %v6011_v40 = vadd.f32 %v6010_v61, %v10051_v37  ;;  %v6012_v16 = vpop.f32.mrb[213].mxu1 }
 0x610   :  { %v6013_v52 = vadd.f32 %v6012_v16, %v10054_v4  ;;  %v6014_v28 = vpop.f32.mrb[214].mxu1  ;;  %6414 = vmatprep.mubr.bf16.mxu1 %v6192_v23 }
 0x611   :  { %v6015_v33 = vadd.f32 %v6014_v28, %v10051_v37  ;;  %v6016_v53 = vpop.f32.mrb[215].mxu1  ;;  %6415 = vmatmul.mubr.bf16.gmra.mrb[16].mxu1 %v6191_v50  ;;  %v6139_v2 = vmax.f32 %v6011_v40, 0.0 }
 0x612   :  { %v6017_v6 = vadd.f32 %v6016_v53, %v10054_v4  ;;  %v6140_v9 = vmax.f32 %v6013_v52, 0.0 }
 0x613   :  { %v6141_v29 = vmax.f32 %v6015_v33, 0.0 }
 0x614   :  { %v6142_v27 = vmax.f32 %v6017_v6, 0.0 }
 0x615   :  { %v6193_v11 = vpack.c.bf16 %v6141_v29, %v6139_v2 }
 0x616   :  { %v6194_v49 = vpack.c.bf16 %v6142_v27, %v6140_v9  ;;  %v6020_v56 = vpop.f32.mrb[216].mxu1 }
 0x617   :  { %v6021_v10 = vadd.f32 %v6020_v56, %v10051_v37  ;;  %v6022_v31 = vpop.f32.mrb[217].mxu1 }
 0x618   :  { %v6023_v5 = vadd.f32 %v6022_v31, %v10054_v4  ;;  %v6024_v39 = vpop.f32.mrb[218].mxu1  ;;  %6422 = vmatprep.mubr.bf16.mxu1 %v6194_v49 }
 0x619   :  { %v6025_v17 = vadd.f32 %v6024_v39, %v10051_v37  ;;  %v6026_v41 = vpop.f32.mrb[219].mxu1  ;;  %6423 = vmatmul.mubr.bf16.gmra.mrb[20].mxu1 %v6193_v11  ;;  %v6143_v35 = vmax.f32 %v6021_v10, 0.0 }
 0x61a   :  { %v6027_v58 = vadd.f32 %v6026_v41, %v10054_v4  ;;  %v6144_v32 = vmax.f32 %v6023_v5, 0.0 }
 0x61b   :  { %v6145_v14 = vmax.f32 %v6025_v17, 0.0 }
 0x61c   :  { %v6146_v7 = vmax.f32 %v6027_v58, 0.0 }
 0x61d   :  { %v6195_v48 = vpack.c.bf16 %v6145_v14, %v6143_v35 }
 0x61e   :  { %v6196_v12 = vpack.c.bf16 %v6146_v7, %v6144_v32  ;;  %v6030_v55 = vpop.f32.mrb[220].mxu1 }
 0x61f   :  { %v6031_v46 = vadd.f32 %v6030_v55, %v10051_v37  ;;  %v6032_v38 = vpop.f32.mrb[221].mxu1 }
 0x620   :  { %v6033_v45 = vadd.f32 %v6032_v38, %v10054_v4  ;;  %v6034_v63 = vpop.f32.mrb[222].mxu1  ;;  %6430 = vmatprep.mubr.bf16.mxu1 %v6196_v12 }
 0x621   :  { %v6035_v20 = vadd.f32 %v6034_v63, %v10051_v37  ;;  %v6036_v44 = vpop.f32.mrb[223].mxu1  ;;  %6431 = vmatmul.mubr.bf16.gmra.mrb[24].mxu1 %v6195_v48  ;;  %v6147_v34 = vmax.f32 %v6031_v46, 0.0 }
 0x622   :  { %v6037_v21 = vadd.f32 %v6036_v44, %v10054_v4  ;;  %v6148_v47 = vmax.f32 %v6033_v45, 0.0 }
 0x623   :  { %v6149_v26 = vmax.f32 %v6035_v20, 0.0 }
 0x624   :  { %v6150_v18 = vmax.f32 %v6037_v21, 0.0 }
 0x625   :  { %v6197_v15 = vpack.c.bf16 %v6149_v26, %v6147_v34 }
 0x626   :  { %v6198_v42 = vpack.c.bf16 %v6150_v18, %v6148_v47  ;;  %v6040_v13 = vpop.f32.mrb[224].mxu1 }
 0x627   :  { %v6041_v54 = vadd.f32 %v6040_v13, %v10051_v37  ;;  %v6042_v8 = vpop.f32.mrb[225].mxu1 }
 0x628   :  { %v6043_v25 = vadd.f32 %v6042_v8, %v10054_v4  ;;  %v6044_v24 = vpop.f32.mrb[226].mxu1  ;;  %6438 = vmatprep.mubr.bf16.mxu1 %v6198_v42 }
 0x629   :  { %v6045_v0 = vadd.f32 %v6044_v24, %v10051_v37  ;;  %v6046_v59 = vpop.f32.mrb[227].mxu1  ;;  %6439 = vmatmul.mubr.bf16.gmra.mrb[28].mxu1 %v6197_v15  ;;  %v6151_v43 = vmax.f32 %v6041_v54, 0.0 }
 0x62a   :  { %v6047_v62 = vadd.f32 %v6046_v59, %v10054_v4  ;;  %v6152_v60 = vmax.f32 %v6043_v25, 0.0 }
 0x62b   :  { %v6153_v19 = vmax.f32 %v6045_v0, 0.0 }
 0x62c   :  { %v6154_v30 = vmax.f32 %v6047_v62, 0.0 }
 0x62d   :  { %v6199_v57 = vpack.c.bf16 %v6153_v19, %v6151_v43 }
 0x62e   :  { %v6200_v3 = vpack.c.bf16 %v6154_v30, %v6152_v60  ;;  %v6050_v36 = vpop.f32.mrb[228].mxu1 }
 0x62f   :  { %v6051_v51 = vadd.f32 %v6050_v36, %v10051_v37  ;;  %v6052_v22 = vpop.f32.mrb[229].mxu1 }
 0x630   :  { %v6053_v1 = vadd.f32 %v6052_v22, %v10054_v4  ;;  %v6054_v50 = vpop.f32.mrb[230].mxu1  ;;  %6446 = vmatprep.mubr.bf16.mxu1 %v6200_v3 }
 0x631   :  { %v6055_v23 = vadd.f32 %v6054_v50, %v10051_v37  ;;  %v6056_v61 = vpop.f32.mrb[231].mxu1  ;;  %6447 = vmatmul.mubr.bf16.gmra.mrb[32].mxu1 %v6199_v57  ;;  %v6155_v16 = vmax.f32 %v6051_v51, 0.0 }
 0x632   :  { %v6057_v40 = vadd.f32 %v6056_v61, %v10054_v4  ;;  %v6156_v28 = vmax.f32 %v6053_v1, 0.0 }
 0x633   :  { %v6157_v52 = vmax.f32 %v6055_v23, 0.0 }
 0x634   :  { %v6158_v33 = vmax.f32 %v6057_v40, 0.0 }
 0x635   :  { %v6201_v53 = vpack.c.bf16 %v6157_v52, %v6155_v16 }
 0x636   :  { %v6202_v6 = vpack.c.bf16 %v6158_v33, %v6156_v28  ;;  %v6060_v2 = vpop.f32.mrb[232].mxu1 }
 0x637   :  { %v6061_v29 = vadd.f32 %v6060_v2, %v10051_v37  ;;  %v6062_v9 = vpop.f32.mrb[233].mxu1 }
 0x638   :  { %v6063_v27 = vadd.f32 %v6062_v9, %v10054_v4  ;;  %v6064_v11 = vpop.f32.mrb[234].mxu1  ;;  %6454 = vmatprep.mubr.bf16.mxu1 %v6202_v6 }
 0x639   :  { %v6065_v49 = vadd.f32 %v6064_v11, %v10051_v37  ;;  %v6066_v56 = vpop.f32.mrb[235].mxu1  ;;  %6455 = vmatmul.mubr.bf16.gmra.mrb[36].mxu1 %v6201_v53  ;;  %v6159_v31 = vmax.f32 %v6061_v29, 0.0 }
 0x63a   :  { %v6067_v10 = vadd.f32 %v6066_v56, %v10054_v4  ;;  %v6160_v39 = vmax.f32 %v6063_v27, 0.0 }
 0x63b   :  { %v6161_v5 = vmax.f32 %v6065_v49, 0.0 }
 0x63c   :  { %v6162_v17 = vmax.f32 %v6067_v10, 0.0 }
 0x63d   :  { %v6203_v41 = vpack.c.bf16 %v6161_v5, %v6159_v31 }
 0x63e   :  { %v6204_v58 = vpack.c.bf16 %v6162_v17, %v6160_v39  ;;  %v6070_v35 = vpop.f32.mrb[236].mxu1 }
 0x63f   :  { %v6071_v14 = vadd.f32 %v6070_v35, %v10051_v37  ;;  %v6072_v32 = vpop.f32.mrb[237].mxu1 }
 0x640   :  { %v6073_v7 = vadd.f32 %v6072_v32, %v10054_v4  ;;  %v6074_v48 = vpop.f32.mrb[238].mxu1  ;;  %6462 = vmatprep.mubr.bf16.mxu1 %v6204_v58 }
 0x641   :  { %v6075_v12 = vadd.f32 %v6074_v48, %v10051_v37  ;;  %v6076_v55 = vpop.f32.mrb[239].mxu1  ;;  %6463 = vmatmul.mubr.bf16.gmra.mrb[40].mxu1 %v6203_v41  ;;  %v6163_v38 = vmax.f32 %v6071_v14, 0.0 }
 0x642   :  { %v6077_v46 = vadd.f32 %v6076_v55, %v10054_v4  ;;  %v6164_v63 = vmax.f32 %v6073_v7, 0.0 }
 0x643   :  { %v6165_v45 = vmax.f32 %v6075_v12, 0.0 }
 0x644   :  { %v6166_v20 = vmax.f32 %v6077_v46, 0.0 }
 0x645   :  { %v6205_v44 = vpack.c.bf16 %v6165_v45, %v6163_v38  ;;  %v10123_v45 = vld [vmem:[%s10182_s10] ss:$0 sm:$0xff]  ;;  %s8481_s10 = smov [#allocation10]  }
 0x646   :  { %v6206_v21 = vpack.c.bf16 %v6166_v20, %v6164_v63  ;;  %v6080_v34 = vpop.f32.mrb[240].mxu1  ;;  %s6548_s3 = sshll.u32 %s8481_s10, 4  ;;  %s6549_s3 = int_to_ptr.vmem [resolvable:$true] %s6548_s3 }
 0x647   :  { %v6081_v26 = vadd.f32 %v6080_v34, %v10051_v37  ;;  %v6082_v47 = vpop.f32.mrb[241].mxu1  ;;  %s8440_s13 = scalar_lea.vmem %s6549_s3, 4096  ;;  %p8445_p5 = scmp.lt.s32.totalorder %s6549_s3, %s6549_s3 }
 0x648   :  { %v6083_v18 = vadd.f32 %v6082_v47, %v10054_v4  ;;  %v6084_v15 = vpop.f32.mrb[242].mxu1  ;;  %6470 = vmatprep.mubr.bf16.mxu1 %v6206_v21  ;;  %p8441_p4 = scmp.ne.s32.totalorder %s6549_s3, %s8440_s13  ;;  %p8446_p6 = scmp.lt.s32.totalorder %s8440_s13, %s8440_s13 }
 0x649   :  { %v6085_v42 = vadd.f32 %v6084_v15, %v10051_v37  ;;  %v6086_v13 = vpop.f32.mrb[243].mxu1  ;;  %6471 = vmatmul.mubr.bf16.gmra.mrb[44].mxu1 %v6205_v44  ;;  %v6167_v8 = vmax.f32 %v6081_v26, 0.0 }
 0x64a   :  { %v6087_v54 = vadd.f32 %v6086_v13, %v10054_v4  ;;  %v6168_v24 = vmax.f32 %v6083_v18, 0.0  ;;  %p8447_p7 = por %p8446_p6, %p8445_p5 }
 0x64b   :  { %v6169_v25 = vmax.f32 %v6085_v42, 0.0 }
 0x64c   :  { %v6170_v0 = vmax.f32 %v6087_v54, 0.0  ;;  %p8448_p8 = pnand %p8447_p7, %p8441_p4 }
 0x64d   :  { %v6207_v59 = vpack.c.bf16 %v6169_v25, %v6167_v8 }
 0x64e   :  { %v6208_v62 = vpack.c.bf16 %v6170_v0, %v6168_v24  ;;  %v6090_v43 = vpop.f32.mrb[244].mxu1 }
 0x64f   :  { %v6091_v19 = vadd.f32 %v6090_v43, %v10051_v37  ;;  %v6092_v60 = vpop.f32.mrb[245].mxu1 }
 0x650   :  { %v6093_v30 = vadd.f32 %v6092_v60, %v10054_v4  ;;  %v6094_v57 = vpop.f32.mrb[246].mxu1  ;;  %6478 = vmatprep.mubr.bf16.mxu1 %v6208_v62 }
 0x651   :  { %v6095_v3 = vadd.f32 %v6094_v57, %v10051_v37  ;;  %v6096_v36 = vpop.f32.mrb[247].mxu1  ;;  %6479 = vmatmul.mubr.bf16.gmra.mrb[48].mxu1 %v6207_v59  ;;  %v6171_v22 = vmax.f32 %v6091_v19, 0.0 }
 0x652   :  { %v6097_v51 = vadd.f32 %v6096_v36, %v10054_v4  ;;  %v6172_v50 = vmax.f32 %v6093_v30, 0.0 }
 0x653   :  { %v6173_v1 = vmax.f32 %v6095_v3, 0.0 }
 0x654   :  { %v6174_v23 = vmax.f32 %v6097_v51, 0.0 }
 0x655   :  { %v6209_v61 = vpack.c.bf16 %v6173_v1, %v6171_v22 }
 0x656   :  { %v6210_v40 = vpack.c.bf16 %v6174_v23, %v6172_v50  ;;  %v6100_v16 = vpop.f32.mrb[248].mxu1 }
 0x657   :  { %v6101_v52 = vadd.f32 %v6100_v16, %v10051_v37  ;;  %v6102_v28 = vpop.f32.mrb[249].mxu1 }
 0x658   :  { %v6103_v33 = vadd.f32 %v6102_v28, %v10054_v4  ;;  %v6104_v53 = vpop.f32.mrb[250].mxu1  ;;  %6486 = vmatprep.mubr.bf16.mxu1 %v6210_v40 }
 0x659   :  { %v6105_v6 = vadd.f32 %v6104_v53, %v10051_v37  ;;  %v6106_v2 = vpop.f32.mrb[251].mxu1  ;;  %6487 = vmatmul.mubr.bf16.gmra.mrb[52].mxu1 %v6209_v61  ;;  %v6175_v9 = vmax.f32 %v6101_v52, 0.0 }
 0x65a   :  { %v6107_v29 = vadd.f32 %v6106_v2, %v10054_v4  ;;  %v6176_v11 = vmax.f32 %v6103_v33, 0.0 }
 0x65b   :  { %v6177_v27 = vmax.f32 %v6105_v6, 0.0 }
 0x65c   :  { %v6178_v49 = vmax.f32 %v6107_v29, 0.0 }
 0x65d   :  { %v6211_v56 = vpack.c.bf16 %v6177_v27, %v6175_v9 }
 0x65e   :  { %v6212_v10 = vpack.c.bf16 %v6178_v49, %v6176_v11  ;;  %v6110_v31 = vpop.f32.mrb[252].mxu1 }
 0x65f   :  { %v6111_v5 = vadd.f32 %v6110_v31, %v10051_v37  ;;  %v6112_v39 = vpop.f32.mrb[253].mxu1 }
 0x660   :  { %v6113_v17 = vadd.f32 %v6112_v39, %v10054_v4  ;;  %v6114_v41 = vpop.f32.mrb[254].mxu1  ;;  %6494 = vmatprep.mubr.bf16.mxu1 %v6212_v10 }
 0x661   :  { %v6115_v58 = vadd.f32 %v6114_v41, %v10051_v37  ;;  %v6116_v35 = vpop.f32.mrb[255].mxu1  ;;  %6495 = vmatmul.mubr.bf16.gmra.mrb[56].mxu1 %v6211_v56  ;;  %v6179_v32 = vmax.f32 %v6111_v5, 0.0 }
 0x662   :  { %v6117_v14 = vadd.f32 %v6116_v35, %v10054_v4  ;;  %v6180_v48 = vmax.f32 %v6113_v17, 0.0 }
 0x663   :  { %v6181_v7 = vmax.f32 %v6115_v58, 0.0 }
 0x664   :  { %v6182_v12 = vmax.f32 %v6117_v14, 0.0 }
 0x665   :  { %v6213_v55 = vpack.c.bf16 %v6181_v7, %v6179_v32 }
 0x666   :  { %v6214_v46 = vpack.c.bf16 %v6182_v12, %v6180_v48 }
 0x668   :  { %6502 = vmatprep.mubr.bf16.mxu1 %v6214_v46 }
 0x669   :  { %6503 = vmatmul.mubr.bf16.gmra.mrb[60].mxu1 %v6213_v55 }
 0x6c4   :  { %v7043_v38 = vpop.f32.mrb[0].mxu1 }
 0x6c5   :  { %v7044_v63 = vpop.f32.mrb[1].mxu1 }
 0x6c6   :  { %v7045_v37 = vadd.f32 %v7044_v63, %v7043_v38  ;;  %v7046_v20 = vpop.f32.mrb[2].mxu1 }
 0x6c7   :  { %v7047_v44 = vpop.f32.mrb[3].mxu1 }
 0x6c8   :  { %v6385_v4 = vadd.f32 %v7045_v37, %v10123_v45  ;;  %v7048_v21 = vadd.f32 %v7047_v44, %v7046_v20 }
 0x6ca   :  { %6511 = vst [vmem:[#allocation10] sm:$0xff] %v6385_v4  ;;  %v6388_v34 = vadd.f32 %v7048_v21, %v10123_v45 }
 0x6cc   :  { %6512 = vst [vmem:[#allocation10 + $0x8] sm:$0xff] %v6388_v34  ;;  %v7049_v26 = vpop.f32.mrb[4].mxu1 }
 0x6cd   :  { %v7050_v47 = vpop.f32.mrb[5].mxu1 }
 0x6ce   :  { %v7051_v18 = vadd.f32 %v7050_v47, %v7049_v26  ;;  %v7052_v15 = vpop.f32.mrb[6].mxu1 }
 0x6cf   :  { %v7053_v42 = vpop.f32.mrb[7].mxu1 }
 0x6d0   :  { %v6393_v13 = vadd.f32 %v7051_v18, %v10123_v45  ;;  %v7054_v54 = vadd.f32 %v7053_v42, %v7052_v15 }
 0x6d2   :  { %6513 = vst [vmem:[#allocation10 + $0x10] sm:$0xff] %v6393_v13  ;;  %v6396_v8 = vadd.f32 %v7054_v54, %v10123_v45 }
 0x6d4   :  { %6514 = vst [vmem:[#allocation10 + $0x18] sm:$0xff] %v6396_v8  ;;  %v7055_v25 = vpop.f32.mrb[8].mxu1 }
 0x6d5   :  { %v7056_v24 = vpop.f32.mrb[9].mxu1 }
 0x6d6   :  { %v7057_v0 = vadd.f32 %v7056_v24, %v7055_v25  ;;  %v7058_v59 = vpop.f32.mrb[10].mxu1 }
 0x6d7   :  { %v7059_v62 = vpop.f32.mrb[11].mxu1 }
 0x6d8   :  { %v6401_v43 = vadd.f32 %v7057_v0, %v10123_v45  ;;  %v7060_v19 = vadd.f32 %v7059_v62, %v7058_v59 }
 0x6da   :  { %6515 = vst [vmem:[#allocation10 + $0x20] sm:$0xff] %v6401_v43  ;;  %v6404_v60 = vadd.f32 %v7060_v19, %v10123_v45 }
 0x6dc   :  { %6516 = vst [vmem:[#allocation10 + $0x28] sm:$0xff] %v6404_v60  ;;  %v7061_v30 = vpop.f32.mrb[12].mxu1 }
 0x6dd   :  { %v7062_v57 = vpop.f32.mrb[13].mxu1 }
 0x6de   :  { %v7063_v3 = vadd.f32 %v7062_v57, %v7061_v30  ;;  %v7064_v36 = vpop.f32.mrb[14].mxu1 }
 0x6df   :  { %v7065_v51 = vpop.f32.mrb[15].mxu1 }
 0x6e0   :  { %v6409_v22 = vadd.f32 %v7063_v3, %v10123_v45  ;;  %v7066_v1 = vadd.f32 %v7065_v51, %v7064_v36 }
 0x6e2   :  { %6517 = vst [vmem:[#allocation10 + $0x30] sm:$0xff] %v6409_v22  ;;  %v6412_v50 = vadd.f32 %v7066_v1, %v10123_v45 }
 0x6e4   :  { %6518 = vst [vmem:[#allocation10 + $0x38] sm:$0xff] %v6412_v50  ;;  %v7067_v23 = vpop.f32.mrb[16].mxu1 }
 0x6e5   :  { %v7068_v61 = vpop.f32.mrb[17].mxu1 }
 0x6e6   :  { %v7069_v40 = vadd.f32 %v7068_v61, %v7067_v23  ;;  %v7070_v16 = vpop.f32.mrb[18].mxu1 }
 0x6e7   :  { %v7071_v52 = vpop.f32.mrb[19].mxu1 }
 0x6e8   :  { %v6417_v28 = vadd.f32 %v7069_v40, %v10123_v45  ;;  %v7072_v33 = vadd.f32 %v7071_v52, %v7070_v16 }
 0x6ea   :  { %6519 = vst [vmem:[#allocation10 + $0x40] sm:$0xff] %v6417_v28  ;;  %v6420_v53 = vadd.f32 %v7072_v33, %v10123_v45 }
 0x6ec   :  { %6520 = vst [vmem:[#allocation10 + $0x48] sm:$0xff] %v6420_v53  ;;  %v7073_v6 = vpop.f32.mrb[20].mxu1 }
 0x6ed   :  { %v7074_v2 = vpop.f32.mrb[21].mxu1 }
 0x6ee   :  { %v7075_v29 = vadd.f32 %v7074_v2, %v7073_v6  ;;  %v7076_v9 = vpop.f32.mrb[22].mxu1 }
 0x6ef   :  { %v7077_v27 = vpop.f32.mrb[23].mxu1 }
 0x6f0   :  { %v6425_v11 = vadd.f32 %v7075_v29, %v10123_v45  ;;  %v7078_v49 = vadd.f32 %v7077_v27, %v7076_v9 }
 0x6f2   :  { %6521 = vst [vmem:[#allocation10 + $0x50] sm:$0xff] %v6425_v11  ;;  %v6428_v56 = vadd.f32 %v7078_v49, %v10123_v45 }
 0x6f4   :  { %6522 = vst [vmem:[#allocation10 + $0x58] sm:$0xff] %v6428_v56  ;;  %v7079_v10 = vpop.f32.mrb[24].mxu1 }
 0x6f5   :  { %v7080_v31 = vpop.f32.mrb[25].mxu1 }
 0x6f6   :  { %v7081_v5 = vadd.f32 %v7080_v31, %v7079_v10  ;;  %v7082_v39 = vpop.f32.mrb[26].mxu1 }
 0x6f7   :  { %v7083_v17 = vpop.f32.mrb[27].mxu1 }
 0x6f8   :  { %v6433_v41 = vadd.f32 %v7081_v5, %v10123_v45  ;;  %v7084_v58 = vadd.f32 %v7083_v17, %v7082_v39 }
 0x6fa   :  { %6523 = vst [vmem:[#allocation10 + $0x60] sm:$0xff] %v6433_v41  ;;  %v6436_v35 = vadd.f32 %v7084_v58, %v10123_v45 }
 0x6fc   :  { %6524 = vst [vmem:[#allocation10 + $0x68] sm:$0xff] %v6436_v35  ;;  %v7085_v14 = vpop.f32.mrb[28].mxu1 }
 0x6fd   :  { %v7086_v32 = vpop.f32.mrb[29].mxu1 }
 0x6fe   :  { %v7087_v7 = vadd.f32 %v7086_v32, %v7085_v14  ;;  %v7088_v48 = vpop.f32.mrb[30].mxu1 }
 0x6ff   :  { %v7089_v12 = vpop.f32.mrb[31].mxu1 }
 0x700   :  { %v6441_v55 = vadd.f32 %v7087_v7, %v10123_v45  ;;  %v7090_v46 = vadd.f32 %v7089_v12, %v7088_v48 }
 0x702   :  { %6525 = vst [vmem:[#allocation10 + $0x70] sm:$0xff] %v6441_v55  ;;  %v6444_v38 = vadd.f32 %v7090_v46, %v10123_v45 }
 0x704   :  { %6526 = vst [vmem:[#allocation10 + $0x78] sm:$0xff] %v6444_v38  ;;  %v7091_v63 = vpop.f32.mrb[32].mxu1 }
 0x705   :  { %v7092_v37 = vpop.f32.mrb[33].mxu1 }
 0x706   :  { %v7093_v20 = vadd.f32 %v7092_v37, %v7091_v63  ;;  %v7094_v44 = vpop.f32.mrb[34].mxu1 }
 0x707   :  { %v7095_v4 = vpop.f32.mrb[35].mxu1 }
 0x708   :  { %v6449_v21 = vadd.f32 %v7093_v20, %v10123_v45  ;;  %v7096_v34 = vadd.f32 %v7095_v4, %v7094_v44 }
 0x70a   :  { %6527 = vst [vmem:[#allocation10 + $0x80] sm:$0xff] %v6449_v21  ;;  %v6452_v26 = vadd.f32 %v7096_v34, %v10123_v45 }
 0x70c   :  { %6528 = vst [vmem:[#allocation10 + $0x88] sm:$0xff] %v6452_v26  ;;  %v7097_v47 = vpop.f32.mrb[36].mxu1 }
 0x70d   :  { %v7098_v18 = vpop.f32.mrb[37].mxu1 }
 0x70e   :  { %v7099_v15 = vadd.f32 %v7098_v18, %v7097_v47  ;;  %v7100_v42 = vpop.f32.mrb[38].mxu1 }
 0x70f   :  { %v7101_v13 = vpop.f32.mrb[39].mxu1 }
 0x710   :  { %v6457_v54 = vadd.f32 %v7099_v15, %v10123_v45  ;;  %v7102_v8 = vadd.f32 %v7101_v13, %v7100_v42 }
 0x712   :  { %6529 = vst [vmem:[#allocation10 + $0x90] sm:$0xff] %v6457_v54  ;;  %v6460_v25 = vadd.f32 %v7102_v8, %v10123_v45 }
 0x714   :  { %6530 = vst [vmem:[#allocation10 + $0x98] sm:$0xff] %v6460_v25  ;;  %v7103_v24 = vpop.f32.mrb[40].mxu1 }
 0x715   :  { %v7104_v0 = vpop.f32.mrb[41].mxu1 }
 0x716   :  { %v7105_v59 = vadd.f32 %v7104_v0, %v7103_v24  ;;  %v7106_v62 = vpop.f32.mrb[42].mxu1 }
 0x717   :  { %v7107_v43 = vpop.f32.mrb[43].mxu1 }
 0x718   :  { %v6465_v19 = vadd.f32 %v7105_v59, %v10123_v45  ;;  %v7108_v60 = vadd.f32 %v7107_v43, %v7106_v62 }
 0x71a   :  { %6531 = vst [vmem:[#allocation10 + $0xa0] sm:$0xff] %v6465_v19  ;;  %v6468_v30 = vadd.f32 %v7108_v60, %v10123_v45 }
 0x71c   :  { %6532 = vst [vmem:[#allocation10 + $0xa8] sm:$0xff] %v6468_v30  ;;  %v7109_v57 = vpop.f32.mrb[44].mxu1 }
 0x71d   :  { %v7110_v3 = vpop.f32.mrb[45].mxu1 }
 0x71e   :  { %v7111_v36 = vadd.f32 %v7110_v3, %v7109_v57  ;;  %v7112_v51 = vpop.f32.mrb[46].mxu1 }
 0x71f   :  { %v7113_v22 = vpop.f32.mrb[47].mxu1 }
 0x720   :  { %v6473_v1 = vadd.f32 %v7111_v36, %v10123_v45  ;;  %v7114_v50 = vadd.f32 %v7113_v22, %v7112_v51 }
 0x722   :  { %6533 = vst [vmem:[#allocation10 + $0xb0] sm:$0xff] %v6473_v1  ;;  %v6476_v23 = vadd.f32 %v7114_v50, %v10123_v45 }
 0x724   :  { %6534 = vst [vmem:[#allocation10 + $0xb8] sm:$0xff] %v6476_v23  ;;  %v7115_v61 = vpop.f32.mrb[48].mxu1 }
 0x725   :  { %v7116_v40 = vpop.f32.mrb[49].mxu1 }
 0x726   :  { %v7117_v16 = vadd.f32 %v7116_v40, %v7115_v61  ;;  %v7118_v52 = vpop.f32.mrb[50].mxu1 }
 0x727   :  { %v7119_v28 = vpop.f32.mrb[51].mxu1 }
 0x728   :  { %v6481_v33 = vadd.f32 %v7117_v16, %v10123_v45  ;;  %v7120_v53 = vadd.f32 %v7119_v28, %v7118_v52 }
 0x72a   :  { %6535 = vst [vmem:[#allocation10 + $0xc0] sm:$0xff] %v6481_v33  ;;  %v6484_v6 = vadd.f32 %v7120_v53, %v10123_v45 }
 0x72c   :  { %6536 = vst [vmem:[#allocation10 + $0xc8] sm:$0xff] %v6484_v6  ;;  %v7121_v2 = vpop.f32.mrb[52].mxu1 }
 0x72d   :  { %v7122_v29 = vpop.f32.mrb[53].mxu1 }
 0x72e   :  { %v7123_v9 = vadd.f32 %v7122_v29, %v7121_v2  ;;  %v7124_v27 = vpop.f32.mrb[54].mxu1 }
 0x72f   :  { %v7125_v11 = vpop.f32.mrb[55].mxu1 }
 0x730   :  { %v6489_v49 = vadd.f32 %v7123_v9, %v10123_v45  ;;  %v7126_v56 = vadd.f32 %v7125_v11, %v7124_v27 }
 0x732   :  { %6537 = vst [vmem:[#allocation10 + $0xd0] sm:$0xff] %v6489_v49  ;;  %v6492_v10 = vadd.f32 %v7126_v56, %v10123_v45 }
 0x734   :  { %6538 = vst [vmem:[#allocation10 + $0xd8] sm:$0xff] %v6492_v10  ;;  %v7127_v31 = vpop.f32.mrb[56].mxu1 }
 0x735   :  { %v7128_v5 = vpop.f32.mrb[57].mxu1 }
 0x736   :  { %v7129_v39 = vadd.f32 %v7128_v5, %v7127_v31  ;;  %v7130_v17 = vpop.f32.mrb[58].mxu1 }
 0x737   :  { %v7131_v41 = vpop.f32.mrb[59].mxu1 }
 0x738   :  { %v6497_v58 = vadd.f32 %v7129_v39, %v10123_v45  ;;  %v7132_v35 = vadd.f32 %v7131_v41, %v7130_v17 }
 0x73a   :  { %6539 = vst [vmem:[#allocation10 + $0xe0] sm:$0xff] %v6497_v58  ;;  %v6500_v14 = vadd.f32 %v7132_v35, %v10123_v45 }
 0x73c   :  { %6540 = vst [vmem:[#allocation10 + $0xe8] sm:$0xff] %v6500_v14  ;;  %v7133_v32 = vpop.f32.mrb[60].mxu1 }
 0x73d   :  { %v7134_v7 = vpop.f32.mrb[61].mxu1 }
 0x73e   :  { %v7135_v48 = vadd.f32 %v7134_v7, %v7133_v32  ;;  %v7136_v12 = vpop.f32.mrb[62].mxu1 }
 0x73f   :  { %v7137_v55 = vpop.f32.mrb[63].mxu1 }
 0x740   :  { %v6505_v46 = vadd.f32 %v7135_v48, %v10123_v45  ;;  %v7138_v38 = vadd.f32 %v7137_v55, %v7136_v12 }
 0x742   :  { %6541 = vst [vmem:[#allocation10 + $0xf0] sm:$0xff] %v6505_v46  ;;  %v6508_v63 = vadd.f32 %v7138_v38, %v10123_v45 }
 0x744   :  { %6542 = vst [vmem:[#allocation10 + $0xf8] sm:$0xff] %v6508_v63 }
 0x745   :  { %8451 = shalt.err (!%p8448_p8)
}
 0x746   :  { %s8452_s5 = scalar_lea.hbm %s10183_s11, 4096 }
 0x747   :  { %p8453_p9 = scmp.ne.s32.totalorder %s10183_s11, %s8452_s5  ;;  %p8456_p10 = scmp.lt.u32.totalorder %s8452_s5, %s10183_s11 }
 0x749   :  { %p8458_p11 = pnand %p8456_p10, %p8453_p9 }
 0x74b   :  { %8461 = shalt.err (!%p8458_p11)
}
 0x74c   :  { %6554 = dma.vmem_to_hbm [thread:$0]  %s6549_s3, 4096, %s10183_s11, [#allocation4], %s8471_s27, %s8471_s27, %s8472_s28  }
 0x74d   :  { %8468 = dma.done.wait [#allocation4], 4096  }
 0x74e   :  { %8469 = vsyncadd [#allocation4], 4294963200 }
 0x74f   :  { %6558 = vsyncpa [#allocation3], 1 }
 0x750   :  { %6559 = vsyncpa [#allocation6], 1 }
 0x751   :  { %6560 = vsyncpa [#allocation9], 1 }
 0x752   :  { %6561 = vsyncpa [#allocation4], 1 }

</bundles_post_ra>
